<compile_context>
chip_gen: v7x
topology: tpu7x:2x2x1
jax: 0.10.0
libtpu: 0.0.40
codegen_flags: <defaults>
</compile_context>

<pallas_src>
import math

import jax
import jax.numpy as jnp
from jax.experimental import pallas as pl
from jax.experimental.pallas import tpu as pltpu

LANE = 128
SUBLANE = 8


def _round_up(n, m):
    return ((n + m - 1) // m) * m


def _pad_to(a, shape):
    out = jnp.zeros(shape, a.dtype)
    return out.at[tuple(slice(0, s) for s in a.shape)].set(a)


# ---------------------------------------------------------------------------
# Fully fused GRU model kernel (all layers + all timesteps + ReLU + FC head).
# ---------------------------------------------------------------------------
def make_gru_kernel(n_layers, T, Bp, Ip, Hp):
    H3 = 3 * Hp

    def kernel(*refs):
        # Argument layout:
        #   inputs : x[T*Bp, Ip], h0[L, Bp, Hp],
        #            per layer: wx[Kp,3Hp], wh[Hp,3Hp], bx[1,3Hp], bh[1,3Hp],
        #            wfc[Hp,Op], bfc[1,Op]
        #   outputs: fc_out[Bp,Op], h_final[L,Bp,Hp]
        x_ref, h0_ref = refs[0], refs[1]
        layer_refs = [refs[2 + 4 * l: 6 + 4 * l] for l in range(n_layers)]
        wfc_ref = refs[2 + 4 * n_layers]
        bfc_ref = refs[3 + 4 * n_layers]
        fc_out_ref = refs[4 + 4 * n_layers]
        hfin_ref = refs[5 + 4 * n_layers]

        # ---- Hoisted layer-0 input projection ------------------------------
        # One MXU matmul with M = T*Bp for the whole sequence instead of T
        # tiny (M = Bp) matmuls inside the serial chain.
        wx0_ref, _, bx0_ref, _ = layer_refs[0]
        gx0_all = (jnp.dot(x_ref[...], wx0_ref[...],
                           preferred_element_type=jnp.float32)
                   + bx0_ref[...])                     # [T*Bp, 3Hp]

        # ---- Load / broadcast per-layer recurrent params ONCE ---------------
        wh = [layer_refs[l][1][...] for l in range(n_layers)]
        bh = [jnp.broadcast_to(layer_refs[l][3][...], (Bp, H3))
              for l in range(n_layers)]
        wx = [None] + [layer_refs[l][0][...] for l in range(1, n_layers)]
        bx = [None] + [jnp.broadcast_to(layer_refs[l][2][...], (Bp, H3))
                       for l in range(1, n_layers)]

        def cell(gx, gh, h):
            # Gate slices at lane offsets 0 / Hp / 2Hp (multiples of 128).
            r = jax.nn.sigmoid(gx[:, :Hp] + gh[:, :Hp])
            z = jax.nn.sigmoid(gx[:, Hp:2 * Hp] + gh[:, Hp:2 * Hp])
            n = jnp.tanh(gx[:, 2 * Hp:] + r * gh[:, 2 * Hp:])
            return n + z * (h - n)         # == (1 - z) * n + z * h

        hs = [h0_ref[l] for l in range(n_layers)]

        # ---- Serial time recurrence (trace-time unrolled; T is small/static).
        # Single grid step => no per-step grid overhead; hidden state carried
        # in VMEM values; one recurrent matmul per layer per step.
        for t in range(T):
            gx = gx0_all[t * Bp:(t + 1) * Bp, :]       # sublane-aligned slice
            gh = jnp.dot(hs[0], wh[0],
                         preferred_element_type=jnp.float32) + bh[0]
            hs[0] = cell(gx, gh, hs[0])
            for l in range(1, n_layers):
                gx_l = jnp.dot(hs[l - 1], wx[l],
                               preferred_element_type=jnp.float32) + bx[l]
                gh_l = jnp.dot(hs[l], wh[l],
                               preferred_element_type=jnp.float32) + bh[l]
                hs[l] = cell(gx_l, gh_l, hs[l])

        # ---- Final hidden states + fused ReLU + FC head ---------------------
        for l in range(n_layers):
            hfin_ref[l] = hs[l]
        h_relu = jnp.maximum(hs[-1], 0.0)
        fc_out_ref[...] = (jnp.dot(h_relu, wfc_ref[...],
                                   preferred_element_type=jnp.float32)
                           + bfc_ref[...])

    return kernel


# ---------------------------------------------------------------------------
# Parameter preparation (PyTorch nn.GRU layout -> fused, padded kernel layout)
# ---------------------------------------------------------------------------
def prepare_layer_params(w_ih, w_hh, b_ih, b_hh, Kp, Hp):
    """w_ih: [3H, K], w_hh: [3H, H], b_ih/b_hh: [3H] (PyTorch gate order r,z,n).

    Returns fused, zero-padded:
        wx [Kp, 3Hp], wh [Hp, 3Hp], bx [1, 3Hp], bh [1, 3Hp]
    with gate g occupying lanes [g*Hp, g*Hp + H).
    r/z biases are pre-summed into bx; the n-gate h-side bias stays in bh
    because the reset gate multiplies (h @ Whn + b_hn).
    """
    H = w_hh.shape[1]

    def split(a):
        return [a[i * H:(i + 1) * H] for i in range(3)]

    wi = split(w_ih)          # each [H, K]
    whg = split(w_hh)         # each [H, H]
    bi = split(b_ih)
    bhg = split(b_hh)

    wx = jnp.zeros((Kp, 3 * Hp), jnp.float32)
    wh = jnp.zeros((Hp, 3 * Hp), jnp.float32)
    for g in range(3):
        wx = wx.at[:wi[g].shape[1], g * Hp:g * Hp + H].set(wi[g].T)
        wh = wh.at[:H, g * Hp:g * Hp + H].set(whg[g].T)

    bx = jnp.zeros((1, 3 * Hp), jnp.float32)
    bh = jnp.zeros((1, 3 * Hp), jnp.float32)
    bx = bx.at[0, 0 * Hp:0 * Hp + H].set(bi[0] + bhg[0])   # pre-summed r bias
    bx = bx.at[0, 1 * Hp:1 * Hp + H].set(bi[1] + bhg[1])   # pre-summed z bias
    bx = bx.at[0, 2 * Hp:2 * Hp + H].set(bi[2])            # x-side n bias
    bh = bh.at[0, 2 * Hp:2 * Hp + H].set(bhg[2])           # h-side n bias
    return wx, wh, bx, bh


def gru_model_forward(x, h0, layer_params, fc_params, hidden_dim, output_dim):
    """x: [B, T, input_dim] (batch_first), h0: [n_layers, B, H].
    Returns (fc(relu(out[:, -1])) -> [B, output_dim], final hidden [L, B, H])."""
    B, T, I = x.shape
    L = len(layer_params)
    Hp = _round_up(hidden_dim, LANE)
    Ip = _round_up(I, LANE)
    Op = _round_up(output_dim, LANE)
    Bp = _round_up(B, SUBLANE)

    # Time-major, batch/lane-padded input, flattened to [T*Bp, Ip] so the
    # layer-0 projection is a single MXU matmul with M = T*Bp.
    x_tm = _pad_to(jnp.transpose(x, (1, 0, 2)), (T, Bp, Ip)).reshape(T * Bp, Ip)
    # Zero-padded h0 keeps padded hidden lanes exactly 0 through the recurrence.
    h0_p = _pad_to(h0, (L, Bp, Hp))

    flat = []
    for l, (w_ih, w_hh, b_ih, b_hh) in enumerate(layer_params):
        Kp = Ip if l == 0 else Hp
        flat += list(prepare_layer_params(w_ih, w_hh, b_ih, b_hh, Kp, Hp))
    # TODO(synk): nn.GRU inter-layer dropout is training-only; this is the
    # eval/inference forward pass, so it is intentionally omitted.

    w_fc, b_fc = fc_params                                  # [O, H], [O]
    w_fc_p = _pad_to(w_fc.T, (Hp, Op))
    b_fc_p = _pad_to(b_fc[None, :], (1, Op))

    inputs = [x_tm, h0_p] + flat + [w_fc_p, b_fc_p]

    kernel = make_gru_kernel(L, T, Bp, Ip, Hp)

    def full(a):
        return pl.BlockSpec(a.shape, lambda *_: (0,) * a.ndim)

    fc_out, h_fin = pl.pallas_call(
        kernel,
        out_shape=(jax.ShapeDtypeStruct((Bp, Op), jnp.float32),
                   jax.ShapeDtypeStruct((L, Bp, Hp), jnp.float32)),
        in_specs=[full(a) for a in inputs],
        out_specs=(pl.BlockSpec((Bp, Op), lambda: (0, 0)),
                   pl.BlockSpec((L, Bp, Hp), lambda: (0, 0, 0))),
        compiler_params=pltpu.CompilerParams(
            # Plenty at these shapes; only matters when scaling hidden_dim.
            vmem_limit_bytes=32 * 1024 * 1024),
    )(*inputs)

    return fc_out[:B, :output_dim], h_fin[:, :B, :hidden_dim]


# ---------------------------------------------------------------------------
# Pure-JAX reference (mirrors PyTorch nn.GRU + ReLU + Linear, eval mode).
# ---------------------------------------------------------------------------
def reference_forward(x, h0, layer_params, fc_params, hidden_dim):
    B, T, _ = x.shape
    H = hidden_dim
    layer_in = x
    hs = []
    for l, (w_ih, w_hh, b_ih, b_hh) in enumerate(layer_params):
        h = h0[l]
        outs = []
        for t in range(T):
            xt = layer_in[:, t]
            gx = xt @ w_ih.T + b_ih
            gh = h @ w_hh.T + b_hh
            r = jax.nn.sigmoid(gx[:, :H] + gh[:, :H])
            z = jax.nn.sigmoid(gx[:, H:2 * H] + gh[:, H:2 * H])
            n = jnp.tanh(gx[:, 2 * H:] + r * gh[:, 2 * H:])
            h = n + z * (h - n)
            outs.append(h)
        layer_in = jnp.stack(outs, axis=1)
        hs.append(h)
    w_fc, b_fc = fc_params
    out = jnp.maximum(layer_in[:, -1], 0.0) @ w_fc.T + b_fc
    return out, jnp.stack(hs, axis=0)


# ---------------------------------------------------------------------------
# Deterministic parameter init (uniform(-1/sqrt(H), 1/sqrt(H)), like PyTorch).
# ---------------------------------------------------------------------------
def init_params(key, input_dim, hidden_dim, output_dim, n_layers):
    std = 1.0 / math.sqrt(hidden_dim)
    layers = []
    for l in range(n_layers):
        k_in = input_dim if l == 0 else hidden_dim
        key, k1, k2, k3, k4 = jax.random.split(key, 5)
        w_ih = jax.random.uniform(k1, (3 * hidden_dim, k_in), jnp.float32, -std, std)
        w_hh = jax.random.uniform(k2, (3 * hidden_dim, hidden_dim), jnp.float32, -std, std)
        b_ih = jax.random.uniform(k3, (3 * hidden_dim,), jnp.float32, -std, std)
        b_hh = jax.random.uniform(k4, (3 * hidden_dim,), jnp.float32, -std, std)
        layers.append((w_ih, w_hh, b_ih, b_hh))
    key, k1, k2 = jax.random.split(key, 3)
    w_fc = jax.random.uniform(k1, (output_dim, hidden_dim), jnp.float32, -std, std)
    b_fc = jax.random.uniform(k2, (output_dim,), jnp.float32, -std, std)
    return layers, (w_fc, b_fc)


if __name__ == "__main__":
    batch = 2
    seq_len = 8
    input_dim = 1
    hidden_dim = 32
    output_dim = 1
    n_layers = 2

    key = jax.random.PRNGKey(0)
    key, kx = jax.random.split(key)
    x = jax.random.normal(kx, (batch, seq_len, input_dim), jnp.float32)
    h0 = jnp.zeros((n_layers, batch, hidden_dim), jnp.float32)

    layer_params, fc_params = init_params(key, input_dim, hidden_dim,
                                          output_dim, n_layers)

    out, h = gru_model_forward(x, h0, layer_params, fc_params,
                               hidden_dim, output_dim)
    out, h = jax.block_until_ready((out, h))

    ref_out, ref_h = reference_forward(x, h0, layer_params, fc_params, hidden_dim)

    assert out.shape == (batch, output_dim)
    assert h.shape == (n_layers, batch, hidden_dim)
    assert jnp.allclose(out, ref_out, atol=1e-4, rtol=1e-4)
    assert jnp.allclose(h, ref_h, atol=1e-4, rtol=1e-4)

    print("KERNEL_OK")
</pallas_src>

<mosaic_0001>
module attributes {stable_mosaic.version = 11 : i64} {
  func.func @kernel(%arg0: memref<64x128xf32, #tpu.memory_space<vmem>>, %arg1: memref<2x8x128xf32, #tpu.memory_space<vmem>>, %arg2: memref<128x384xf32, #tpu.memory_space<vmem>>, %arg3: memref<128x384xf32, #tpu.memory_space<vmem>>, %arg4: memref<1x384xf32, #tpu.memory_space<vmem>>, %arg5: memref<1x384xf32, #tpu.memory_space<vmem>>, %arg6: memref<128x384xf32, #tpu.memory_space<vmem>>, %arg7: memref<128x384xf32, #tpu.memory_space<vmem>>, %arg8: memref<1x384xf32, #tpu.memory_space<vmem>>, %arg9: memref<1x384xf32, #tpu.memory_space<vmem>>, %arg10: memref<128x128xf32, #tpu.memory_space<vmem>>, %arg11: memref<1x128xf32, #tpu.memory_space<vmem>>, %arg12: memref<8x128xf32, #tpu.memory_space<vmem>>, %arg13: memref<2x8x128xf32, #tpu.memory_space<vmem>>) attributes {dimension_semantics = [], scalar_prefetch = 0 : i64, scratch_operands = 0 : i64, tpu.core_type = #tpu.core_type<tc>} {
    %c0 = arith.constant 0 : index
    %c0_0 = arith.constant 0 : index
    %0 = vector.load %arg0[%c0, %c0_0] : memref<64x128xf32, #tpu.memory_space<vmem>>, vector<64x128xf32>
    %c0_1 = arith.constant 0 : index
    %c0_2 = arith.constant 0 : index
    %1 = vector.load %arg2[%c0_1, %c0_2] : memref<128x384xf32, #tpu.memory_space<vmem>>, vector<128x384xf32>
    %cst = arith.constant dense<0.000000e+00> : vector<64x384xf32>
    %2 = tpu.matmul %0, %1, %cst {dimension_numbers = #tpu.dot_dimension_numbers<[1], [0], [0], [1], [0, 0, 1, 1], [], []>} : vector<64x128xf32>, vector<128x384xf32>, vector<64x384xf32> -> vector<64x384xf32>
    %c0_3 = arith.constant 0 : index
    %c0_4 = arith.constant 0 : index
    %3 = vector.load %arg4[%c0_3, %c0_4] : memref<1x384xf32, #tpu.memory_space<vmem>>, vector<1x384xf32>
    %4 = vector.broadcast %3 : vector<1x384xf32> to vector<64x384xf32>
    %5 = arith.addf %2, %4 : vector<64x384xf32>
    %c0_5 = arith.constant 0 : index
    %c0_6 = arith.constant 0 : index
    %6 = vector.load %arg3[%c0_5, %c0_6] : memref<128x384xf32, #tpu.memory_space<vmem>>, vector<128x384xf32>
    %c0_7 = arith.constant 0 : index
    %c0_8 = arith.constant 0 : index
    %7 = vector.load %arg7[%c0_7, %c0_8] : memref<128x384xf32, #tpu.memory_space<vmem>>, vector<128x384xf32>
    %c0_9 = arith.constant 0 : index
    %c0_10 = arith.constant 0 : index
    %8 = vector.load %arg5[%c0_9, %c0_10] : memref<1x384xf32, #tpu.memory_space<vmem>>, vector<1x384xf32>
    %9 = vector.shape_cast %8 : vector<1x384xf32> to vector<1x384xf32>
    %10 = vector.broadcast %9 : vector<1x384xf32> to vector<8x384xf32>
    %c0_11 = arith.constant 0 : index
    %c0_12 = arith.constant 0 : index
    %11 = vector.load %arg9[%c0_11, %c0_12] : memref<1x384xf32, #tpu.memory_space<vmem>>, vector<1x384xf32>
    %12 = vector.shape_cast %11 : vector<1x384xf32> to vector<1x384xf32>
    %13 = vector.broadcast %12 : vector<1x384xf32> to vector<8x384xf32>
    %c0_13 = arith.constant 0 : index
    %c0_14 = arith.constant 0 : index
    %14 = vector.load %arg6[%c0_13, %c0_14] : memref<128x384xf32, #tpu.memory_space<vmem>>, vector<128x384xf32>
    %c0_15 = arith.constant 0 : index
    %c0_16 = arith.constant 0 : index
    %15 = vector.load %arg8[%c0_15, %c0_16] : memref<1x384xf32, #tpu.memory_space<vmem>>, vector<1x384xf32>
    %16 = vector.shape_cast %15 : vector<1x384xf32> to vector<1x384xf32>
    %17 = vector.broadcast %16 : vector<1x384xf32> to vector<8x384xf32>
    %c0_17 = arith.constant 0 : index
    %c0_18 = arith.constant 0 : index
    %c0_19 = arith.constant 0 : index
    %18 = vector.load %arg1[%c0_17, %c0_18, %c0_19] : memref<2x8x128xf32, #tpu.memory_space<vmem>>, vector<1x8x128xf32>
    %19 = vector.shape_cast %18 : vector<1x8x128xf32> to vector<8x128xf32>
    %c1 = arith.constant 1 : index
    %c0_20 = arith.constant 0 : index
    %c0_21 = arith.constant 0 : index
    %20 = vector.load %arg1[%c1, %c0_20, %c0_21] : memref<2x8x128xf32, #tpu.memory_space<vmem>>, vector<1x8x128xf32>
    %21 = vector.shape_cast %20 : vector<1x8x128xf32> to vector<8x128xf32>
    %22 = vector.extract_strided_slice %5 {offsets = [0, 0], sizes = [8, 384], strides = [1, 1]} : vector<64x384xf32> to vector<8x384xf32>
    %cst_22 = arith.constant dense<0.000000e+00> : vector<8x384xf32>
    %23 = tpu.matmul %19, %6, %cst_22 {dimension_numbers = #tpu.dot_dimension_numbers<[1], [0], [0], [1], [0, 0, 1, 1], [], []>} : vector<8x128xf32>, vector<128x384xf32>, vector<8x384xf32> -> vector<8x384xf32>
    %24 = arith.addf %23, %10 : vector<8x384xf32>
    %25 = vector.extract_strided_slice %22 {offsets = [0, 0], sizes = [8, 128], strides = [1, 1]} : vector<8x384xf32> to vector<8x128xf32>
    %26 = vector.extract_strided_slice %24 {offsets = [0, 0], sizes = [8, 128], strides = [1, 1]} : vector<8x384xf32> to vector<8x128xf32>
    %27 = arith.addf %25, %26 : vector<8x128xf32>
    %28 = arith.negf %27 : vector<8x128xf32>
    %29 = math.exp %28 : vector<8x128xf32>
    %cst_23 = arith.constant 1.000000e+00 : f32
    %30 = vector.broadcast %cst_23 : f32 to vector<8x128xf32>
    %31 = arith.addf %30, %29 : vector<8x128xf32>
    %32 = arith.divf %30, %31 : vector<8x128xf32>
    %33 = vector.extract_strided_slice %22 {offsets = [0, 128], sizes = [8, 128], strides = [1, 1]} : vector<8x384xf32> to vector<8x128xf32>
    %34 = vector.extract_strided_slice %24 {offsets = [0, 128], sizes = [8, 128], strides = [1, 1]} : vector<8x384xf32> to vector<8x128xf32>
    %35 = arith.addf %33, %34 : vector<8x128xf32>
    %36 = arith.negf %35 : vector<8x128xf32>
    %37 = math.exp %36 : vector<8x128xf32>
    %cst_24 = arith.constant 1.000000e+00 : f32
    %38 = vector.broadcast %cst_24 : f32 to vector<8x128xf32>
    %39 = arith.addf %38, %37 : vector<8x128xf32>
    %40 = arith.divf %38, %39 : vector<8x128xf32>
    %41 = vector.extract_strided_slice %22 {offsets = [0, 256], sizes = [8, 128], strides = [1, 1]} : vector<8x384xf32> to vector<8x128xf32>
    %42 = vector.extract_strided_slice %24 {offsets = [0, 256], sizes = [8, 128], strides = [1, 1]} : vector<8x384xf32> to vector<8x128xf32>
    %43 = arith.mulf %32, %42 : vector<8x128xf32>
    %44 = arith.addf %41, %43 : vector<8x128xf32>
    %45 = math.tanh %44 : vector<8x128xf32>
    %46 = arith.subf %19, %45 : vector<8x128xf32>
    %47 = arith.mulf %40, %46 : vector<8x128xf32>
    %48 = arith.addf %45, %47 : vector<8x128xf32>
    %cst_25 = arith.constant dense<0.000000e+00> : vector<8x384xf32>
    %49 = tpu.matmul %48, %14, %cst_25 {dimension_numbers = #tpu.dot_dimension_numbers<[1], [0], [0], [1], [0, 0, 1, 1], [], []>} : vector<8x128xf32>, vector<128x384xf32>, vector<8x384xf32> -> vector<8x384xf32>
    %50 = arith.addf %49, %17 : vector<8x384xf32>
    %cst_26 = arith.constant dense<0.000000e+00> : vector<8x384xf32>
    %51 = tpu.matmul %21, %7, %cst_26 {dimension_numbers = #tpu.dot_dimension_numbers<[1], [0], [0], [1], [0, 0, 1, 1], [], []>} : vector<8x128xf32>, vector<128x384xf32>, vector<8x384xf32> -> vector<8x384xf32>
    %52 = arith.addf %51, %13 : vector<8x384xf32>
    %53 = vector.extract_strided_slice %50 {offsets = [0, 0], sizes = [8, 128], strides = [1, 1]} : vector<8x384xf32> to vector<8x128xf32>
    %54 = vector.extract_strided_slice %52 {offsets = [0, 0], sizes = [8, 128], strides = [1, 1]} : vector<8x384xf32> to vector<8x128xf32>
    %55 = arith.addf %53, %54 : vector<8x128xf32>
    %56 = arith.negf %55 : vector<8x128xf32>
    %57 = math.exp %56 : vector<8x128xf32>
    %cst_27 = arith.constant 1.000000e+00 : f32
    %58 = vector.broadcast %cst_27 : f32 to vector<8x128xf32>
    %59 = arith.addf %58, %57 : vector<8x128xf32>
    %60 = arith.divf %58, %59 : vector<8x128xf32>
    %61 = vector.extract_strided_slice %50 {offsets = [0, 128], sizes = [8, 128], strides = [1, 1]} : vector<8x384xf32> to vector<8x128xf32>
    %62 = vector.extract_strided_slice %52 {offsets = [0, 128], sizes = [8, 128], strides = [1, 1]} : vector<8x384xf32> to vector<8x128xf32>
    %63 = arith.addf %61, %62 : vector<8x128xf32>
    %64 = arith.negf %63 : vector<8x128xf32>
    %65 = math.exp %64 : vector<8x128xf32>
    %cst_28 = arith.constant 1.000000e+00 : f32
    %66 = vector.broadcast %cst_28 : f32 to vector<8x128xf32>
    %67 = arith.addf %66, %65 : vector<8x128xf32>
    %68 = arith.divf %66, %67 : vector<8x128xf32>
    %69 = vector.extract_strided_slice %50 {offsets = [0, 256], sizes = [8, 128], strides = [1, 1]} : vector<8x384xf32> to vector<8x128xf32>
    %70 = vector.extract_strided_slice %52 {offsets = [0, 256], sizes = [8, 128], strides = [1, 1]} : vector<8x384xf32> to vector<8x128xf32>
    %71 = arith.mulf %60, %70 : vector<8x128xf32>
    %72 = arith.addf %69, %71 : vector<8x128xf32>
    %73 = math.tanh %72 : vector<8x128xf32>
    %74 = arith.subf %21, %73 : vector<8x128xf32>
    %75 = arith.mulf %68, %74 : vector<8x128xf32>
    %76 = arith.addf %73, %75 : vector<8x128xf32>
    %77 = vector.extract_strided_slice %5 {offsets = [8, 0], sizes = [8, 384], strides = [1, 1]} : vector<64x384xf32> to vector<8x384xf32>
    %cst_29 = arith.constant dense<0.000000e+00> : vector<8x384xf32>
    %78 = tpu.matmul %48, %6, %cst_29 {dimension_numbers = #tpu.dot_dimension_numbers<[1], [0], [0], [1], [0, 0, 1, 1], [], []>} : vector<8x128xf32>, vector<128x384xf32>, vector<8x384xf32> -> vector<8x384xf32>
    %79 = arith.addf %78, %10 : vector<8x384xf32>
    %80 = vector.extract_strided_slice %77 {offsets = [0, 0], sizes = [8, 128], strides = [1, 1]} : vector<8x384xf32> to vector<8x128xf32>
    %81 = vector.extract_strided_slice %79 {offsets = [0, 0], sizes = [8, 128], strides = [1, 1]} : vector<8x384xf32> to vector<8x128xf32>
    %82 = arith.addf %80, %81 : vector<8x128xf32>
    %83 = arith.negf %82 : vector<8x128xf32>
    %84 = math.exp %83 : vector<8x128xf32>
    %cst_30 = arith.constant 1.000000e+00 : f32
    %85 = vector.broadcast %cst_30 : f32 to vector<8x128xf32>
    %86 = arith.addf %85, %84 : vector<8x128xf32>
    %87 = arith.divf %85, %86 : vector<8x128xf32>
    %88 = vector.extract_strided_slice %77 {offsets = [0, 128], sizes = [8, 128], strides = [1, 1]} : vector<8x384xf32> to vector<8x128xf32>
    %89 = vector.extract_strided_slice %79 {offsets = [0, 128], sizes = [8, 128], strides = [1, 1]} : vector<8x384xf32> to vector<8x128xf32>
    %90 = arith.addf %88, %89 : vector<8x128xf32>
    %91 = arith.negf %90 : vector<8x128xf32>
    %92 = math.exp %91 : vector<8x128xf32>
    %cst_31 = arith.constant 1.000000e+00 : f32
    %93 = vector.broadcast %cst_31 : f32 to vector<8x128xf32>
    %94 = arith.addf %93, %92 : vector<8x128xf32>
    %95 = arith.divf %93, %94 : vector<8x128xf32>
    %96 = vector.extract_strided_slice %77 {offsets = [0, 256], sizes = [8, 128], strides = [1, 1]} : vector<8x384xf32> to vector<8x128xf32>
    %97 = vector.extract_strided_slice %79 {offsets = [0, 256], sizes = [8, 128], strides = [1, 1]} : vector<8x384xf32> to vector<8x128xf32>
    %98 = arith.mulf %87, %97 : vector<8x128xf32>
    %99 = arith.addf %96, %98 : vector<8x128xf32>
    %100 = math.tanh %99 : vector<8x128xf32>
    %101 = arith.subf %48, %100 : vector<8x128xf32>
    %102 = arith.mulf %95, %101 : vector<8x128xf32>
    %103 = arith.addf %100, %102 : vector<8x128xf32>
    %cst_32 = arith.constant dense<0.000000e+00> : vector<8x384xf32>
    %104 = tpu.matmul %103, %14, %cst_32 {dimension_numbers = #tpu.dot_dimension_numbers<[1], [0], [0], [1], [0, 0, 1, 1], [], []>} : vector<8x128xf32>, vector<128x384xf32>, vector<8x384xf32> -> vector<8x384xf32>
    %105 = arith.addf %104, %17 : vector<8x384xf32>
    %cst_33 = arith.constant dense<0.000000e+00> : vector<8x384xf32>
    %106 = tpu.matmul %76, %7, %cst_33 {dimension_numbers = #tpu.dot_dimension_numbers<[1], [0], [0], [1], [0, 0, 1, 1], [], []>} : vector<8x128xf32>, vector<128x384xf32>, vector<8x384xf32> -> vector<8x384xf32>
    %107 = arith.addf %106, %13 : vector<8x384xf32>
    %108 = vector.extract_strided_slice %105 {offsets = [0, 0], sizes = [8, 128], strides = [1, 1]} : vector<8x384xf32> to vector<8x128xf32>
    %109 = vector.extract_strided_slice %107 {offsets = [0, 0], sizes = [8, 128], strides = [1, 1]} : vector<8x384xf32> to vector<8x128xf32>
    %110 = arith.addf %108, %109 : vector<8x128xf32>
    %111 = arith.negf %110 : vector<8x128xf32>
    %112 = math.exp %111 : vector<8x128xf32>
    %cst_34 = arith.constant 1.000000e+00 : f32
    %113 = vector.broadcast %cst_34 : f32 to vector<8x128xf32>
    %114 = arith.addf %113, %112 : vector<8x128xf32>
    %115 = arith.divf %113, %114 : vector<8x128xf32>
    %116 = vector.extract_strided_slice %105 {offsets = [0, 128], sizes = [8, 128], strides = [1, 1]} : vector<8x384xf32> to vector<8x128xf32>
    %117 = vector.extract_strided_slice %107 {offsets = [0, 128], sizes = [8, 128], strides = [1, 1]} : vector<8x384xf32> to vector<8x128xf32>
    %118 = arith.addf %116, %117 : vector<8x128xf32>
    %119 = arith.negf %118 : vector<8x128xf32>
    %120 = math.exp %119 : vector<8x128xf32>
    %cst_35 = arith.constant 1.000000e+00 : f32
    %121 = vector.broadcast %cst_35 : f32 to vector<8x128xf32>
    %122 = arith.addf %121, %120 : vector<8x128xf32>
    %123 = arith.divf %121, %122 : vector<8x128xf32>
    %124 = vector.extract_strided_slice %105 {offsets = [0, 256], sizes = [8, 128], strides = [1, 1]} : vector<8x384xf32> to vector<8x128xf32>
    %125 = vector.extract_strided_slice %107 {offsets = [0, 256], sizes = [8, 128], strides = [1, 1]} : vector<8x384xf32> to vector<8x128xf32>
    %126 = arith.mulf %115, %125 : vector<8x128xf32>
    %127 = arith.addf %124, %126 : vector<8x128xf32>
    %128 = math.tanh %127 : vector<8x128xf32>
    %129 = arith.subf %76, %128 : vector<8x128xf32>
    %130 = arith.mulf %123, %129 : vector<8x128xf32>
    %131 = arith.addf %128, %130 : vector<8x128xf32>
    %132 = vector.extract_strided_slice %5 {offsets = [16, 0], sizes = [8, 384], strides = [1, 1]} : vector<64x384xf32> to vector<8x384xf32>
    %cst_36 = arith.constant dense<0.000000e+00> : vector<8x384xf32>
    %133 = tpu.matmul %103, %6, %cst_36 {dimension_numbers = #tpu.dot_dimension_numbers<[1], [0], [0], [1], [0, 0, 1, 1], [], []>} : vector<8x128xf32>, vector<128x384xf32>, vector<8x384xf32> -> vector<8x384xf32>
    %134 = arith.addf %133, %10 : vector<8x384xf32>
    %135 = vector.extract_strided_slice %132 {offsets = [0, 0], sizes = [8, 128], strides = [1, 1]} : vector<8x384xf32> to vector<8x128xf32>
    %136 = vector.extract_strided_slice %134 {offsets = [0, 0], sizes = [8, 128], strides = [1, 1]} : vector<8x384xf32> to vector<8x128xf32>
    %137 = arith.addf %135, %136 : vector<8x128xf32>
    %138 = arith.negf %137 : vector<8x128xf32>
    %139 = math.exp %138 : vector<8x128xf32>
    %cst_37 = arith.constant 1.000000e+00 : f32
    %140 = vector.broadcast %cst_37 : f32 to vector<8x128xf32>
    %141 = arith.addf %140, %139 : vector<8x128xf32>
    %142 = arith.divf %140, %141 : vector<8x128xf32>
    %143 = vector.extract_strided_slice %132 {offsets = [0, 128], sizes = [8, 128], strides = [1, 1]} : vector<8x384xf32> to vector<8x128xf32>
    %144 = vector.extract_strided_slice %134 {offsets = [0, 128], sizes = [8, 128], strides = [1, 1]} : vector<8x384xf32> to vector<8x128xf32>
    %145 = arith.addf %143, %144 : vector<8x128xf32>
    %146 = arith.negf %145 : vector<8x128xf32>
    %147 = math.exp %146 : vector<8x128xf32>
    %cst_38 = arith.constant 1.000000e+00 : f32
    %148 = vector.broadcast %cst_38 : f32 to vector<8x128xf32>
    %149 = arith.addf %148, %147 : vector<8x128xf32>
    %150 = arith.divf %148, %149 : vector<8x128xf32>
    %151 = vector.extract_strided_slice %132 {offsets = [0, 256], sizes = [8, 128], strides = [1, 1]} : vector<8x384xf32> to vector<8x128xf32>
    %152 = vector.extract_strided_slice %134 {offsets = [0, 256], sizes = [8, 128], strides = [1, 1]} : vector<8x384xf32> to vector<8x128xf32>
    %153 = arith.mulf %142, %152 : vector<8x128xf32>
    %154 = arith.addf %151, %153 : vector<8x128xf32>
    %155 = math.tanh %154 : vector<8x128xf32>
    %156 = arith.subf %103, %155 : vector<8x128xf32>
    %157 = arith.mulf %150, %156 : vector<8x128xf32>
    %158 = arith.addf %155, %157 : vector<8x128xf32>
    %cst_39 = arith.constant dense<0.000000e+00> : vector<8x384xf32>
    %159 = tpu.matmul %158, %14, %cst_39 {dimension_numbers = #tpu.dot_dimension_numbers<[1], [0], [0], [1], [0, 0, 1, 1], [], []>} : vector<8x128xf32>, vector<128x384xf32>, vector<8x384xf32> -> vector<8x384xf32>
    %160 = arith.addf %159, %17 : vector<8x384xf32>
    %cst_40 = arith.constant dense<0.000000e+00> : vector<8x384xf32>
    %161 = tpu.matmul %131, %7, %cst_40 {dimension_numbers = #tpu.dot_dimension_numbers<[1], [0], [0], [1], [0, 0, 1, 1], [], []>} : vector<8x128xf32>, vector<128x384xf32>, vector<8x384xf32> -> vector<8x384xf32>
    %162 = arith.addf %161, %13 : vector<8x384xf32>
    %163 = vector.extract_strided_slice %160 {offsets = [0, 0], sizes = [8, 128], strides = [1, 1]} : vector<8x384xf32> to vector<8x128xf32>
    %164 = vector.extract_strided_slice %162 {offsets = [0, 0], sizes = [8, 128], strides = [1, 1]} : vector<8x384xf32> to vector<8x128xf32>
    %165 = arith.addf %163, %164 : vector<8x128xf32>
    %166 = arith.negf %165 : vector<8x128xf32>
    %167 = math.exp %166 : vector<8x128xf32>
    %cst_41 = arith.constant 1.000000e+00 : f32
    %168 = vector.broadcast %cst_41 : f32 to vector<8x128xf32>
    %169 = arith.addf %168, %167 : vector<8x128xf32>
    %170 = arith.divf %168, %169 : vector<8x128xf32>
    %171 = vector.extract_strided_slice %160 {offsets = [0, 128], sizes = [8, 128], strides = [1, 1]} : vector<8x384xf32> to vector<8x128xf32>
    %172 = vector.extract_strided_slice %162 {offsets = [0, 128], sizes = [8, 128], strides = [1, 1]} : vector<8x384xf32> to vector<8x128xf32>
    %173 = arith.addf %171, %172 : vector<8x128xf32>
    %174 = arith.negf %173 : vector<8x128xf32>
    %175 = math.exp %174 : vector<8x128xf32>
    %cst_42 = arith.constant 1.000000e+00 : f32
    %176 = vector.broadcast %cst_42 : f32 to vector<8x128xf32>
    %177 = arith.addf %176, %175 : vector<8x128xf32>
    %178 = arith.divf %176, %177 : vector<8x128xf32>
    %179 = vector.extract_strided_slice %160 {offsets = [0, 256], sizes = [8, 128], strides = [1, 1]} : vector<8x384xf32> to vector<8x128xf32>
    %180 = vector.extract_strided_slice %162 {offsets = [0, 256], sizes = [8, 128], strides = [1, 1]} : vector<8x384xf32> to vector<8x128xf32>
    %181 = arith.mulf %170, %180 : vector<8x128xf32>
    %182 = arith.addf %179, %181 : vector<8x128xf32>
    %183 = math.tanh %182 : vector<8x128xf32>
    %184 = arith.subf %131, %183 : vector<8x128xf32>
    %185 = arith.mulf %178, %184 : vector<8x128xf32>
    %186 = arith.addf %183, %185 : vector<8x128xf32>
    %187 = vector.extract_strided_slice %5 {offsets = [24, 0], sizes = [8, 384], strides = [1, 1]} : vector<64x384xf32> to vector<8x384xf32>
    %cst_43 = arith.constant dense<0.000000e+00> : vector<8x384xf32>
    %188 = tpu.matmul %158, %6, %cst_43 {dimension_numbers = #tpu.dot_dimension_numbers<[1], [0], [0], [1], [0, 0, 1, 1], [], []>} : vector<8x128xf32>, vector<128x384xf32>, vector<8x384xf32> -> vector<8x384xf32>
    %189 = arith.addf %188, %10 : vector<8x384xf32>
    %190 = vector.extract_strided_slice %187 {offsets = [0, 0], sizes = [8, 128], strides = [1, 1]} : vector<8x384xf32> to vector<8x128xf32>
    %191 = vector.extract_strided_slice %189 {offsets = [0, 0], sizes = [8, 128], strides = [1, 1]} : vector<8x384xf32> to vector<8x128xf32>
    %192 = arith.addf %190, %191 : vector<8x128xf32>
    %193 = arith.negf %192 : vector<8x128xf32>
    %194 = math.exp %193 : vector<8x128xf32>
    %cst_44 = arith.constant 1.000000e+00 : f32
    %195 = vector.broadcast %cst_44 : f32 to vector<8x128xf32>
    %196 = arith.addf %195, %194 : vector<8x128xf32>
    %197 = arith.divf %195, %196 : vector<8x128xf32>
    %198 = vector.extract_strided_slice %187 {offsets = [0, 128], sizes = [8, 128], strides = [1, 1]} : vector<8x384xf32> to vector<8x128xf32>
    %199 = vector.extract_strided_slice %189 {offsets = [0, 128], sizes = [8, 128], strides = [1, 1]} : vector<8x384xf32> to vector<8x128xf32>
    %200 = arith.addf %198, %199 : vector<8x128xf32>
    %201 = arith.negf %200 : vector<8x128xf32>
    %202 = math.exp %201 : vector<8x128xf32>
    %cst_45 = arith.constant 1.000000e+00 : f32
    %203 = vector.broadcast %cst_45 : f32 to vector<8x128xf32>
    %204 = arith.addf %203, %202 : vector<8x128xf32>
    %205 = arith.divf %203, %204 : vector<8x128xf32>
    %206 = vector.extract_strided_slice %187 {offsets = [0, 256], sizes = [8, 128], strides = [1, 1]} : vector<8x384xf32> to vector<8x128xf32>
    %207 = vector.extract_strided_slice %189 {offsets = [0, 256], sizes = [8, 128], strides = [1, 1]} : vector<8x384xf32> to vector<8x128xf32>
    %208 = arith.mulf %197, %207 : vector<8x128xf32>
    %209 = arith.addf %206, %208 : vector<8x128xf32>
    %210 = math.tanh %209 : vector<8x128xf32>
    %211 = arith.subf %158, %210 : vector<8x128xf32>
    %212 = arith.mulf %205, %211 : vector<8x128xf32>
    %213 = arith.addf %210, %212 : vector<8x128xf32>
    %cst_46 = arith.constant dense<0.000000e+00> : vector<8x384xf32>
    %214 = tpu.matmul %213, %14, %cst_46 {dimension_numbers = #tpu.dot_dimension_numbers<[1], [0], [0], [1], [0, 0, 1, 1], [], []>} : vector<8x128xf32>, vector<128x384xf32>, vector<8x384xf32> -> vector<8x384xf32>
    %215 = arith.addf %214, %17 : vector<8x384xf32>
    %cst_47 = arith.constant dense<0.000000e+00> : vector<8x384xf32>
    %216 = tpu.matmul %186, %7, %cst_47 {dimension_numbers = #tpu.dot_dimension_numbers<[1], [0], [0], [1], [0, 0, 1, 1], [], []>} : vector<8x128xf32>, vector<128x384xf32>, vector<8x384xf32> -> vector<8x384xf32>
    %217 = arith.addf %216, %13 : vector<8x384xf32>
    %218 = vector.extract_strided_slice %215 {offsets = [0, 0], sizes = [8, 128], strides = [1, 1]} : vector<8x384xf32> to vector<8x128xf32>
    %219 = vector.extract_strided_slice %217 {offsets = [0, 0], sizes = [8, 128], strides = [1, 1]} : vector<8x384xf32> to vector<8x128xf32>
    %220 = arith.addf %218, %219 : vector<8x128xf32>
    %221 = arith.negf %220 : vector<8x128xf32>
    %222 = math.exp %221 : vector<8x128xf32>
    %cst_48 = arith.constant 1.000000e+00 : f32
    %223 = vector.broadcast %cst_48 : f32 to vector<8x128xf32>
    %224 = arith.addf %223, %222 : vector<8x128xf32>
    %225 = arith.divf %223, %224 : vector<8x128xf32>
    %226 = vector.extract_strided_slice %215 {offsets = [0, 128], sizes = [8, 128], strides = [1, 1]} : vector<8x384xf32> to vector<8x128xf32>
    %227 = vector.extract_strided_slice %217 {offsets = [0, 128], sizes = [8, 128], strides = [1, 1]} : vector<8x384xf32> to vector<8x128xf32>
    %228 = arith.addf %226, %227 : vector<8x128xf32>
    %229 = arith.negf %228 : vector<8x128xf32>
    %230 = math.exp %229 : vector<8x128xf32>
    %cst_49 = arith.constant 1.000000e+00 : f32
    %231 = vector.broadcast %cst_49 : f32 to vector<8x128xf32>
    %232 = arith.addf %231, %230 : vector<8x128xf32>
    %233 = arith.divf %231, %232 : vector<8x128xf32>
    %234 = vector.extract_strided_slice %215 {offsets = [0, 256], sizes = [8, 128], strides = [1, 1]} : vector<8x384xf32> to vector<8x128xf32>
    %235 = vector.extract_strided_slice %217 {offsets = [0, 256], sizes = [8, 128], strides = [1, 1]} : vector<8x384xf32> to vector<8x128xf32>
    %236 = arith.mulf %225, %235 : vector<8x128xf32>
    %237 = arith.addf %234, %236 : vector<8x128xf32>
    %238 = math.tanh %237 : vector<8x128xf32>
    %239 = arith.subf %186, %238 : vector<8x128xf32>
    %240 = arith.mulf %233, %239 : vector<8x128xf32>
    %241 = arith.addf %238, %240 : vector<8x128xf32>
    %242 = vector.extract_strided_slice %5 {offsets = [32, 0], sizes = [8, 384], strides = [1, 1]} : vector<64x384xf32> to vector<8x384xf32>
    %cst_50 = arith.constant dense<0.000000e+00> : vector<8x384xf32>
    %243 = tpu.matmul %213, %6, %cst_50 {dimension_numbers = #tpu.dot_dimension_numbers<[1], [0], [0], [1], [0, 0, 1, 1], [], []>} : vector<8x128xf32>, vector<128x384xf32>, vector<8x384xf32> -> vector<8x384xf32>
    %244 = arith.addf %243, %10 : vector<8x384xf32>
    %245 = vector.extract_strided_slice %242 {offsets = [0, 0], sizes = [8, 128], strides = [1, 1]} : vector<8x384xf32> to vector<8x128xf32>
    %246 = vector.extract_strided_slice %244 {offsets = [0, 0], sizes = [8, 128], strides = [1, 1]} : vector<8x384xf32> to vector<8x128xf32>
    %247 = arith.addf %245, %246 : vector<8x128xf32>
    %248 = arith.negf %247 : vector<8x128xf32>
    %249 = math.exp %248 : vector<8x128xf32>
    %cst_51 = arith.constant 1.000000e+00 : f32
    %250 = vector.broadcast %cst_51 : f32 to vector<8x128xf32>
    %251 = arith.addf %250, %249 : vector<8x128xf32>
    %252 = arith.divf %250, %251 : vector<8x128xf32>
    %253 = vector.extract_strided_slice %242 {offsets = [0, 128], sizes = [8, 128], strides = [1, 1]} : vector<8x384xf32> to vector<8x128xf32>
    %254 = vector.extract_strided_slice %244 {offsets = [0, 128], sizes = [8, 128], strides = [1, 1]} : vector<8x384xf32> to vector<8x128xf32>
    %255 = arith.addf %253, %254 : vector<8x128xf32>
    %256 = arith.negf %255 : vector<8x128xf32>
    %257 = math.exp %256 : vector<8x128xf32>
    %cst_52 = arith.constant 1.000000e+00 : f32
    %258 = vector.broadcast %cst_52 : f32 to vector<8x128xf32>
    %259 = arith.addf %258, %257 : vector<8x128xf32>
    %260 = arith.divf %258, %259 : vector<8x128xf32>
    %261 = vector.extract_strided_slice %242 {offsets = [0, 256], sizes = [8, 128], strides = [1, 1]} : vector<8x384xf32> to vector<8x128xf32>
    %262 = vector.extract_strided_slice %244 {offsets = [0, 256], sizes = [8, 128], strides = [1, 1]} : vector<8x384xf32> to vector<8x128xf32>
    %263 = arith.mulf %252, %262 : vector<8x128xf32>
    %264 = arith.addf %261, %263 : vector<8x128xf32>
    %265 = math.tanh %264 : vector<8x128xf32>
    %266 = arith.subf %213, %265 : vector<8x128xf32>
    %267 = arith.mulf %260, %266 : vector<8x128xf32>
    %268 = arith.addf %265, %267 : vector<8x128xf32>
    %cst_53 = arith.constant dense<0.000000e+00> : vector<8x384xf32>
    %269 = tpu.matmul %268, %14, %cst_53 {dimension_numbers = #tpu.dot_dimension_numbers<[1], [0], [0], [1], [0, 0, 1, 1], [], []>} : vector<8x128xf32>, vector<128x384xf32>, vector<8x384xf32> -> vector<8x384xf32>
    %270 = arith.addf %269, %17 : vector<8x384xf32>
    %cst_54 = arith.constant dense<0.000000e+00> : vector<8x384xf32>
    %271 = tpu.matmul %241, %7, %cst_54 {dimension_numbers = #tpu.dot_dimension_numbers<[1], [0], [0], [1], [0, 0, 1, 1], [], []>} : vector<8x128xf32>, vector<128x384xf32>, vector<8x384xf32> -> vector<8x384xf32>
    %272 = arith.addf %271, %13 : vector<8x384xf32>
    %273 = vector.extract_strided_slice %270 {offsets = [0, 0], sizes = [8, 128], strides = [1, 1]} : vector<8x384xf32> to vector<8x128xf32>
    %274 = vector.extract_strided_slice %272 {offsets = [0, 0], sizes = [8, 128], strides = [1, 1]} : vector<8x384xf32> to vector<8x128xf32>
    %275 = arith.addf %273, %274 : vector<8x128xf32>
    %276 = arith.negf %275 : vector<8x128xf32>
    %277 = math.exp %276 : vector<8x128xf32>
    %cst_55 = arith.constant 1.000000e+00 : f32
    %278 = vector.broadcast %cst_55 : f32 to vector<8x128xf32>
    %279 = arith.addf %278, %277 : vector<8x128xf32>
    %280 = arith.divf %278, %279 : vector<8x128xf32>
    %281 = vector.extract_strided_slice %270 {offsets = [0, 128], sizes = [8, 128], strides = [1, 1]} : vector<8x384xf32> to vector<8x128xf32>
    %282 = vector.extract_strided_slice %272 {offsets = [0, 128], sizes = [8, 128], strides = [1, 1]} : vector<8x384xf32> to vector<8x128xf32>
    %283 = arith.addf %281, %282 : vector<8x128xf32>
    %284 = arith.negf %283 : vector<8x128xf32>
    %285 = math.exp %284 : vector<8x128xf32>
    %cst_56 = arith.constant 1.000000e+00 : f32
    %286 = vector.broadcast %cst_56 : f32 to vector<8x128xf32>
    %287 = arith.addf %286, %285 : vector<8x128xf32>
    %288 = arith.divf %286, %287 : vector<8x128xf32>
    %289 = vector.extract_strided_slice %270 {offsets = [0, 256], sizes = [8, 128], strides = [1, 1]} : vector<8x384xf32> to vector<8x128xf32>
    %290 = vector.extract_strided_slice %272 {offsets = [0, 256], sizes = [8, 128], strides = [1, 1]} : vector<8x384xf32> to vector<8x128xf32>
    %291 = arith.mulf %280, %290 : vector<8x128xf32>
    %292 = arith.addf %289, %291 : vector<8x128xf32>
    %293 = math.tanh %292 : vector<8x128xf32>
    %294 = arith.subf %241, %293 : vector<8x128xf32>
    %295 = arith.mulf %288, %294 : vector<8x128xf32>
    %296 = arith.addf %293, %295 : vector<8x128xf32>
    %297 = vector.extract_strided_slice %5 {offsets = [40, 0], sizes = [8, 384], strides = [1, 1]} : vector<64x384xf32> to vector<8x384xf32>
    %cst_57 = arith.constant dense<0.000000e+00> : vector<8x384xf32>
    %298 = tpu.matmul %268, %6, %cst_57 {dimension_numbers = #tpu.dot_dimension_numbers<[1], [0], [0], [1], [0, 0, 1, 1], [], []>} : vector<8x128xf32>, vector<128x384xf32>, vector<8x384xf32> -> vector<8x384xf32>
    %299 = arith.addf %298, %10 : vector<8x384xf32>
    %300 = vector.extract_strided_slice %297 {offsets = [0, 0], sizes = [8, 128], strides = [1, 1]} : vector<8x384xf32> to vector<8x128xf32>
    %301 = vector.extract_strided_slice %299 {offsets = [0, 0], sizes = [8, 128], strides = [1, 1]} : vector<8x384xf32> to vector<8x128xf32>
    %302 = arith.addf %300, %301 : vector<8x128xf32>
    %303 = arith.negf %302 : vector<8x128xf32>
    %304 = math.exp %303 : vector<8x128xf32>
    %cst_58 = arith.constant 1.000000e+00 : f32
    %305 = vector.broadcast %cst_58 : f32 to vector<8x128xf32>
    %306 = arith.addf %305, %304 : vector<8x128xf32>
    %307 = arith.divf %305, %306 : vector<8x128xf32>
    %308 = vector.extract_strided_slice %297 {offsets = [0, 128], sizes = [8, 128], strides = [1, 1]} : vector<8x384xf32> to vector<8x128xf32>
    %309 = vector.extract_strided_slice %299 {offsets = [0, 128], sizes = [8, 128], strides = [1, 1]} : vector<8x384xf32> to vector<8x128xf32>
    %310 = arith.addf %308, %309 : vector<8x128xf32>
    %311 = arith.negf %310 : vector<8x128xf32>
    %312 = math.exp %311 : vector<8x128xf32>
    %cst_59 = arith.constant 1.000000e+00 : f32
    %313 = vector.broadcast %cst_59 : f32 to vector<8x128xf32>
    %314 = arith.addf %313, %312 : vector<8x128xf32>
    %315 = arith.divf %313, %314 : vector<8x128xf32>
    %316 = vector.extract_strided_slice %297 {offsets = [0, 256], sizes = [8, 128], strides = [1, 1]} : vector<8x384xf32> to vector<8x128xf32>
    %317 = vector.extract_strided_slice %299 {offsets = [0, 256], sizes = [8, 128], strides = [1, 1]} : vector<8x384xf32> to vector<8x128xf32>
    %318 = arith.mulf %307, %317 : vector<8x128xf32>
    %319 = arith.addf %316, %318 : vector<8x128xf32>
    %320 = math.tanh %319 : vector<8x128xf32>
    %321 = arith.subf %268, %320 : vector<8x128xf32>
    %322 = arith.mulf %315, %321 : vector<8x128xf32>
    %323 = arith.addf %320, %322 : vector<8x128xf32>
    %cst_60 = arith.constant dense<0.000000e+00> : vector<8x384xf32>
    %324 = tpu.matmul %323, %14, %cst_60 {dimension_numbers = #tpu.dot_dimension_numbers<[1], [0], [0], [1], [0, 0, 1, 1], [], []>} : vector<8x128xf32>, vector<128x384xf32>, vector<8x384xf32> -> vector<8x384xf32>
    %325 = arith.addf %324, %17 : vector<8x384xf32>
    %cst_61 = arith.constant dense<0.000000e+00> : vector<8x384xf32>
    %326 = tpu.matmul %296, %7, %cst_61 {dimension_numbers = #tpu.dot_dimension_numbers<[1], [0], [0], [1], [0, 0, 1, 1], [], []>} : vector<8x128xf32>, vector<128x384xf32>, vector<8x384xf32> -> vector<8x384xf32>
    %327 = arith.addf %326, %13 : vector<8x384xf32>
    %328 = vector.extract_strided_slice %325 {offsets = [0, 0], sizes = [8, 128], strides = [1, 1]} : vector<8x384xf32> to vector<8x128xf32>
    %329 = vector.extract_strided_slice %327 {offsets = [0, 0], sizes = [8, 128], strides = [1, 1]} : vector<8x384xf32> to vector<8x128xf32>
    %330 = arith.addf %328, %329 : vector<8x128xf32>
    %331 = arith.negf %330 : vector<8x128xf32>
    %332 = math.exp %331 : vector<8x128xf32>
    %cst_62 = arith.constant 1.000000e+00 : f32
    %333 = vector.broadcast %cst_62 : f32 to vector<8x128xf32>
    %334 = arith.addf %333, %332 : vector<8x128xf32>
    %335 = arith.divf %333, %334 : vector<8x128xf32>
    %336 = vector.extract_strided_slice %325 {offsets = [0, 128], sizes = [8, 128], strides = [1, 1]} : vector<8x384xf32> to vector<8x128xf32>
    %337 = vector.extract_strided_slice %327 {offsets = [0, 128], sizes = [8, 128], strides = [1, 1]} : vector<8x384xf32> to vector<8x128xf32>
    %338 = arith.addf %336, %337 : vector<8x128xf32>
    %339 = arith.negf %338 : vector<8x128xf32>
    %340 = math.exp %339 : vector<8x128xf32>
    %cst_63 = arith.constant 1.000000e+00 : f32
    %341 = vector.broadcast %cst_63 : f32 to vector<8x128xf32>
    %342 = arith.addf %341, %340 : vector<8x128xf32>
    %343 = arith.divf %341, %342 : vector<8x128xf32>
    %344 = vector.extract_strided_slice %325 {offsets = [0, 256], sizes = [8, 128], strides = [1, 1]} : vector<8x384xf32> to vector<8x128xf32>
    %345 = vector.extract_strided_slice %327 {offsets = [0, 256], sizes = [8, 128], strides = [1, 1]} : vector<8x384xf32> to vector<8x128xf32>
    %346 = arith.mulf %335, %345 : vector<8x128xf32>
    %347 = arith.addf %344, %346 : vector<8x128xf32>
    %348 = math.tanh %347 : vector<8x128xf32>
    %349 = arith.subf %296, %348 : vector<8x128xf32>
    %350 = arith.mulf %343, %349 : vector<8x128xf32>
    %351 = arith.addf %348, %350 : vector<8x128xf32>
    %352 = vector.extract_strided_slice %5 {offsets = [48, 0], sizes = [8, 384], strides = [1, 1]} : vector<64x384xf32> to vector<8x384xf32>
    %cst_64 = arith.constant dense<0.000000e+00> : vector<8x384xf32>
    %353 = tpu.matmul %323, %6, %cst_64 {dimension_numbers = #tpu.dot_dimension_numbers<[1], [0], [0], [1], [0, 0, 1, 1], [], []>} : vector<8x128xf32>, vector<128x384xf32>, vector<8x384xf32> -> vector<8x384xf32>
    %354 = arith.addf %353, %10 : vector<8x384xf32>
    %355 = vector.extract_strided_slice %352 {offsets = [0, 0], sizes = [8, 128], strides = [1, 1]} : vector<8x384xf32> to vector<8x128xf32>
    %356 = vector.extract_strided_slice %354 {offsets = [0, 0], sizes = [8, 128], strides = [1, 1]} : vector<8x384xf32> to vector<8x128xf32>
    %357 = arith.addf %355, %356 : vector<8x128xf32>
    %358 = arith.negf %357 : vector<8x128xf32>
    %359 = math.exp %358 : vector<8x128xf32>
    %cst_65 = arith.constant 1.000000e+00 : f32
    %360 = vector.broadcast %cst_65 : f32 to vector<8x128xf32>
    %361 = arith.addf %360, %359 : vector<8x128xf32>
    %362 = arith.divf %360, %361 : vector<8x128xf32>
    %363 = vector.extract_strided_slice %352 {offsets = [0, 128], sizes = [8, 128], strides = [1, 1]} : vector<8x384xf32> to vector<8x128xf32>
    %364 = vector.extract_strided_slice %354 {offsets = [0, 128], sizes = [8, 128], strides = [1, 1]} : vector<8x384xf32> to vector<8x128xf32>
    %365 = arith.addf %363, %364 : vector<8x128xf32>
    %366 = arith.negf %365 : vector<8x128xf32>
    %367 = math.exp %366 : vector<8x128xf32>
    %cst_66 = arith.constant 1.000000e+00 : f32
    %368 = vector.broadcast %cst_66 : f32 to vector<8x128xf32>
    %369 = arith.addf %368, %367 : vector<8x128xf32>
    %370 = arith.divf %368, %369 : vector<8x128xf32>
    %371 = vector.extract_strided_slice %352 {offsets = [0, 256], sizes = [8, 128], strides = [1, 1]} : vector<8x384xf32> to vector<8x128xf32>
    %372 = vector.extract_strided_slice %354 {offsets = [0, 256], sizes = [8, 128], strides = [1, 1]} : vector<8x384xf32> to vector<8x128xf32>
    %373 = arith.mulf %362, %372 : vector<8x128xf32>
    %374 = arith.addf %371, %373 : vector<8x128xf32>
    %375 = math.tanh %374 : vector<8x128xf32>
    %376 = arith.subf %323, %375 : vector<8x128xf32>
    %377 = arith.mulf %370, %376 : vector<8x128xf32>
    %378 = arith.addf %375, %377 : vector<8x128xf32>
    %cst_67 = arith.constant dense<0.000000e+00> : vector<8x384xf32>
    %379 = tpu.matmul %378, %14, %cst_67 {dimension_numbers = #tpu.dot_dimension_numbers<[1], [0], [0], [1], [0, 0, 1, 1], [], []>} : vector<8x128xf32>, vector<128x384xf32>, vector<8x384xf32> -> vector<8x384xf32>
    %380 = arith.addf %379, %17 : vector<8x384xf32>
    %cst_68 = arith.constant dense<0.000000e+00> : vector<8x384xf32>
    %381 = tpu.matmul %351, %7, %cst_68 {dimension_numbers = #tpu.dot_dimension_numbers<[1], [0], [0], [1], [0, 0, 1, 1], [], []>} : vector<8x128xf32>, vector<128x384xf32>, vector<8x384xf32> -> vector<8x384xf32>
    %382 = arith.addf %381, %13 : vector<8x384xf32>
    %383 = vector.extract_strided_slice %380 {offsets = [0, 0], sizes = [8, 128], strides = [1, 1]} : vector<8x384xf32> to vector<8x128xf32>
    %384 = vector.extract_strided_slice %382 {offsets = [0, 0], sizes = [8, 128], strides = [1, 1]} : vector<8x384xf32> to vector<8x128xf32>
    %385 = arith.addf %383, %384 : vector<8x128xf32>
    %386 = arith.negf %385 : vector<8x128xf32>
    %387 = math.exp %386 : vector<8x128xf32>
    %cst_69 = arith.constant 1.000000e+00 : f32
    %388 = vector.broadcast %cst_69 : f32 to vector<8x128xf32>
    %389 = arith.addf %388, %387 : vector<8x128xf32>
    %390 = arith.divf %388, %389 : vector<8x128xf32>
    %391 = vector.extract_strided_slice %380 {offsets = [0, 128], sizes = [8, 128], strides = [1, 1]} : vector<8x384xf32> to vector<8x128xf32>
    %392 = vector.extract_strided_slice %382 {offsets = [0, 128], sizes = [8, 128], strides = [1, 1]} : vector<8x384xf32> to vector<8x128xf32>
    %393 = arith.addf %391, %392 : vector<8x128xf32>
    %394 = arith.negf %393 : vector<8x128xf32>
    %395 = math.exp %394 : vector<8x128xf32>
    %cst_70 = arith.constant 1.000000e+00 : f32
    %396 = vector.broadcast %cst_70 : f32 to vector<8x128xf32>
    %397 = arith.addf %396, %395 : vector<8x128xf32>
    %398 = arith.divf %396, %397 : vector<8x128xf32>
    %399 = vector.extract_strided_slice %380 {offsets = [0, 256], sizes = [8, 128], strides = [1, 1]} : vector<8x384xf32> to vector<8x128xf32>
    %400 = vector.extract_strided_slice %382 {offsets = [0, 256], sizes = [8, 128], strides = [1, 1]} : vector<8x384xf32> to vector<8x128xf32>
    %401 = arith.mulf %390, %400 : vector<8x128xf32>
    %402 = arith.addf %399, %401 : vector<8x128xf32>
    %403 = math.tanh %402 : vector<8x128xf32>
    %404 = arith.subf %351, %403 : vector<8x128xf32>
    %405 = arith.mulf %398, %404 : vector<8x128xf32>
    %406 = arith.addf %403, %405 : vector<8x128xf32>
    %407 = vector.extract_strided_slice %5 {offsets = [56, 0], sizes = [8, 384], strides = [1, 1]} : vector<64x384xf32> to vector<8x384xf32>
    %cst_71 = arith.constant dense<0.000000e+00> : vector<8x384xf32>
    %408 = tpu.matmul %378, %6, %cst_71 {dimension_numbers = #tpu.dot_dimension_numbers<[1], [0], [0], [1], [0, 0, 1, 1], [], []>} : vector<8x128xf32>, vector<128x384xf32>, vector<8x384xf32> -> vector<8x384xf32>
    %409 = arith.addf %408, %10 : vector<8x384xf32>
    %410 = vector.extract_strided_slice %407 {offsets = [0, 0], sizes = [8, 128], strides = [1, 1]} : vector<8x384xf32> to vector<8x128xf32>
    %411 = vector.extract_strided_slice %409 {offsets = [0, 0], sizes = [8, 128], strides = [1, 1]} : vector<8x384xf32> to vector<8x128xf32>
    %412 = arith.addf %410, %411 : vector<8x128xf32>
    %413 = arith.negf %412 : vector<8x128xf32>
    %414 = math.exp %413 : vector<8x128xf32>
    %cst_72 = arith.constant 1.000000e+00 : f32
    %415 = vector.broadcast %cst_72 : f32 to vector<8x128xf32>
    %416 = arith.addf %415, %414 : vector<8x128xf32>
    %417 = arith.divf %415, %416 : vector<8x128xf32>
    %418 = vector.extract_strided_slice %407 {offsets = [0, 128], sizes = [8, 128], strides = [1, 1]} : vector<8x384xf32> to vector<8x128xf32>
    %419 = vector.extract_strided_slice %409 {offsets = [0, 128], sizes = [8, 128], strides = [1, 1]} : vector<8x384xf32> to vector<8x128xf32>
    %420 = arith.addf %418, %419 : vector<8x128xf32>
    %421 = arith.negf %420 : vector<8x128xf32>
    %422 = math.exp %421 : vector<8x128xf32>
    %cst_73 = arith.constant 1.000000e+00 : f32
    %423 = vector.broadcast %cst_73 : f32 to vector<8x128xf32>
    %424 = arith.addf %423, %422 : vector<8x128xf32>
    %425 = arith.divf %423, %424 : vector<8x128xf32>
    %426 = vector.extract_strided_slice %407 {offsets = [0, 256], sizes = [8, 128], strides = [1, 1]} : vector<8x384xf32> to vector<8x128xf32>
    %427 = vector.extract_strided_slice %409 {offsets = [0, 256], sizes = [8, 128], strides = [1, 1]} : vector<8x384xf32> to vector<8x128xf32>
    %428 = arith.mulf %417, %427 : vector<8x128xf32>
    %429 = arith.addf %426, %428 : vector<8x128xf32>
    %430 = math.tanh %429 : vector<8x128xf32>
    %431 = arith.subf %378, %430 : vector<8x128xf32>
    %432 = arith.mulf %425, %431 : vector<8x128xf32>
    %433 = arith.addf %430, %432 : vector<8x128xf32>
    %cst_74 = arith.constant dense<0.000000e+00> : vector<8x384xf32>
    %434 = tpu.matmul %433, %14, %cst_74 {dimension_numbers = #tpu.dot_dimension_numbers<[1], [0], [0], [1], [0, 0, 1, 1], [], []>} : vector<8x128xf32>, vector<128x384xf32>, vector<8x384xf32> -> vector<8x384xf32>
    %435 = arith.addf %434, %17 : vector<8x384xf32>
    %cst_75 = arith.constant dense<0.000000e+00> : vector<8x384xf32>
    %436 = tpu.matmul %406, %7, %cst_75 {dimension_numbers = #tpu.dot_dimension_numbers<[1], [0], [0], [1], [0, 0, 1, 1], [], []>} : vector<8x128xf32>, vector<128x384xf32>, vector<8x384xf32> -> vector<8x384xf32>
    %437 = arith.addf %436, %13 : vector<8x384xf32>
    %438 = vector.extract_strided_slice %435 {offsets = [0, 0], sizes = [8, 128], strides = [1, 1]} : vector<8x384xf32> to vector<8x128xf32>
    %439 = vector.extract_strided_slice %437 {offsets = [0, 0], sizes = [8, 128], strides = [1, 1]} : vector<8x384xf32> to vector<8x128xf32>
    %440 = arith.addf %438, %439 : vector<8x128xf32>
    %441 = arith.negf %440 : vector<8x128xf32>
    %442 = math.exp %441 : vector<8x128xf32>
    %cst_76 = arith.constant 1.000000e+00 : f32
    %443 = vector.broadcast %cst_76 : f32 to vector<8x128xf32>
    %444 = arith.addf %443, %442 : vector<8x128xf32>
    %445 = arith.divf %443, %444 : vector<8x128xf32>
    %446 = vector.extract_strided_slice %435 {offsets = [0, 128], sizes = [8, 128], strides = [1, 1]} : vector<8x384xf32> to vector<8x128xf32>
    %447 = vector.extract_strided_slice %437 {offsets = [0, 128], sizes = [8, 128], strides = [1, 1]} : vector<8x384xf32> to vector<8x128xf32>
    %448 = arith.addf %446, %447 : vector<8x128xf32>
    %449 = arith.negf %448 : vector<8x128xf32>
    %450 = math.exp %449 : vector<8x128xf32>
    %cst_77 = arith.constant 1.000000e+00 : f32
    %451 = vector.broadcast %cst_77 : f32 to vector<8x128xf32>
    %452 = arith.addf %451, %450 : vector<8x128xf32>
    %453 = arith.divf %451, %452 : vector<8x128xf32>
    %454 = vector.extract_strided_slice %435 {offsets = [0, 256], sizes = [8, 128], strides = [1, 1]} : vector<8x384xf32> to vector<8x128xf32>
    %455 = vector.extract_strided_slice %437 {offsets = [0, 256], sizes = [8, 128], strides = [1, 1]} : vector<8x384xf32> to vector<8x128xf32>
    %456 = arith.mulf %445, %455 : vector<8x128xf32>
    %457 = arith.addf %454, %456 : vector<8x128xf32>
    %458 = math.tanh %457 : vector<8x128xf32>
    %459 = arith.subf %406, %458 : vector<8x128xf32>
    %460 = arith.mulf %453, %459 : vector<8x128xf32>
    %461 = arith.addf %458, %460 : vector<8x128xf32>
    %c0_78 = arith.constant 0 : index
    %c0_79 = arith.constant 0 : index
    %c0_80 = arith.constant 0 : index
    %462 = vector.load %arg13[%c0_78, %c0_79, %c0_80] : memref<2x8x128xf32, #tpu.memory_space<vmem>>, vector<1x8x128xf32>
    %463 = vector.shape_cast %462 : vector<1x8x128xf32> to vector<8x128xf32>
    %464 = vector.shape_cast %433 : vector<8x128xf32> to vector<1x8x128xf32>
    tpu.vector_store %arg13[%c0_78, %c0_79, %c0_80], %464 {strides = array<i32>} : memref<2x8x128xf32, #tpu.memory_space<vmem>>, vector<1x8x128xf32>,
    %c1_81 = arith.constant 1 : index
    %c0_82 = arith.constant 0 : index
    %c0_83 = arith.constant 0 : index
    %465 = vector.load %arg13[%c1_81, %c0_82, %c0_83] : memref<2x8x128xf32, #tpu.memory_space<vmem>>, vector<1x8x128xf32>
    %466 = vector.shape_cast %465 : vector<1x8x128xf32> to vector<8x128xf32>
    %467 = vector.shape_cast %461 : vector<8x128xf32> to vector<1x8x128xf32>
    tpu.vector_store %arg13[%c1_81, %c0_82, %c0_83], %467 {strides = array<i32>} : memref<2x8x128xf32, #tpu.memory_space<vmem>>, vector<1x8x128xf32>,
    %cst_84 = arith.constant 0.000000e+00 : f32
    %468 = vector.broadcast %cst_84 : f32 to vector<8x128xf32>
    %469 = arith.maximumf %461, %468 : vector<8x128xf32>
    %c0_85 = arith.constant 0 : index
    %c0_86 = arith.constant 0 : index
    %470 = vector.load %arg10[%c0_85, %c0_86] : memref<128x128xf32, #tpu.memory_space<vmem>>, vector<128x128xf32>
    %cst_87 = arith.constant dense<0.000000e+00> : vector<8x128xf32>
    %471 = tpu.matmul %469, %470, %cst_87 {dimension_numbers = #tpu.dot_dimension_numbers<[1], [0], [0], [1], [0, 0, 1, 1], [], []>} : vector<8x128xf32>, vector<128x128xf32>, vector<8x128xf32> -> vector<8x128xf32>
    %c0_88 = arith.constant 0 : index
    %c0_89 = arith.constant 0 : index
    %472 = vector.load %arg11[%c0_88, %c0_89] : memref<1x128xf32, #tpu.memory_space<vmem>>, vector<1x128xf32>
    %473 = vector.broadcast %472 : vector<1x128xf32> to vector<8x128xf32>
    %474 = arith.addf %471, %473 : vector<8x128xf32>
    %c0_90 = arith.constant 0 : index
    %c0_91 = arith.constant 0 : index
    %475 = vector.load %arg12[%c0_90, %c0_91] : memref<8x128xf32, #tpu.memory_space<vmem>>, vector<8x128xf32>
    tpu.vector_store %arg12[%c0_90, %c0_91], %474 {strides = array<i32>} : memref<8x128xf32, #tpu.memory_space<vmem>>, vector<8x128xf32>,
    return
  }
}

</mosaic_0001>

<bundles_post_ra>
// kernel: tpu_custom_call.1
= control target key start
LH: loop header
LB: loop body
LE: loop exit
PB: predicated region body
PF: predicated region fallthrough
CT: control target
= control target key end

     0   :  { %19 = vsyncpa [#allocation3], 0  ;;  %s9222_s0 = inlined_call_operand.hbm [shape: f32[64,128], index: 0, kind: input, shape index: {}]   ;;  %s9223_s1 = inlined_call_operand.hbm [shape: f32[2,8,128], index: 1, kind: input, shape index: {}]   ;;  %s9224_s2 = inlined_call_operand.hbm [shape: f32[128,384], index: 2, kind: input, shape index: {}]   ;;  %s9225_s3 = inlined_call_operand.hbm [shape: f32[128,384], index: 3, kind: input, shape index: {}]   ;;  %s9226_s4 = inlined_call_operand.vmem [shape: f32[1,384], index: 4, kind: input, shape index: {}]   ;;  %s9227_s5 = inlined_call_operand.vmem [shape: f32[1,384], index: 5, kind: input, shape index: {}]   ;;  %s9228_s6 = inlined_call_operand.hbm [shape: f32[128,384], index: 6, kind: input, shape index: {}]   ;;  %s9229_s7 = inlined_call_operand.hbm [shape: f32[128,384], index: 7, kind: input, shape index: {}]   ;;  %s9230_s8 = inlined_call_operand.vmem [shape: f32[1,384], index: 8, kind: input, shape index: {}]   ;;  %s9231_s9 = inlined_call_operand.vmem [shape: f32[1,384], index: 9, kind: input, shape index: {}]   ;;  %s9232_s10 = inlined_call_operand.hbm [shape: f32[128,128], index: 10, kind: input, shape index: {}]   ;;  %s9233_s11 = inlined_call_operand.vmem [shape: f32[1,128], index: 11, kind: input, shape index: {}]   ;;  %s9234_s12 = inlined_call_operand.hbm [shape: f32[8,128], index: 12, kind: output, shape index: {0}]   ;;  %s9235_s13 = inlined_call_operand.hbm [shape: f32[2,8,128], index: 13, kind: output, shape index: {1}]  }
   0x1   :  { %20 = vsyncpa [#allocation6], 0 }
   0x2   :  { %21 = vsyncpa [#allocation9], 0 }
   0x3   :  { %22 = vsyncpa [#allocation12], 0 }
   0x4   :  { %23 = vsyncpa [#allocation4], 0 }
   0x5   :  { %24 = vsyncpa [#allocation16], 0  ;;  %s7780_s25 = smov [#allocation5]   ;;  %s7570_s29 = scalar_lea.hbm %s9223_s1, 256 }
   0x6   :  { %s42_s26 = sshll.u32 %s7780_s25, 4  ;;  %p7571_p0 = scmp.ne.s32.totalorder %s9223_s1, %s7570_s29  ;;  %s43_s26 = int_to_ptr.vmem [resolvable:$true] %s42_s26 }
   0x7   :  { %p7574_p1 = scmp.lt.u32.totalorder %s7570_s29, %s9223_s1 }
   0x9   :  { %p7576_p2 = pnand %p7574_p1, %p7571_p0 }
   0xb   :  { %7579 = shalt.err (!%p7576_p2)
}
   0xc   :  { %s7580_s17 = scalar_lea.vmem %s43_s26, 256  ;;  %p7585_p4 = scmp.lt.s32.totalorder %s43_s26, %s43_s26 }
   0xd   :  { %p7581_p3 = scmp.ne.s32.totalorder %s43_s26, %s7580_s17  ;;  %p7586_p5 = scmp.lt.s32.totalorder %s7580_s17, %s7580_s17 }
   0xf   :  { %p7587_p6 = por %p7586_p5, %p7585_p4 }
  0x11   :  { %p7588_p7 = pnand %p7587_p6, %p7581_p3 }
  0x13   :  { %7591 = shalt.err (!%p7588_p7)
}
  0x14   :  { %s7781_s18 = smov 128   ;;  %s7782_s19 = smov 8  }
  0x15   :  { %48 = dma.hbm_to_vmem [thread:$0]  %s9223_s1, 256, %s43_s26, [#allocation6], %s7781_s18, %s7781_s18, %s7782_s19  }
  0x16   :  { %s7783_s22 = smov [#allocation8]   ;;  %s7784_s24 = smov [#allocation11]  }
  0x17   :  { %s66_s23 = sshll.u32 %s7783_s22, 4  ;;  %s94_s25 = sshll.u32 %s7784_s24, 4  ;;  %s67_s23 = int_to_ptr.vmem [resolvable:$true] %s66_s23  ;;  %s95_s25 = int_to_ptr.vmem [resolvable:$true] %s94_s25 }
  0x18   :  { %s7592_s29 = scalar_lea.hbm %s9225_s3, 6144 }
  0x19   :  { %p7593_p8 = scmp.ne.s32.totalorder %s9225_s3, %s7592_s29  ;;  %p7596_p9 = scmp.lt.u32.totalorder %s7592_s29, %s9225_s3 }
  0x1b   :  { %p7598_p10 = pnand %p7596_p9, %p7593_p8 }
  0x1d   :  { %7601 = shalt.err (!%p7598_p10)
}
  0x1e   :  { %s7602_s1 = scalar_lea.vmem %s67_s23, 6144  ;;  %p7607_p12 = scmp.lt.s32.totalorder %s67_s23, %s67_s23 }
  0x1f   :  { %p7603_p11 = scmp.ne.s32.totalorder %s67_s23, %s7602_s1  ;;  %p7608_p13 = scmp.lt.s32.totalorder %s7602_s1, %s7602_s1 }
  0x21   :  { %p7609_p0 = por %p7608_p13, %p7607_p12 }
  0x23   :  { %p7610_p1 = pnand %p7609_p0, %p7603_p11 }
  0x25   :  { %7613 = shalt.err (!%p7610_p1)
}
  0x26   :  { %s7785_s26 = smov 384   ;;  %s7786_s17 = smov 24  }
  0x27   :  { %72 = dma.hbm_to_vmem [thread:$0]  %s9225_s3, 6144, %s67_s23, [#allocation9], %s7785_s26, %s7785_s26, %s7786_s17  }
  0x28   :  { %s7614_s27 = scalar_lea.hbm %s9229_s7, 6144 }
  0x29   :  { %p7615_p2 = scmp.ne.s32.totalorder %s9229_s7, %s7614_s27  ;;  %p7618_p3 = scmp.lt.u32.totalorder %s7614_s27, %s9229_s7 }
  0x2b   :  { %p7620_p4 = pnand %p7618_p3, %p7615_p2 }
  0x2d   :  { %7623 = shalt.err (!%p7620_p4)
}
  0x2e   :  { %s7624_s15 = scalar_lea.vmem %s95_s25, 6144  ;;  %p7629_p6 = scmp.lt.s32.totalorder %s95_s25, %s95_s25 }
  0x2f   :  { %p7625_p5 = scmp.ne.s32.totalorder %s95_s25, %s7624_s15  ;;  %p7630_p7 = scmp.lt.s32.totalorder %s7624_s15, %s7624_s15 }
  0x31   :  { %p7631_p8 = por %p7630_p7, %p7629_p6 }
  0x33   :  { %p7632_p9 = pnand %p7631_p8, %p7625_p5 }
  0x35   :  { %7635 = shalt.err (!%p7632_p9)
}
  0x36   :  { %100 = dma.hbm_to_vmem [thread:$0]  %s9229_s7, 6144, %s95_s25, [#allocation12], %s7785_s26, %s7785_s26, %s7786_s17  }
  0x37   :  { %s7787_s16 = smov [#allocation2]   ;;  %s7788_s20 = smov [#allocation7]  }
  0x38   :  { %s30_s1 = sshll.u32 %s7787_s16, 4  ;;  %s54_s21 = sshll.u32 %s7788_s20, 4  ;;  %s31_s1 = int_to_ptr.vmem [resolvable:$true] %s30_s1  ;;  %s55_s21 = int_to_ptr.vmem [resolvable:$true] %s54_s21 }
  0x39   :  { %s7636_s27 = scalar_lea.hbm %s9222_s0, 1024 }
  0x3a   :  { %p7637_p10 = scmp.ne.s32.totalorder %s9222_s0, %s7636_s27  ;;  %p7640_p11 = scmp.lt.u32.totalorder %s7636_s27, %s9222_s0 }
  0x3c   :  { %p7642_p12 = pnand %p7640_p11, %p7637_p10 }
  0x3e   :  { %7645 = shalt.err (!%p7642_p12)
}
  0x3f   :  { %s7646_s7 = scalar_lea.vmem %s31_s1, 1024  ;;  %p7651_p0 = scmp.lt.s32.totalorder %s31_s1, %s31_s1 }
  0x40   :  { %p7647_p13 = scmp.ne.s32.totalorder %s31_s1, %s7646_s7  ;;  %p7652_p1 = scmp.lt.s32.totalorder %s7646_s7, %s7646_s7 }
  0x42   :  { %p7653_p2 = por %p7652_p1, %p7651_p0 }
  0x44   :  { %p7654_p3 = pnand %p7653_p2, %p7647_p13 }
  0x46   :  { %7657 = shalt.err (!%p7654_p3)
}
  0x47   :  { %36 = dma.hbm_to_vmem [thread:$0]  %s9222_s0, 1024, %s31_s1, [#allocation3], %s7781_s18, %s7781_s18, %s7782_s19  }
  0x48   :  { %s7658_s16 = scalar_lea.hbm %s9224_s2, 6144 }
  0x49   :  { %p7659_p4 = scmp.ne.s32.totalorder %s9224_s2, %s7658_s16  ;;  %p7662_p5 = scmp.lt.u32.totalorder %s7658_s16, %s9224_s2 }
  0x4b   :  { %p7664_p6 = pnand %p7662_p5, %p7659_p4 }
  0x4d   :  { %7667 = shalt.err (!%p7664_p6)
}
  0x4e   :  { %s7668_s28 = scalar_lea.vmem %s55_s21, 6144  ;;  %p7673_p8 = scmp.lt.s32.totalorder %s55_s21, %s55_s21 }
  0x4f   :  { %p7669_p7 = scmp.ne.s32.totalorder %s55_s21, %s7668_s28  ;;  %p7674_p9 = scmp.lt.s32.totalorder %s7668_s28, %s7668_s28 }
  0x51   :  { %p7675_p10 = por %p7674_p9, %p7673_p8 }
  0x53   :  { %p7676_p11 = pnand %p7675_p10, %p7669_p7 }
  0x55   :  { %7679 = shalt.err (!%p7676_p11)
}
  0x56   :  { %60 = dma.hbm_to_vmem [thread:$0]  %s9224_s2, 6144, %s55_s21, [#allocation6], %s7785_s26, %s7785_s26, %s7786_s17  }
  0x57   :  { %s7789_s29 = smov [#allocation10]   ;;  %s7790_s14 = smov [#allocation13]  }
  0x58   :  { %s82_s30 = sshll.u32 %s7789_s29, 4  ;;  %s110_s7 = sshll.u32 %s7790_s14, 4  ;;  %s83_s30 = int_to_ptr.vmem [resolvable:$true] %s82_s30  ;;  %s111_s7 = int_to_ptr.vmem [resolvable:$true] %s110_s7 }
  0x59   :  { %s7680_s3 = scalar_lea.hbm %s9228_s6, 6144 }
  0x5a   :  { %p7681_p12 = scmp.ne.s32.totalorder %s9228_s6, %s7680_s3  ;;  %p7684_p13 = scmp.lt.u32.totalorder %s7680_s3, %s9228_s6 }
  0x5c   :  { %p7686_p0 = pnand %p7684_p13, %p7681_p12 }
  0x5e   :  { %7689 = shalt.err (!%p7686_p0)
}
  0x5f   :  { %s7690_s2 = scalar_lea.vmem %s83_s30, 6144  ;;  %p7695_p2 = scmp.lt.s32.totalorder %s83_s30, %s83_s30 }
  0x60   :  { %p7691_p1 = scmp.ne.s32.totalorder %s83_s30, %s7690_s2  ;;  %p7696_p3 = scmp.lt.s32.totalorder %s7690_s2, %s7690_s2 }
  0x62   :  { %p7697_p4 = por %p7696_p3, %p7695_p2 }
  0x64   :  { %p7698_p5 = pnand %p7697_p4, %p7691_p1 }
  0x66   :  { %7701 = shalt.err (!%p7698_p5)
}
  0x67   :  { %88 = dma.hbm_to_vmem [thread:$0]  %s9228_s6, 6144, %s83_s30, [#allocation9], %s7785_s26, %s7785_s26, %s7786_s17  }
  0x68   :  { %s7702_s0 = scalar_lea.hbm %s9232_s10, 2048 }
  0x69   :  { %p7703_p6 = scmp.ne.s32.totalorder %s9232_s10, %s7702_s0  ;;  %p7706_p7 = scmp.lt.u32.totalorder %s7702_s0, %s9232_s10 }
  0x6b   :  { %p7708_p8 = pnand %p7706_p7, %p7703_p6 }
  0x6d   :  { %7711 = shalt.err (!%p7708_p8)
}
  0x6e   :  { %s7712_s15 = scalar_lea.vmem %s111_s7, 2048  ;;  %p7717_p10 = scmp.lt.s32.totalorder %s111_s7, %s111_s7 }
  0x6f   :  { %p7713_p9 = scmp.ne.s32.totalorder %s111_s7, %s7712_s15  ;;  %p7718_p11 = scmp.lt.s32.totalorder %s7712_s15, %s7712_s15 }
  0x71   :  { %p7719_p12 = por %p7718_p11, %p7717_p10 }
  0x73   :  { %p7720_p13 = pnand %p7719_p12, %p7713_p9 }
  0x75   :  { %7723 = shalt.err (!%p7720_p13)
}
  0x76   :  { %116 = dma.hbm_to_vmem [thread:$0]  %s9232_s10, 2048, %s111_s7, [#allocation12], %s7781_s18, %s7781_s18, %s7782_s19  }
  0x77   :  { %7768 = dma.done.wait [#allocation3], 1024  }
  0x78   :  { %7769 = vsyncadd [#allocation3], 4294966272 }
  0x79   :  { %7770 = dma.done.wait [#allocation6], 6400  }
  0x7a   :  { %7771 = vsyncadd [#allocation6], 4294960896 }
  0x7b   :  { %7772 = dma.done.wait [#allocation9], 12288  }
  0x7c   :  { %7773 = vsyncadd [#allocation9], 4294955008 }
  0x7d   :  { %7774 = dma.done.wait [#allocation12], 8192  }
  0x7e   :  { %7775 = vsyncadd [#allocation12], 4294959104  ;;  %v9236_v0 = vmov 0.0   ;;  %v149_v1 = vld [vmem:[#allocation7 + $0x8] sm:$0xff]  ;;  %v152_v2 = vld [vmem:[#allocation7 + $0x20] sm:$0xff]  ;;  %vm7793_vm0 = vmmov 0  }
  0x7f   :  { %277 = vmatprep.mubr.f32.mxu0 %v9236_v0  ;;  %v148_v3 = vld [vmem:[#allocation7] sm:$0xff]  ;;  %v5866_v4 = vpack.c.bf16 %v152_v2, %v149_v1  ;;  %v151_v5 = vld [vmem:[#allocation7 + $0x18] sm:$0xff]  ;;  %v158_v7 = vld [vmem:[#allocation7 + $0x50] sm:$0xff] }
  0x80   :  { %v155_v6 = vld [vmem:[#allocation7 + $0x38] sm:$0xff]  ;;  %v5868_v8 = vpack.c.bf16 %v151_v5, %v148_v3  ;;  %v154_v10 = vld [vmem:[#allocation7 + $0x30] sm:$0xff]  ;;  %v157_v11 = vld [vmem:[#allocation7 + $0x48] sm:$0xff] }
  0x81   :  { %v5870_v9 = vpack.c.bf16 %v158_v7, %v155_v6  ;;  %v161_v12 = vld [vmem:[#allocation7 + $0x68] sm:$0xff]  ;;  %5867 = vmatprep.subr.bf16.mxu0 %v5866_v4  ;;  %v164_v13 = vld [vmem:[#allocation7 + $0x80] sm:$0xff]  ;;  %v5872_v14 = vpack.c.bf16 %v157_v11, %v154_v10  ;;  %v163_v17 = vld [vmem:[#allocation7 + $0x78] sm:$0xff] }
  0x82   :  { %5869 = vmatpush1.bf16.msra.mxu0 %v5868_v8  ;;  %v5874_v15 = vpack.c.bf16 %v164_v13, %v161_v12  ;;  %v160_v16 = vld [vmem:[#allocation7 + $0x60] sm:$0xff]  ;;  %v167_v18 = vld [vmem:[#allocation7 + $0x98] sm:$0xff]  ;;  %v170_v19 = vld [vmem:[#allocation7 + $0xb0] sm:$0xff] }
  0x83   :  { %5871 = vmatprep.subr.bf16.mxu0 %v5870_v9  ;;  %v5876_v20 = vpack.c.bf16 %v163_v17, %v160_v16  ;;  %v166_v21 = vld [vmem:[#allocation7 + $0x90] sm:$0xff]  ;;  %v5878_v22 = vpack.c.bf16 %v170_v19, %v167_v18  ;;  %v169_v23 = vld [vmem:[#allocation7 + $0xa8] sm:$0xff]  ;;  %v176_v27 = vld [vmem:[#allocation7 + $0xe0] sm:$0xff] }
  0x84   :  { %v150_v24 = vld [vmem:[#allocation7 + $0x10] sm:$0xff]  ;;  %v153_v25 = vld [vmem:[#allocation7 + $0x28] sm:$0xff]  ;;  %v156_v29 = vld [vmem:[#allocation7 + $0x40] sm:$0xff]  ;;  %v5880_v31 = vpack.c.bf16 %v169_v23, %v166_v21 }
  0x85   :  { %v173_v26 = vld [vmem:[#allocation7 + $0xc8] sm:$0xff]  ;;  %v5898_v28 = vpack.c.bf16 %v153_v25, %v150_v24  ;;  %v159_v30 = vld [vmem:[#allocation7 + $0x58] sm:$0xff]  ;;  %v172_v32 = vld [vmem:[#allocation7 + $0xc0] sm:$0xff] }
  0x86   :  { %5873 = vmatpush1.bf16.msra.mxu0 %v5872_v14  ;;  %v5902_v33 = vpack.c.bf16 %v159_v30, %v156_v29  ;;  %v5882_v34 = vpack.c.bf16 %v176_v27, %v173_v26  ;;  %v175_v35 = vld [vmem:[#allocation7 + $0xd8] sm:$0xff]  ;;  %v7972_v36 = vld [vmem:[#allocation2] sm:$0xff]  ;;  %v165_v40 = vld [vmem:[#allocation7 + $0x88] sm:$0xff] }
  0x87   :  { %5875 = vmatprep.subr.bf16.mxu0 %v5874_v15  ;;  %5899 = vmatprep.subr.bf16.mxu1 %v5898_v28  ;;  %v162_v37 = vld [vmem:[#allocation7 + $0x70] sm:$0xff]  ;;  %v179_v38 = vld [vmem:[#allocation7 + $0xf8] sm:$0xff]  ;;  %v5884_v42 = vpack.c.bf16 %v175_v35, %v172_v32  ;;  %v168_v43 = vld [vmem:[#allocation7 + $0xa0] sm:$0xff] }
  0x88   :  { %5901 = vmatpush3.bf16.msra.mxu1 %v5898_v28  ;;  %v182_v39 = vld [vmem:[#allocation7 + $0x110] sm:$0xff]  ;;  %4979 = vmatprep.mubr.f32.mxu1 %v7972_v36  ;;  %v5906_v41 = vpack.c.bf16 %v165_v40, %v162_v37  ;;  %v171_v44 = vld [vmem:[#allocation7 + $0xb8] sm:$0xff]  ;;  %v181_v47 = vld [vmem:[#allocation7 + $0x108] sm:$0xff]  ;;  %v9238_v40 = vmov 0.0|0.0  }
  0x89   :  { %5903 = vmatprep.subr.bf16.mxu1 %v5902_v33  ;;  %v5886_v45 = vpack.c.bf16 %v182_v39, %v179_v38  ;;  %v178_v46 = vld [vmem:[#allocation7 + $0xf0] sm:$0xff]  ;;  %v185_v48 = vld [vmem:[#allocation7 + $0x128] sm:$0xff]  ;;  %v188_v49 = vld [vmem:[#allocation7 + $0x140] sm:$0xff]  ;;  %v5910_v50 = vpack.c.bf16 %v171_v44, %v168_v43 }
  0x8a   :  { %5877 = vmatpush1.bf16.msra.mxu0 %v5876_v20  ;;  %v174_v51 = vld [vmem:[#allocation7 + $0xd0] sm:$0xff]  ;;  %v177_v52 = vld [vmem:[#allocation7 + $0xe8] sm:$0xff]  ;;  %v5888_v53 = vpack.c.bf16 %v181_v47, %v178_v46  ;;  %v5890_v54 = vpack.c.bf16 %v188_v49, %v185_v48  ;;  %v184_v55 = vld [vmem:[#allocation7 + $0x120] sm:$0xff] }
  0x8b   :  { %5879 = vmatprep.subr.bf16.mxu0 %v5878_v22  ;;  %v187_v56 = vld [vmem:[#allocation7 + $0x138] sm:$0xff]  ;;  %v194_v58 = vld [vmem:[#allocation7 + $0x170] sm:$0xff]  ;;  %v5914_v59 = vpack.c.bf16 %v177_v52, %v174_v51  ;;  %v180_v60 = vld [vmem:[#allocation7 + $0x100] sm:$0xff] }
  0x8c   :  { %5905 = vmatpush3.bf16.msra.mxu1 %v5902_v33  ;;  %v191_v57 = vld [vmem:[#allocation7 + $0x158] sm:$0xff]  ;;  %v5892_v62 = vpack.c.bf16 %v187_v56, %v184_v55  ;;  %v190_v1 = vld [vmem:[#allocation7 + $0x150] sm:$0xff]  ;;  %v193_v2 = vld [vmem:[#allocation7 + $0x168] sm:$0xff] }
  0x8d   :  { %5907 = vmatprep.subr.bf16.mxu1 %v5906_v41  ;;  %v183_v61 = vld [vmem:[#allocation7 + $0x118] sm:$0xff]  ;;  %v5894_v63 = vpack.c.bf16 %v194_v58, %v191_v57  ;;  %v432_v3 = vld [vmem:[#allocation8 + $0x8] sm:$0xff]  ;;  %v435_v4 = vld [vmem:[#allocation8 + $0x20] sm:$0xff]  ;;  %v5896_v8 = vpack.c.bf16 %v193_v2, %v190_v1 }
  0x8e   :  { %5881 = vmatpush1.bf16.msra.mxu0 %v5880_v31  ;;  %v5918_v5 = vpack.c.bf16 %v183_v61, %v180_v60  ;;  %v186_v6 = vld [vmem:[#allocation7 + $0x130] sm:$0xff]  ;;  %v189_v7 = vld [vmem:[#allocation7 + $0x148] sm:$0xff]  ;;  %v7975_v9 = vpack.c.bf16 %v435_v4, %v432_v3  ;;  %v431_v10 = vld [vmem:[#allocation8] sm:$0xff] }
  0x8f   :  { %5883 = vmatprep.subr.bf16.mxu0 %v5882_v34  ;;  %v434_v11 = vld [vmem:[#allocation8 + $0x18] sm:$0xff]  ;;  %v441_v13 = vld [vmem:[#allocation8 + $0x50] sm:$0xff]  ;;  %v5922_v14 = vpack.c.bf16 %v189_v7, %v186_v6  ;;  %v192_v15 = vld [vmem:[#allocation7 + $0x160] sm:$0xff] }
  0x90   :  { %5909 = vmatpush3.bf16.msra.mxu1 %v5906_v41  ;;  %v438_v12 = vld [vmem:[#allocation8 + $0x38] sm:$0xff]  ;;  %v7977_v17 = vpack.c.bf16 %v434_v11, %v431_v10  ;;  %v437_v19 = vld [vmem:[#allocation8 + $0x30] sm:$0xff]  ;;  %v440_v20 = vld [vmem:[#allocation8 + $0x48] sm:$0xff] }
  0x91   :  { %5911 = vmatprep.subr.bf16.mxu1 %v5910_v50  ;;  %v195_v16 = vld [vmem:[#allocation7 + $0x178] sm:$0xff]  ;;  %v7980_v18 = vpack.c.bf16 %v441_v13, %v438_v12  ;;  %v444_v21 = vld [vmem:[#allocation8 + $0x68] sm:$0xff]  ;;  %v447_v22 = vld [vmem:[#allocation8 + $0x80] sm:$0xff]  ;;  %v7985_v25 = vpack.c.bf16 %v440_v20, %v437_v19 }
  0x92   :  { %5885 = vmatpush1.bf16.msra.mxu0 %v5884_v42  ;;  %v5926_v23 = vpack.c.bf16 %v195_v16, %v192_v15  ;;  %v141_v24 = vld [vmem:[#allocation2 + $0x8] sm:$0xff]  ;;  %v7988_v26 = vpack.c.bf16 %v447_v22, %v444_v21  ;;  %v443_v27 = vld [vmem:[#allocation8 + $0x60] sm:$0xff]  ;;  %v453_v30 = vld [vmem:[#allocation8 + $0xb0] sm:$0xff] }
  0x93   :  { %5887 = vmatprep.subr.bf16.mxu0 %v5886_v45  ;;  %v446_v28 = vld [vmem:[#allocation8 + $0x78] sm:$0xff]  ;;  %v433_v31 = vld [vmem:[#allocation8 + $0x10] sm:$0xff]  ;;  %v436_v32 = vld [vmem:[#allocation8 + $0x28] sm:$0xff] }
  0x94   :  { %5913 = vmatpush3.bf16.msra.mxu1 %v5910_v50  ;;  %v450_v29 = vld [vmem:[#allocation8 + $0x98] sm:$0xff]  ;;  %v142_v33 = vld [vmem:[#allocation2 + $0x10] sm:$0xff]  ;;  %v7992_v34 = vpack.c.bf16 %v446_v28, %v443_v27  ;;  %v452_v37 = vld [vmem:[#allocation8 + $0xa8] sm:$0xff]  ;;  %v7998_v41 = vpack.c.bf16 %v436_v32, %v433_v31 }
  0x95   :  { %5915 = vmatprep.subr.bf16.mxu1 %v5914_v59  ;;  %v7995_v35 = vpack.c.bf16 %v453_v30, %v450_v29  ;;  %v456_v38 = vld [vmem:[#allocation8 + $0xc8] sm:$0xff]  ;;  %v459_v39 = vld [vmem:[#allocation8 + $0xe0] sm:$0xff]  ;;  %v442_v43 = vld [vmem:[#allocation8 + $0x58] sm:$0xff] }
  0x96   :  { %5889 = vmatpush1.bf16.msra.mxu0 %v5888_v53  ;;  %v439_v42 = vld [vmem:[#allocation8 + $0x40] sm:$0xff]  ;;  %v143_v44 = vld [vmem:[#allocation2 + $0x18] sm:$0xff]  ;;  %v8005_v46 = vpack.c.bf16 %v459_v39, %v456_v38  ;;  %v458_v48 = vld [vmem:[#allocation8 + $0xd8] sm:$0xff] }
  0x97   :  { %5891 = vmatprep.subr.bf16.mxu0 %v5890_v54  ;;  %v455_v47 = vld [vmem:[#allocation8 + $0xc0] sm:$0xff]  ;;  %v462_v49 = vld [vmem:[#allocation8 + $0xf8] sm:$0xff]  ;;  %v465_v50 = vld [vmem:[#allocation8 + $0x110] sm:$0xff]  ;;  %v8008_v51 = vpack.c.bf16 %v442_v43, %v439_v42 }
  0x98   :  { %5917 = vmatpush3.bf16.msra.mxu1 %v5914_v59  ;;  %v445_v52 = vld [vmem:[#allocation8 + $0x70] sm:$0xff]  ;;  %v448_v53 = vld [vmem:[#allocation8 + $0x88] sm:$0xff]  ;;  %v8013_v55 = vpack.c.bf16 %v458_v48, %v455_v47  ;;  %v8016_v56 = vpack.c.bf16 %v465_v50, %v462_v49  ;;  %v471_v60 = vld [vmem:[#allocation8 + $0x140] sm:$0xff] }
  0x99   :  { %5919 = vmatprep.subr.bf16.mxu1 %v5918_v5  ;;  %v144_v54 = vld [vmem:[#allocation2 + $0x20] sm:$0xff]  ;;  %v464_v58 = vld [vmem:[#allocation8 + $0x108] sm:$0xff]  ;;  %v8019_v61 = vpack.c.bf16 %v448_v53, %v445_v52  ;;  %v145_v1 = vld [vmem:[#allocation2 + $0x28] sm:$0xff] }
  0x9a   :  { %5893 = vmatpush1.bf16.msra.mxu0 %v5892_v62  ;;  %9356 = vst [vmem:[#allocation23_spill] sm:$0xff] %v8013_v55  ;;  %9357 = vst [vmem:[#allocation24_spill] sm:$0xff] %v8016_v56  ;;  %v461_v57 = vld [vmem:[#allocation8 + $0xf0] sm:$0xff]  ;;  %v468_v59 = vld [vmem:[#allocation8 + $0x128] sm:$0xff] }
  0x9b   :  { %5895 = vmatprep.subr.bf16.mxu0 %v5894_v63  ;;  %v451_v62 = vld [vmem:[#allocation8 + $0xa0] sm:$0xff]  ;;  %v454_v63 = vld [vmem:[#allocation8 + $0xb8] sm:$0xff]  ;;  %v8024_v2 = vpack.c.bf16 %v464_v58, %v461_v57  ;;  %v8027_v4 = vpack.c.bf16 %v471_v60, %v468_v59  ;;  %v457_v11 = vld [vmem:[#allocation8 + $0xd0] sm:$0xff] }
  0x9c   :  { %5921 = vmatpush3.bf16.msra.mxu1 %v5918_v5  ;;  %v146_v3 = vld [vmem:[#allocation2 + $0x30] sm:$0xff]  ;;  %v470_v6 = vld [vmem:[#allocation8 + $0x138] sm:$0xff]  ;;  %v8030_v10 = vpack.c.bf16 %v454_v63, %v451_v62  ;;  %v460_v12 = vld [vmem:[#allocation8 + $0xe8] sm:$0xff] }
  0x9d   :  { %5923 = vmatprep.subr.bf16.mxu1 %v5922_v14  ;;  %9358 = vst [vmem:[#allocation25_spill] sm:$0xff] %v8024_v2  ;;  %9359 = vst [vmem:[#allocation26_spill] sm:$0xff] %v8027_v4  ;;  %v467_v5 = vld [vmem:[#allocation8 + $0x120] sm:$0xff]  ;;  %v474_v7 = vld [vmem:[#allocation8 + $0x158] sm:$0xff]  ;;  %v8041_v20 = vpack.c.bf16 %v460_v12, %v457_v11 }
  0x9e   :  { %5897 = vmatpush1.bf16.msra.mxu0 %v5896_v8  ;;  %v477_v8 = vld [vmem:[#allocation8 + $0x170] sm:$0xff]  ;;  %v8035_v13 = vpack.c.bf16 %v470_v6, %v467_v5  ;;  %v476_v19 = vld [vmem:[#allocation8 + $0x168] sm:$0xff]  ;;  %v463_v21 = vld [vmem:[#allocation8 + $0x100] sm:$0xff] }
  0x9f   :  { %5931 = vmatprep.subr.bf16.mxu0 %v7975_v9  ;;  %v8038_v15 = vpack.c.bf16 %v477_v8, %v474_v7  ;;  %v473_v16 = vld [vmem:[#allocation8 + $0x150] sm:$0xff]  ;;  %9362 = vst [vmem:[#allocation29_spill] sm:$0xff] %v8041_v20  ;;  %v466_v22 = vld [vmem:[#allocation8 + $0x118] sm:$0xff]  ;;  %v472_v28 = vld [vmem:[#allocation8 + $0x148] sm:$0xff] }
  0xa0   :  { %5925 = vmatpush3.bf16.msra.mxu1 %v5922_v14  ;;  %9360 = vst [vmem:[#allocation27_spill] sm:$0xff] %v8035_v13  ;;  %v147_v14 = vld [vmem:[#allocation2 + $0x38] sm:$0xff]  ;;  %v469_v27 = vld [vmem:[#allocation8 + $0x130] sm:$0xff]  ;;  %v475_v31 = vld [vmem:[#allocation8 + $0x160] sm:$0xff] }
  0xa1   :  { %278 = vmatmul.mubr.f32.vlgmr.msra.gmra.mrb[0].mxu0 %v7972_v36  ;;  %5927 = vmatprep.subr.bf16.mxu1 %v5926_v23  ;;  %v449_v36 = vld [vmem:[#allocation8 + $0x90] sm:$0xff]  ;;  %9361 = vst [vmem:[#allocation28_spill] sm:$0xff] %v8038_v15  ;;  %v8060_v30 = vpack.c.bf16 %v472_v28, %v469_v27  ;;  %v478_v32 = vld [vmem:[#allocation8 + $0x178] sm:$0xff]  ;;  %v561_v39 = vld [vmem:[#allocation10] sm:$0xff] }
  0xa2   :  { %5933 = vmatpush1.bf16.msra.mxu0 %v7977_v17  ;;  %283 = vmatprep.mubr.f32.mxu0 %v9236_v0  ;;  %v8002_v45 = vpack.c.bf16 %v452_v37, %v449_v36  ;;  %v8057_v29 = vld [vmem:[#allocation5] sm:$0xff]  ;;  %v562_v36 = vld [vmem:[#allocation10 + $0x8] sm:$0xff]  ;;  %v565_v37 = vld [vmem:[#allocation10 + $0x20] sm:$0xff] }
  0xa3   :  { %5935 = vmatprep.subr.bf16.mxu0 %v7980_v18  ;;  %9365 = vst [vmem:[#allocation32_spill] sm:$0xff] %v8060_v30  ;;  %v8074_v38 = vpack.c.bf16 %v565_v37, %v562_v36  ;;  %v564_v42 = vld [vmem:[#allocation10 + $0x18] sm:$0xff]  ;;  %v563_v43 = vld [vmem:[#allocation10 + $0x10] sm:$0xff]  ;;  %v566_v47 = vld [vmem:[#allocation10 + $0x28] sm:$0xff] }
  0xa4   :  { %5929 = vmatpush3.bf16.msra.mxu1 %v5926_v23  ;;  %v8048_v23 = vpack.c.bf16 %v476_v19, %v473_v16  ;;  %v8079_v48 = vpack.c.bf16 %v566_v47, %v563_v43  ;;  %v568_v49 = vld [vmem:[#allocation10 + $0x38] sm:$0xff]  ;;  %v571_v50 = vld [vmem:[#allocation10 + $0x50] sm:$0xff]  ;;  %v569_v57 = vld [vmem:[#allocation10 + $0x40] sm:$0xff] }
  0xa5   :  { %284 = vmatmul.mubr.f32.gmra.mrb[2].mxu0 %v141_v24  ;;  %5962 = vmatprep.subr.bf16.mxu1 %v9238_v40  ;;  %9367 = vst [vmem:[#allocation34_spill] sm:$0xff] %v8074_v38  ;;  %v8083_v52 = vpack.c.bf16 %v571_v50, %v568_v49  ;;  %v567_v53 = vld [vmem:[#allocation10 + $0x30] sm:$0xff]  ;;  %v572_v59 = vld [vmem:[#allocation10 + $0x58] sm:$0xff]  ;;  %v574_v60 = vld [vmem:[#allocation10 + $0x68] sm:$0xff] }
  0xa6   :  { %5937 = vmatpush1.bf16.msra.mxu0 %v7985_v25  ;;  %289 = vmatprep.mubr.f32.mxu0 %v9236_v0  ;;  %9363 = vst [vmem:[#allocation30_spill] sm:$0xff] %v8048_v23  ;;  %9369 = vst [vmem:[#allocation36_spill] sm:$0xff] %v8079_v48  ;;  %v577_v62 = vld [vmem:[#allocation10 + $0x80] sm:$0xff]  ;;  %v8089_v63 = vpack.c.bf16 %v572_v59, %v569_v57  ;;  %v576_v5 = vld [vmem:[#allocation10 + $0x78] sm:$0xff] }
  0xa7   :  { %5939 = vmatprep.subr.bf16.mxu0 %v7988_v26  ;;  %4980 = vmatmul.mubr.f32.vlgmr.msra.gmra.mrb[0].mxu1 %v141_v24  ;;  %v8052_v24 = vpack.c.bf16 %v466_v22, %v463_v21  ;;  %9370 = vst [vmem:[#allocation37_spill] sm:$0xff] %v8083_v52  ;;  %v575_v6 = vld [vmem:[#allocation10 + $0x70] sm:$0xff]  ;;  %v578_v8 = vld [vmem:[#allocation10 + $0x88] sm:$0xff]  ;;  %v580_v12 = vld [vmem:[#allocation10 + $0x98] sm:$0xff] }
  0xa8   :  { %5964 = vmatpush3.bf16.msra.mxu1 %v7998_v41  ;;  %4982 = vmatprep.mubr.f32.mxu1 %v142_v33  ;;  %9372 = vst [vmem:[#allocation39_spill] sm:$0xff] %v8089_v63  ;;  %v8099_v11 = vpack.c.bf16 %v578_v8, %v575_v6  ;;  %v579_v19 = vld [vmem:[#allocation10 + $0x90] sm:$0xff]  ;;  %v582_v21 = vld [vmem:[#allocation10 + $0xa8] sm:$0xff]  ;;  %v581_v22 = vld [vmem:[#allocation10 + $0xa0] sm:$0xff] }
  0xa9   :  { %290 = vmatmul.mubr.f32.gmra.mrb[4].mxu0 %v142_v33  ;;  %5965 = vmatprep.subr.bf16.mxu1 %v9238_v40  ;;  %9364 = vst [vmem:[#allocation31_spill] sm:$0xff] %v8052_v24  ;;  %v8066_v33 = vpack.c.bf16 %v478_v32, %v475_v31  ;;  %v8106_v27 = vpack.c.bf16 %v582_v21, %v579_v19  ;;  %v584_v28 = vld [vmem:[#allocation10 + $0xb8] sm:$0xff]  ;;  %v586_v32 = vld [vmem:[#allocation10 + $0xc8] sm:$0xff]  ;;  %v589_v36 = vld [vmem:[#allocation10 + $0xe0] sm:$0xff] }
  0xaa   :  { %5941 = vmatpush1.bf16.msra.mxu0 %v7992_v34  ;;  %295 = vmatprep.mubr.f32.mxu0 %v9236_v0  ;;  %9375 = vst [vmem:[#allocation42_spill] sm:$0xff] %v8099_v11  ;;  %v8109_v31 = vpack.c.bf16 %v584_v28, %v581_v22  ;;  %v8113_v37 = vpack.c.bf16 %v589_v36, %v586_v32  ;;  %v587_v43 = vld [vmem:[#allocation10 + $0xd0] sm:$0xff]  ;;  %v590_v49 = vld [vmem:[#allocation10 + $0xe8] sm:$0xff]  ;;  %v600_v21 = vld [vmem:[#allocation10 + $0x138] sm:$0xff] }
  0xab   :  { %5943 = vmatprep.subr.bf16.mxu0 %v7995_v35  ;;  %4983 = vmatmul.mubr.f32.gmra.mrb[2].mxu1 %v143_v44  ;;  %9366 = vst [vmem:[#allocation33_spill] sm:$0xff] %v8066_v33  ;;  %9377 = vst [vmem:[#allocation44_spill] sm:$0xff] %v8106_v27  ;;  %v8119_v50 = vpack.c.bf16 %v590_v49, %v587_v43  ;;  %v591_v57 = vld [vmem:[#allocation10 + $0xf0] sm:$0xff]  ;;  %v598_v8 = vld [vmem:[#allocation10 + $0x128] sm:$0xff] }
  0xac   :  { %5967 = vmatpush3.bf16.msra.mxu1 %v8008_v51  ;;  %4985 = vmatprep.mubr.f32.mxu1 %v144_v54  ;;  %9378 = vst [vmem:[#allocation45_spill] sm:$0xff] %v8109_v31  ;;  %9379 = vst [vmem:[#allocation46_spill] sm:$0xff] %v8113_v37  ;;  %v599_v22 = vld [vmem:[#allocation10 + $0x130] sm:$0xff]  ;;  %v602_v28 = vld [vmem:[#allocation10 + $0x148] sm:$0xff] }
  0xad   :  { %296 = vmatmul.mubr.f32.gmra.mrb[6].mxu0 %v143_v44  ;;  %5968 = vmatprep.subr.bf16.mxu1 %v9238_v40  ;;  %v8076_v44 = vpack.c.bf16 %v564_v42, %v561_v39  ;;  %v585_v39 = vld [vmem:[#allocation10 + $0xc0] sm:$0xff]  ;;  %v588_v42 = vld [vmem:[#allocation10 + $0xd8] sm:$0xff]  ;;  %9381 = vst [vmem:[#allocation48_spill] sm:$0xff] %v8119_v50  ;;  %v607_v36 = vld [vmem:[#allocation10 + $0x170] sm:$0xff] }
  0xae   :  { %5945 = vmatpush1.bf16.msra.mxu0 %v8002_v45  ;;  %301 = vmatprep.mubr.f32.mxu0 %v9236_v0  ;;  %v8116_v47 = vpack.c.bf16 %v588_v42, %v585_v39  ;;  %v604_v32 = vld [vmem:[#allocation10 + $0x158] sm:$0xff]  ;;  %v8138_v42 = vpack.c.bf16 %v602_v28, %v599_v22  ;;  %v603_v49 = vld [vmem:[#allocation10 + $0x150] sm:$0xff] }
  0xaf   :  { %5947 = vmatprep.subr.bf16.mxu0 %v8005_v46  ;;  %4986 = vmatmul.mubr.f32.gmra.mrb[4].mxu1 %v145_v1  ;;  %9368 = vst [vmem:[#allocation35_spill] sm:$0xff] %v8076_v44  ;;  %v8140_v43 = vpack.c.bf16 %v607_v36, %v604_v32  ;;  %v196_v28 = vld [vmem:[%s9226_s4] sm:$0x7] }
  0xb0   :  { %5970 = vmatpush3.bf16.msra.mxu1 %v8019_v61  ;;  %4988 = vmatprep.mubr.f32.mxu1 %v146_v3  ;;  %9380 = vst [vmem:[#allocation47_spill] sm:$0xff] %v8116_v47  ;;  %9387 = vst [vmem:[#allocation54_spill] sm:$0xff] %v8138_v42 }
  0xb1   :  { %302 = vmatmul.mubr.f32.gmra.mrb[8].mxu0 %v144_v54  ;;  %5971 = vmatprep.subr.bf16.mxu1 %v9238_v40  ;;  %v570_v54 = vld [vmem:[#allocation10 + $0x48] sm:$0xff]  ;;  %9388 = vst [vmem:[#allocation55_spill] sm:$0xff] %v8140_v43 }
  0xb2   :  { %5949 = vmatpush1.bf16.msra.mxu0 %v8013_v55  ;;  %307 = vmatprep.mubr.f32.mxu0 %v9236_v0  ;;  %v8086_v58 = vpack.c.bf16 %v570_v54, %v567_v53  ;;  %v592_v53 = vld [vmem:[#allocation10 + $0xf8] sm:$0xff]  ;;  %v595_v54 = vld [vmem:[#allocation10 + $0x110] sm:$0xff] }
  0xb3   :  { %5951 = vmatprep.subr.bf16.mxu0 %v8016_v56  ;;  %4989 = vmatmul.mubr.f32.gmra.mrb[6].mxu1 %v147_v14  ;;  %v8122_v59 = vpack.c.bf16 %v595_v54, %v592_v53  ;;  %v606_v53 = vld [vmem:[#allocation10 + $0x168] sm:$0xff]  ;;  %v605_v54 = vld [vmem:[#allocation10 + $0x160] sm:$0xff] }
  0xb4   :  { %5973 = vmatpush3.bf16.msra.mxu1 %v8030_v10  ;;  %5023 = vmatprep.mubr.msk.f32.mxu1 %vm7793_vm0, %v9236_v0  ;;  %9371 = vst [vmem:[#allocation38_spill] sm:$0xff] %v8086_v58 }
  0xb5   :  { %308 = vmatmul.mubr.f32.gmra.mrb[10].mxu0 %v145_v1  ;;  %5974 = vmatprep.subr.bf16.mxu1 %v9238_v40  ;;  %v8091_v1 = vpack.c.bf16 %v577_v62, %v574_v60  ;;  %9382 = vst [vmem:[#allocation49_spill] sm:$0xff] %v8122_v59  ;;  %v594_v60 = vld [vmem:[#allocation10 + $0x108] sm:$0xff]  ;;  %v593_v62 = vld [vmem:[#allocation10 + $0x100] sm:$0xff] }
  0xb6   :  { %5953 = vmatpush1.bf16.msra.mxu0 %v8024_v2  ;;  %313 = vmatprep.mubr.f32.mxu0 %v9236_v0 }
  0xb7   :  { %5955 = vmatprep.subr.bf16.mxu0 %v8027_v4  ;;  %9373 = vst [vmem:[#allocation40_spill] sm:$0xff] %v8091_v1 }
  0xb8   :  { %5976 = vmatpush3.bf16.msra.mxu1 %v8041_v20 }
  0xb9   :  { %314 = vmatmul.mubr.f32.gmra.mrb[12].mxu0 %v146_v3  ;;  %5977 = vmatprep.subr.bf16.mxu1 %v9238_v40  ;;  %v573_v3 = vld [vmem:[#allocation10 + $0x60] sm:$0xff] }
  0xba   :  { %5957 = vmatpush1.bf16.msra.mxu0 %v8035_v13  ;;  %319 = vmatprep.mubr.f32.mxu0 %v9236_v0  ;;  %v8097_v7 = vpack.c.bf16 %v576_v5, %v573_v3  ;;  %v596_v3 = vld [vmem:[#allocation10 + $0x118] sm:$0xff]  ;;  %v8125_v5 = vpack.c.bf16 %v594_v60, %v591_v57  ;;  %v480_v60 = vld [vmem:[#allocation11 + $0x8] sm:$0xff] }
  0xbb   :  { %5959 = vmatprep.subr.bf16.mxu0 %v8038_v15  ;;  %v8127_v6 = vpack.c.bf16 %v596_v3, %v593_v62  ;;  %v608_v57 = vld [vmem:[#allocation10 + $0x178] sm:$0xff]  ;;  %v483_v62 = vld [vmem:[#allocation11 + $0x20] sm:$0xff]  ;;  %v8144_v3 = vpack.c.bf16 %v606_v53, %v603_v49 }
  0xbc   :  { %5979 = vmatpush3.bf16.msra.mxu1 %v8052_v24  ;;  %9374 = vst [vmem:[#allocation41_spill] sm:$0xff] %v8097_v7  ;;  %9383 = vst [vmem:[#allocation50_spill] sm:$0xff] %v8125_v5 }
  0xbd   :  { %320 = vmatmul.mubr.f32.gmra.mrb[14].mxu0 %v147_v14  ;;  %5980 = vmatprep.subr.bf16.mxu1 %v9238_v40  ;;  %v583_v14 = vld [vmem:[#allocation10 + $0xb0] sm:$0xff]  ;;  %9384 = vst [vmem:[#allocation51_spill] sm:$0xff] %v8127_v6  ;;  %9389 = vst [vmem:[#allocation56_spill] sm:$0xff] %v8144_v3 }
  0xbe   :  { %5961 = vmatpush1.bf16.msra.mxu0 %v8048_v23  ;;  %693 = vmatprep.mubr.f32.mxu0 %v9236_v0  ;;  %v8103_v16 = vpack.c.bf16 %v583_v14, %v580_v12  ;;  %v601_v12 = vld [vmem:[#allocation10 + $0x140] sm:$0xff] }
  0xbf   :  { %5987 = vmatprep.subr.bf16.mxu0 %v8074_v38  ;;  %v597_v14 = vld [vmem:[#allocation10 + $0x120] sm:$0xff]  ;;  %v8131_v19 = vpack.c.bf16 %v601_v12, %v598_v8  ;;  %v8148_v8 = vpack.c.bf16 %v608_v57, %v605_v54  ;;  %v8150_v12 = vpack.c.bf16 %v483_v62, %v480_v60 }
  0xc0   :  { %5982 = vmatpush3.bf16.msra.mxu1 %v8060_v30  ;;  %9376 = vst [vmem:[#allocation43_spill] sm:$0xff] %v8103_v16  ;;  %v8134_v39 = vpack.c.bf16 %v600_v21, %v597_v14  ;;  %v198_v14 = vlaneseq }
  0xc1   :  { %694 = vmatmul.mubr.f32.vlgmr.msra.gmra.mrb[0].mxu0 %v8057_v29  ;;  %5983 = vmatprep.subr.bf16.mxu1 %v9238_v40  ;;  %9385 = vst [vmem:[#allocation52_spill] sm:$0xff] %v8131_v19  ;;  %9390 = vst [vmem:[#allocation57_spill] sm:$0xff] %v8148_v8 }
  0xc2   :  { %854 = vmatprep.mubr.f32.mxu0 %v9236_v0  ;;  %5989 = vmatpush1.bf16.msra.mxu0 %v8076_v44  ;;  %9386 = vst [vmem:[#allocation53_spill] sm:$0xff] %v8134_v39  ;;  %9391 = vst [vmem:[#allocation58_spill] sm:$0xff] %v8150_v12  ;;  %v199_v21 = vshrl.u32 %v198_v14, 7 }
  0xc3   :  { %5991 = vmatprep.subr.bf16.mxu0 %v8083_v52 }
  0xc4   :  { %5985 = vmatpush3.bf16.msra.mxu1 %v8066_v33  ;;  %v8157_v22 = vsub.s32 2, %v199_v21 }
  0xc5   :  { %6018 = vmatprep.subr.bf16.mxu1 %v9238_v40 }
  0xc6   :  { %5993 = vmatpush1.bf16.msra.mxu0 %v8086_v58  ;;  %9392 = vst [vmem:[#allocation59_spill] sm:$0xff] %v8157_v22  ;;  %v209_v32 = vrot.slane %v196_v28, %v8157_v22 }
  0xc7   :  { %5024 = vmatmul.mubr.f32.vlgmr.msra.gmra.mrb[8].mxu1 %v8057_v29  ;;  %5995 = vmatprep.subr.bf16.mxu0 %v8091_v1 }
  0xc8   :  { %5058 = vmatprep.mubr.msk.f32.mxu1 %vm7793_vm0, %v9236_v0  ;;  %6020 = vmatpush3.bf16.msra.mxu1 %v8079_v48 }
  0xc9   :  { %6021 = vmatprep.subr.bf16.mxu1 %v9238_v40 }
  0xca   :  { %5997 = vmatpush1.bf16.msra.mxu0 %v8097_v7 }
  0xcb   :  { %5999 = vmatprep.subr.bf16.mxu0 %v8103_v16 }
  0xcc   :  { %6023 = vmatpush3.bf16.msra.mxu1 %v8089_v63 }
  0xcd   :  { %6024 = vmatprep.subr.bf16.mxu1 %v9238_v40 }
  0xce   :  { %6001 = vmatpush1.bf16.msra.mxu0 %v8106_v27 }
  0xcf   :  { %6003 = vmatprep.subr.bf16.mxu0 %v8113_v37 }
  0xd0   :  { %6026 = vmatpush3.bf16.msra.mxu1 %v8099_v11 }
  0xd1   :  { %6027 = vmatprep.subr.bf16.mxu1 %v9238_v40 }
  0xd2   :  { %6005 = vmatpush1.bf16.msra.mxu0 %v8116_v47 }
  0xd3   :  { %6007 = vmatprep.subr.bf16.mxu0 %v8122_v59 }
  0xd4   :  { %6029 = vmatpush3.bf16.msra.mxu1 %v8109_v31 }
  0xd5   :  { %6030 = vmatprep.subr.bf16.mxu1 %v9238_v40 }
  0xd6   :  { %6009 = vmatpush1.bf16.msra.mxu0 %v8125_v5 }
  0xd7   :  { %6011 = vmatprep.subr.bf16.mxu0 %v8131_v19 }
  0xd8   :  { %6032 = vmatpush3.bf16.msra.mxu1 %v8119_v50 }
  0xd9   :  { %6033 = vmatprep.subr.bf16.mxu1 %v9238_v40 }
  0xda   :  { %6013 = vmatpush1.bf16.msra.mxu0 %v8134_v39 }
  0xdb   :  { %6015 = vmatprep.subr.bf16.mxu0 %v8140_v43 }
  0xdc   :  { %6035 = vmatpush3.bf16.msra.mxu1 %v8127_v6 }
  0xdd   :  { %6036 = vmatprep.subr.bf16.mxu1 %v9238_v40 }
  0xde   :  { %6017 = vmatpush1.bf16.msra.mxu0 %v8144_v3 }
  0xdf   :  { %6043 = vmatprep.subr.bf16.mxu0 %v8150_v12 }
  0xe0   :  { %6038 = vmatpush3.bf16.msra.mxu1 %v8138_v42 }
  0xe1   :  { %6039 = vmatprep.subr.bf16.mxu1 %v9238_v40 }
  0xe4   :  { %6041 = vmatpush3.bf16.msra.mxu1 %v8148_v8  ;;  %v8173_v8 = vsub.s32 0, %v199_v21 }
  0xe5   :  { %6074 = vmatprep.subr.bf16.mxu1 %v9238_v40 }
  0xe6   :  { %9398 = vst [vmem:[#allocation65_spill] sm:$0xff] %v8173_v8 }
 0x17a   :  { %v4981_v36 = vpop.f32.mrb[0].mxu1 }
 0x17b   :  { %v8163_v49 = vadd.f32 %v4981_v36, %v209_v32  ;;  %v392_v53 = vpop.f32.mrb[1].mxu1  ;;  %v527_v36 = vld [vmem:[%s9227_s5] sm:$0x7] }
 0x17d   :  { %9393 = vst [vmem:[#allocation60_spill] sm:$0xff] %v8163_v49 }
 0x17e   :  { %v4984_v54 = vpop.f32.mrb[2].mxu1 }
 0x17f   :  { %v8165_v57 = vadd.f32 %v4984_v54, %v209_v32  ;;  %v402_v60 = vpop.f32.mrb[3].mxu1 }
 0x180   :  { %v8167_v62 = vadd.f32 %v402_v60, %v209_v32  ;;  %v201_v60 = vrot.slane %v196_v28, %v8173_v8 }
 0x181   :  { %9394 = vst [vmem:[#allocation61_spill] sm:$0xff] %v8165_v57 }
 0x182   :  { %9395 = vst [vmem:[#allocation62_spill] sm:$0xff] %v8167_v62  ;;  %v4987_v0 = vpop.f32.mrb[4].mxu1 }
 0x183   :  { %v8169_v14 = vadd.f32 %v4987_v0, %v209_v32  ;;  %v412_v40 = vpop.f32.mrb[5].mxu1  ;;  %v532_v0 = vrot.slane %v527_v36, %v8173_v8 }
 0x184   :  { %v8171_v12 = vadd.f32 %v412_v40, %v209_v32  ;;  %v8186_v40 = vsub.s32 1, %v199_v21 }
 0x185   :  { %9396 = vst [vmem:[#allocation63_spill] sm:$0xff] %v8169_v14  ;;  %v8184_v14 = vadd.f32 %v532_v0, %v201_v60 }
 0x186   :  { %9397 = vst [vmem:[#allocation64_spill] sm:$0xff] %v8171_v12  ;;  %v4990_v49 = vpop.f32.mrb[6].mxu1  ;;  %9402 = vst [vmem:[#allocation69_spill] sm:$0xff] %v8186_v40  ;;  %v205_v43 = vrot.slane %v196_v28, %v8186_v40  ;;  %v536_v42 = vrot.slane %v527_v36, %v8186_v40 }
 0x187   :  { %v8178_v3 = vadd.f32 %v4990_v49, %v209_v32  ;;  %v422_v54 = vpop.f32.mrb[7].mxu1  ;;  %9401 = vst [vmem:[#allocation68_spill] sm:$0xff] %v8184_v14 }
 0x188   :  { %v8180_v57 = vadd.f32 %v422_v54, %v209_v32  ;;  %v8191_v54 = vadd.f32 %v536_v42, %v205_v43 }
 0x189   :  { %9399 = vst [vmem:[#allocation66_spill] sm:$0xff] %v8178_v3 }
 0x18a   :  { %9400 = vst [vmem:[#allocation67_spill] sm:$0xff] %v8180_v57  ;;  %9403 = vst [vmem:[#allocation70_spill] sm:$0xff] %v8191_v54 }
 0x194   :  { %v695_v12 = vpop.f32.mrb[0].mxu0 }
 0x195   :  { %v7299_v62 = vadd.f32 %v8184_v14, %v695_v12  ;;  %v697_v49 = vpop.f32.mrb[1].mxu0  ;;  %v8195_v12 = vrot.slane %v527_v36, %v8157_v22  ;;  %v486_v36 = vld [vmem:[#allocation11 + $0x38] sm:$0xff]  ;;  %v489_v22 = vld [vmem:[#allocation11 + $0x50] sm:$0xff] }
 0x196   :  { %v7301_v57 = vadd.f32 %v8191_v54, %v697_v49 }
 0x197   :  { %v4465_v3 = vmul.f32 -1.442695, %v7299_v62  ;;  %9404 = vst [vmem:[#allocation71_spill] sm:$0xff] %v8195_v12  ;;  %v393_v62 = vadd.f32 %v392_v53, %v209_v32  ;;  %v485_v32 = vld [vmem:[#allocation11 + $0x30] sm:$0xff] }
 0x198   :  { %v4466_v60 = vmul.f32 -1.442695, %v7301_v57 }
 0x199   :  { %7410 = vpow2.f32 %v4465_v3 }
 0x19a   :  { %v766_v39 = vpop.f32.mrb[8].mxu1  ;;  %7412 = vpow2.f32 %v4466_v60  ;;  %v481_v60 = vld [vmem:[#allocation11 + $0x10] sm:$0xff] }
 0x19b   :  { %v5025_v8 = vpop.f32.mrb[9].mxu1  ;;  %v767_v28 = vadd.f32 %v766_v39, %v8195_v12 }
 0x19c   :  { %v479_v8 = vld [vmem:[#allocation11] sm:$0xff] }
 0x1a3   :  { %v7411_v0 = vpop.eup %7410 }
 0x1a4   :  { %v774_v21 = vadd.f32 1.0, %v7411_v0  ;;  %v7413_v14 = vpop.eup %7412  ;;  %v482_v0 = vld [vmem:[#allocation11 + $0x18] sm:$0xff] }
 0x1a5   :  { %v781_v42 = vadd.f32 1.0, %v7413_v14  ;;  %v8199_v39 = vpack.c.bf16 %v482_v0, %v479_v8  ;;  %v8205_v14 = vpack.c.bf16 %v489_v22, %v486_v36  ;;  %v9409_v22 = vmov 0.0|0.0   ;;  %v493_v8 = vld [vmem:[#allocation11 + $0x70] sm:$0xff]  ;;  %v498_v0 = vld [vmem:[#allocation11 + $0x98] sm:$0xff] }
 0x1a6   :  { %7414 = vrcp.f32 %v774_v21  ;;  %v484_v21 = vld [vmem:[#allocation11 + $0x28] sm:$0xff] }
 0x1a7   :  { %v8201_v12 = vpack.c.bf16 %v484_v21, %v481_v60  ;;  %9406 = vst [vmem:[#allocation73_spill] sm:$0xff] %v8205_v14  ;;  %v501_v60 = vld [vmem:[#allocation11 + $0xb0] sm:$0xff]  ;;  %v9411_v21 = vmov 0.0  }
 0x1a9   :  { %9405 = vst [vmem:[#allocation72_spill] sm:$0xff] %v8201_v12 }
 0x1b0   :  { %v7415_v40 = vpop.eup %7414 }
 0x1b1   :  { %v784_v3 = vmul.f32 %v7415_v40, %v767_v28  ;;  %v488_v40 = vld [vmem:[#allocation11 + $0x48] sm:$0xff]  ;;  %v487_v28 = vld [vmem:[#allocation11 + $0x40] sm:$0xff] }
 0x1b3   :  { %v785_v43 = vadd.f32 %v784_v3, %v393_v62  ;;  %v490_v62 = vld [vmem:[#allocation11 + $0x58] sm:$0xff]  ;;  %v495_v3 = vld [vmem:[#allocation11 + $0x80] sm:$0xff] }
 0x1b5   :  { %7416 = vtanh.f32 %v785_v43 }
 0x1b6   :  { %7418 = vrcp.f32 %v781_v42  ;;  %v8213_v42 = vpack.c.bf16 %v490_v62, %v487_v28  ;;  %v8230_v28 = vpack.c.bf16 %v501_v60, %v498_v0  ;;  %v500_v62 = vld [vmem:[#allocation11 + $0xa8] sm:$0xff]  ;;  %v506_v0 = vld [vmem:[#allocation11 + $0xd8] sm:$0xff]  ;;  %v505_v60 = vld [vmem:[#allocation11 + $0xd0] sm:$0xff] }
 0x1b8   :  { %9408 = vst [vmem:[#allocation75_spill] sm:$0xff] %v8213_v42  ;;  %9414 = vst [vmem:[#allocation79_spill] sm:$0xff] %v8230_v28 }
 0x1bf   :  { %v7417_v49 = vpop.eup %7416 }
 0x1c0   :  { %v787_v57 = vsub.f32 %v8057_v29, %v7417_v49  ;;  %v7419_v54 = vpop.eup %7418  ;;  %v492_v29 = vld [vmem:[#allocation11 + $0x68] sm:$0xff] }
 0x1c1   :  { %v8217_v43 = vpack.c.bf16 %v495_v3, %v492_v29  ;;  %v499_v29 = vld [vmem:[#allocation11 + $0xa0] sm:$0xff]  ;;  %v502_v3 = vld [vmem:[#allocation11 + $0xb8] sm:$0xff] }
 0x1c2   :  { %v788_v19 = vmul.f32 %v7419_v54, %v787_v57  ;;  %v8211_v54 = vpack.c.bf16 %v488_v40, %v485_v32  ;;  %v496_v57 = vld [vmem:[#allocation11 + $0x88] sm:$0xff]  ;;  %v497_v40 = vld [vmem:[#allocation11 + $0x90] sm:$0xff] }
 0x1c3   :  { %9410 = vst [vmem:[#allocation76_spill] sm:$0xff] %v8217_v43  ;;  %v8226_v32 = vpack.c.bf16 %v496_v57, %v493_v8  ;;  %v503_v8 = vld [vmem:[#allocation11 + $0xc0] sm:$0xff] }
 0x1c4   :  { %v8203_v53 = vadd.f32 %v7417_v49, %v788_v19  ;;  %9407 = vst [vmem:[#allocation74_spill] sm:$0xff] %v8211_v54  ;;  %v491_v19 = vld [vmem:[#allocation11 + $0x60] sm:$0xff]  ;;  %v494_v49 = vld [vmem:[#allocation11 + $0x78] sm:$0xff] }
 0x1c5   :  { %v8224_v36 = vpack.c.bf16 %v494_v49, %v491_v19  ;;  %9413 = vst [vmem:[#allocation78_spill] sm:$0xff] %v8226_v32  ;;  %v8234_v19 = vpack.c.bf16 %v500_v62, %v497_v40  ;;  %v8236_v49 = vpack.c.bf16 %v502_v3, %v499_v29  ;;  %v8244_v40 = vpack.c.bf16 %v506_v0, %v503_v8  ;;  %v509_v29 = vld [vmem:[#allocation11 + $0xf0] sm:$0xff]  ;;  %v511_v3 = vld [vmem:[#allocation11 + $0x100] sm:$0xff] }
 0x1c6   :  { %855 = vmatmul.mubr.f32.vlgmr.msra.gmra.mrb[16].mxu0 %v8203_v53  ;;  %5059 = vmatmul.mubr.f32.vlgmr.msra.gmra.mrb[10].mxu1 %v8203_v53  ;;  %v515_v0 = vld [vmem:[#allocation11 + $0x120] sm:$0xff] }
 0x1c7   :  { %6045 = vmatpush1.bf16.msra.mxu0 %v8199_v39  ;;  %6076 = vmatpush3.bf16.msra.mxu1 %v8201_v12  ;;  %9412 = vst [vmem:[#allocation77_spill] sm:$0xff] %v8224_v36  ;;  %v507_v12 = vld [vmem:[#allocation11 + $0xe0] sm:$0xff]  ;;  %9415 = vst [vmem:[#allocation80_spill] sm:$0xff] %v8234_v19 }
 0x1c8   :  { %6047 = vmatprep.subr.bf16.mxu0 %v8205_v14  ;;  %6077 = vmatprep.subr.bf16.mxu1 %v9409_v22  ;;  %v504_v14 = vld [vmem:[#allocation11 + $0xc8] sm:$0xff]  ;;  %9416 = vst [vmem:[#allocation81_spill] sm:$0xff] %v8236_v49 }
 0x1c9   :  { %995 = vmatprep.mubr.f32.mxu0 %v9411_v21  ;;  %5093 = vmatprep.mubr.msk.f32.mxu1 %vm7793_vm0, %v9411_v21  ;;  %v8240_v57 = vpack.c.bf16 %v507_v12, %v504_v14  ;;  %v512_v14 = vld [vmem:[#allocation11 + $0x108] sm:$0xff] }
 0x1ca   :  { %v8254_v8 = vpack.c.bf16 %v512_v14, %v509_v29  ;;  %v521_v14 = vld [vmem:[#allocation11 + $0x150] sm:$0xff] }
 0x1cb   :  { %6049 = vmatpush1.bf16.msra.mxu0 %v8211_v54  ;;  %6079 = vmatpush3.bf16.msra.mxu1 %v8213_v42  ;;  %9417 = vst [vmem:[#allocation82_spill] sm:$0xff] %v8240_v57  ;;  %v510_v42 = vld [vmem:[#allocation11 + $0xf8] sm:$0xff]  ;;  %v513_v54 = vld [vmem:[#allocation11 + $0x110] sm:$0xff] }
 0x1cc   :  { %6051 = vmatprep.subr.bf16.mxu0 %v8217_v43  ;;  %6080 = vmatprep.subr.bf16.mxu1 %v9409_v22  ;;  %v508_v43 = vld [vmem:[#allocation11 + $0xe8] sm:$0xff]  ;;  %v8250_v12 = vpack.c.bf16 %v513_v54, %v510_v42  ;;  %9419 = vst [vmem:[#allocation84_spill] sm:$0xff] %v8254_v8  ;;  %v518_v42 = vld [vmem:[#allocation11 + $0x138] sm:$0xff] }
 0x1cd   :  { %v8246_v62 = vpack.c.bf16 %v508_v43, %v505_v60  ;;  %v517_v60 = vld [vmem:[#allocation11 + $0x130] sm:$0xff]  ;;  %v8264_v29 = vpack.c.bf16 %v518_v42, %v515_v0  ;;  %v9423_v42 = vld [vmem:[#allocation55_spill] sm:$0xff] }
 0x1ce   :  { %9418 = vst [vmem:[#allocation83_spill] sm:$0xff] %v8250_v12 }
 0x1cf   :  { %6053 = vmatpush1.bf16.msra.mxu0 %v8224_v36  ;;  %6082 = vmatpush3.bf16.msra.mxu1 %v8226_v32  ;;  %v516_v32 = vld [vmem:[#allocation11 + $0x128] sm:$0xff]  ;;  %v519_v36 = vld [vmem:[#allocation11 + $0x140] sm:$0xff] }
 0x1d0   :  { %6055 = vmatprep.subr.bf16.mxu0 %v8230_v28  ;;  %6083 = vmatprep.subr.bf16.mxu1 %v9409_v22  ;;  %v514_v28 = vld [vmem:[#allocation11 + $0x118] sm:$0xff]  ;;  %v8260_v54 = vpack.c.bf16 %v519_v36, %v516_v32  ;;  %v524_v32 = vld [vmem:[#allocation11 + $0x168] sm:$0xff] }
 0x1d1   :  { %v8256_v43 = vpack.c.bf16 %v514_v28, %v511_v3  ;;  %v523_v3 = vld [vmem:[#allocation11 + $0x160] sm:$0xff] }
 0x1d3   :  { %6057 = vmatpush1.bf16.msra.mxu0 %v8234_v19  ;;  %6085 = vmatpush3.bf16.msra.mxu1 %v8236_v49  ;;  %v522_v49 = vld [vmem:[#allocation11 + $0x158] sm:$0xff]  ;;  %v525_v19 = vld [vmem:[#allocation11 + $0x170] sm:$0xff] }
 0x1d4   :  { %6059 = vmatprep.subr.bf16.mxu0 %v8240_v57  ;;  %6086 = vmatprep.subr.bf16.mxu1 %v9409_v22  ;;  %v520_v57 = vld [vmem:[#allocation11 + $0x148] sm:$0xff]  ;;  %v8270_v36 = vpack.c.bf16 %v525_v19, %v522_v49  ;;  %v8282_v19 = vld [vmem:[#allocation5 + $0x8] sm:$0xff]  ;;  %v9420_v49 = vld [vmem:[#allocation52_spill] sm:$0xff] }
 0x1d5   :  { %v8266_v28 = vpack.c.bf16 %v520_v57, %v517_v60  ;;  %v9421_v57 = vld [vmem:[#allocation53_spill] sm:$0xff]  ;;  %v9424_v60 = vld [vmem:[#allocation56_spill] sm:$0xff] }
 0x1d7   :  { %6061 = vmatpush1.bf16.msra.mxu0 %v8244_v40  ;;  %6088 = vmatpush3.bf16.msra.mxu1 %v8246_v62 }
 0x1d8   :  { %6063 = vmatprep.subr.bf16.mxu0 %v8250_v12  ;;  %6089 = vmatprep.subr.bf16.mxu1 %v9409_v22  ;;  %v526_v12 = vld [vmem:[#allocation11 + $0x178] sm:$0xff] }
 0x1d9   :  { %v8276_v0 = vpack.c.bf16 %v526_v12, %v523_v3  ;;  %v9422_v12 = vld [vmem:[#allocation54_spill] sm:$0xff] }
 0x1db   :  { %6065 = vmatpush1.bf16.msra.mxu0 %v8254_v8  ;;  %6091 = vmatpush3.bf16.msra.mxu1 %v8256_v43  ;;  %v8274_v8 = vpack.c.bf16 %v524_v32, %v521_v14  ;;  %v9425_v14 = vld [vmem:[#allocation57_spill] sm:$0xff]  ;;  %v9426_v32 = vld [vmem:[#allocation58_spill] sm:$0xff] }
 0x1dc   :  { %6067 = vmatprep.subr.bf16.mxu0 %v8260_v54  ;;  %6092 = vmatprep.subr.bf16.mxu1 %v9409_v22 }
 0x1df   :  { %6069 = vmatpush1.bf16.msra.mxu0 %v8264_v29  ;;  %6094 = vmatpush3.bf16.msra.mxu1 %v8266_v28 }
 0x1e0   :  { %6071 = vmatprep.subr.bf16.mxu0 %v8270_v36  ;;  %6095 = vmatprep.subr.bf16.mxu1 %v9409_v22 }
 0x1e3   :  { %6073 = vmatpush1.bf16.msra.mxu0 %v8274_v8  ;;  %6097 = vmatpush3.bf16.msra.mxu1 %v8276_v0 }
 0x1e4   :  { %6099 = vmatprep.subr.bf16.mxu0 %v7975_v9  ;;  %6130 = vmatprep.subr.bf16.mxu1 %v9409_v22 }
 0x1e6   :  { %996 = vmatmul.mubr.f32.vlgmr.msra.gmra.mrb[16].mxu0 %v8282_v19  ;;  %5094 = vmatmul.mubr.f32.vlgmr.msra.gmra.mrb[12].mxu1 %v8282_v19 }
 0x1e7   :  { %6101 = vmatpush1.bf16.msra.mxu0 %v7977_v17  ;;  %6132 = vmatpush3.bf16.msra.mxu1 %v7998_v41 }
 0x1e8   :  { %6103 = vmatprep.subr.bf16.mxu0 %v7980_v18  ;;  %6133 = vmatprep.subr.bf16.mxu1 %v9409_v22 }
 0x1e9   :  { %1156 = vmatprep.mubr.f32.mxu0 %v9411_v21  ;;  %5128 = vmatprep.mubr.msk.f32.mxu1 %vm7793_vm0, %v9411_v21 }
 0x1eb   :  { %6105 = vmatpush1.bf16.msra.mxu0 %v7985_v25  ;;  %6135 = vmatpush3.bf16.msra.mxu1 %v8008_v51 }
 0x1ec   :  { %6107 = vmatprep.subr.bf16.mxu0 %v7988_v26  ;;  %6136 = vmatprep.subr.bf16.mxu1 %v9409_v22 }
 0x1ef   :  { %6109 = vmatpush1.bf16.msra.mxu0 %v7992_v34  ;;  %6138 = vmatpush3.bf16.msra.mxu1 %v8019_v61 }
 0x1f0   :  { %6111 = vmatprep.subr.bf16.mxu0 %v7995_v35  ;;  %6139 = vmatprep.subr.bf16.mxu1 %v9409_v22 }
 0x1f3   :  { %6113 = vmatpush1.bf16.msra.mxu0 %v8002_v45  ;;  %6141 = vmatpush3.bf16.msra.mxu1 %v8030_v10 }
 0x1f4   :  { %6115 = vmatprep.subr.bf16.mxu0 %v8005_v46  ;;  %6142 = vmatprep.subr.bf16.mxu1 %v9409_v22 }
 0x1f7   :  { %6117 = vmatpush1.bf16.msra.mxu0 %v8013_v55  ;;  %6144 = vmatpush3.bf16.msra.mxu1 %v8041_v20 }
 0x1f8   :  { %6119 = vmatprep.subr.bf16.mxu0 %v8016_v56  ;;  %6145 = vmatprep.subr.bf16.mxu1 %v9409_v22 }
 0x1fb   :  { %6121 = vmatpush1.bf16.msra.mxu0 %v8024_v2  ;;  %6147 = vmatpush3.bf16.msra.mxu1 %v8052_v24 }
 0x1fc   :  { %6123 = vmatprep.subr.bf16.mxu0 %v8027_v4  ;;  %6148 = vmatprep.subr.bf16.mxu1 %v9409_v22 }
 0x1ff   :  { %6125 = vmatpush1.bf16.msra.mxu0 %v8035_v13  ;;  %6150 = vmatpush3.bf16.msra.mxu1 %v8060_v30 }
 0x200   :  { %6127 = vmatprep.subr.bf16.mxu0 %v8038_v15  ;;  %6151 = vmatprep.subr.bf16.mxu1 %v9409_v22 }
 0x203   :  { %6129 = vmatpush1.bf16.msra.mxu0 %v8048_v23  ;;  %6153 = vmatpush3.bf16.msra.mxu1 %v8066_v33 }
 0x204   :  { %6155 = vmatprep.subr.bf16.mxu0 %v8074_v38  ;;  %6186 = vmatprep.subr.bf16.mxu1 %v9409_v22 }
 0x206   :  { %1157 = vmatmul.mubr.f32.vlgmr.msra.gmra.mrb[2].mxu0 %v8203_v53  ;;  %5129 = vmatmul.mubr.f32.vlgmr.msra.gmra.mrb[14].mxu1 %v8203_v53 }
 0x207   :  { %6157 = vmatpush1.bf16.msra.mxu0 %v8076_v44  ;;  %6188 = vmatpush3.bf16.msra.mxu1 %v8079_v48 }
 0x208   :  { %6159 = vmatprep.subr.bf16.mxu0 %v8083_v52  ;;  %6189 = vmatprep.subr.bf16.mxu1 %v9409_v22 }
 0x209   :  { %1317 = vmatprep.mubr.f32.mxu0 %v9411_v21  ;;  %5163 = vmatprep.mubr.msk.f32.mxu1 %vm7793_vm0, %v9411_v21 }
 0x20b   :  { %6161 = vmatpush1.bf16.msra.mxu0 %v8086_v58  ;;  %6191 = vmatpush3.bf16.msra.mxu1 %v8089_v63 }
 0x20c   :  { %6163 = vmatprep.subr.bf16.mxu0 %v8091_v1  ;;  %6192 = vmatprep.subr.bf16.mxu1 %v9409_v22 }
 0x20f   :  { %6165 = vmatpush1.bf16.msra.mxu0 %v8097_v7  ;;  %6194 = vmatpush3.bf16.msra.mxu1 %v8099_v11 }
 0x210   :  { %6167 = vmatprep.subr.bf16.mxu0 %v8103_v16  ;;  %6195 = vmatprep.subr.bf16.mxu1 %v9409_v22 }
 0x213   :  { %6169 = vmatpush1.bf16.msra.mxu0 %v8106_v27  ;;  %6197 = vmatpush3.bf16.msra.mxu1 %v8109_v31 }
 0x214   :  { %6171 = vmatprep.subr.bf16.mxu0 %v8113_v37  ;;  %6198 = vmatprep.subr.bf16.mxu1 %v9409_v22 }
 0x217   :  { %6173 = vmatpush1.bf16.msra.mxu0 %v8116_v47  ;;  %6200 = vmatpush3.bf16.msra.mxu1 %v8119_v50  ;;  %v9429_v50 = vld [vmem:[#allocation69_spill] sm:$0xff] }
 0x218   :  { %6175 = vmatprep.subr.bf16.mxu0 %v8122_v59  ;;  %6201 = vmatprep.subr.bf16.mxu1 %v9409_v22 }
 0x21b   :  { %6177 = vmatpush1.bf16.msra.mxu0 %v8125_v5  ;;  %6203 = vmatpush3.bf16.msra.mxu1 %v8127_v6 }
 0x21c   :  { %6179 = vmatprep.subr.bf16.mxu0 %v9420_v49  ;;  %6204 = vmatprep.subr.bf16.mxu1 %v9409_v22 }
 0x21f   :  { %6181 = vmatpush1.bf16.msra.mxu0 %v9421_v57  ;;  %6206 = vmatpush3.bf16.msra.mxu1 %v9422_v12  ;;  %v544_v57 = vld [vmem:[%s9231_s9] sm:$0x7]  ;;  %v9427_v12 = vld [vmem:[#allocation65_spill] sm:$0xff] }
 0x220   :  { %6183 = vmatprep.subr.bf16.mxu0 %v9423_v42  ;;  %6207 = vmatprep.subr.bf16.mxu1 %v9409_v22  ;;  %v609_v42 = vld [vmem:[%s9230_s8] sm:$0x7]  ;;  %v549_v6 = vrot.slane %v544_v57, %v9427_v12  ;;  %s7794_s8 = smov [#allocation15]  }
 0x221   :  { %v618_v47 = vrot.slane %v609_v42, %v9429_v50  ;;  %s4446_s9 = sshll.u32 %s7794_s8, 4  ;;  %s4447_s9 = int_to_ptr.vmem [resolvable:$true] %s4446_s9 }
 0x222   :  { %s7724_s16 = scalar_lea.vmem %s4447_s9, 256  ;;  %p7729_p1 = scmp.lt.s32.totalorder %s4447_s9, %s4447_s9 }
 0x223   :  { %6185 = vmatpush1.bf16.msra.mxu0 %v9424_v60  ;;  %6209 = vmatpush3.bf16.msra.mxu1 %v9425_v14  ;;  %v614_v60 = vrot.slane %v609_v42, %v9427_v12  ;;  %p7725_p0 = scmp.ne.s32.totalorder %s4447_s9, %s7724_s16  ;;  %p7730_p2 = scmp.lt.s32.totalorder %s7724_s16, %s7724_s16 }
 0x224   :  { %6211 = vmatprep.subr.bf16.mxu0 %v9426_v32  ;;  %6242 = vmatprep.subr.bf16.mxu1 %v9409_v22 }
 0x225   :  { %v8368_v5 = vadd.f32 %v614_v60, %v549_v6  ;;  %v9431_v60 = vld [vmem:[#allocation59_spill] sm:$0xff]  ;;  %p7731_p3 = por %p7730_p2, %p7729_p1 }
 0x226   :  { %v8377_v1 = vrot.slane %v544_v57, %v9431_v60 }
 0x227   :  { %9428 = vst [vmem:[#allocation65_spill] sm:$0xff] %v8368_v5  ;;  %p7732_p4 = pnand %p7731_p3, %p7725_p0 }
 0x228   :  { %9432 = vst [vmem:[#allocation59_spill] sm:$0xff] %v8377_v1 }
 0x299   :  { %v927_v3 = vpop.f32.mrb[10].mxu1 }
 0x29a   :  { %v5060_v49 = vpop.f32.mrb[11].mxu1 }
 0x29b   :  { %v553_v49 = vrot.slane %v544_v57, %v9429_v50 }
 0x29d   :  { %v8373_v16 = vadd.f32 %v618_v47, %v553_v49 }
 0x29f   :  { %9430 = vst [vmem:[#allocation69_spill] sm:$0xff] %v8373_v16 }
 0x2b9   :  { %v997_v14 = vpop.f32.mrb[16].mxu0  ;;  %v1068_v32 = vpop.f32.mrb[12].mxu1 }
 0x2ba   :  { %v7331_v59 = vadd.f32 %v8368_v5, %v997_v14  ;;  %v999_v37 = vpop.f32.mrb[17].mxu0  ;;  %v5095_v31 = vpop.f32.mrb[13].mxu1  ;;  %v8380_v14 = vrot.slane %v609_v42, %v9431_v60  ;;  %v1069_v50 = vadd.f32 %v1068_v32, %v8377_v1  ;;  %v9434_v42 = vld [vmem:[#allocation70_spill] sm:$0xff] }
 0x2bb   :  { %v7333_v11 = vadd.f32 %v8373_v16, %v999_v37 }
 0x2bc   :  { %v4467_v27 = vmul.f32 -1.442695, %v7331_v59 }
 0x2bd   :  { %v4468_v7 = vmul.f32 -1.442695, %v7333_v11 }
 0x2be   :  { %7420 = vpow2.f32 %v4467_v27  ;;  %v928_v27 = vadd.f32 %v927_v3, %v8380_v14 }
 0x2bf   :  { %7422 = vpow2.f32 %v4468_v7  ;;  %v9433_v7 = vld [vmem:[#allocation68_spill] sm:$0xff] }
 0x2c8   :  { %v7421_v12 = vpop.eup %7420 }
 0x2c9   :  { %v1076_v6 = vadd.f32 1.0, %v7421_v12  ;;  %v7423_v31 = vpop.eup %7422 }
 0x2ca   :  { %v1083_v49 = vadd.f32 1.0, %v7423_v31 }
 0x2cb   :  { %7424 = vrcp.f32 %v1076_v6 }
 0x2d5   :  { %v7425_v59 = vpop.eup %7424 }
 0x2d6   :  { %v1086_v47 = vmul.f32 %v7425_v59, %v1069_v50 }
 0x2d8   :  { %v1087_v37 = vadd.f32 %v1086_v47, %v928_v27 }
 0x2d9   :  { %v1158_v11 = vpop.f32.mrb[2].mxu0  ;;  %v1229_v16 = vpop.f32.mrb[14].mxu1 }
 0x2da   :  { %7426 = vtanh.f32 %v1087_v37  ;;  %v7303_v12 = vadd.f32 %v9433_v7, %v1158_v11  ;;  %v1160_v6 = vpop.f32.mrb[3].mxu0  ;;  %v5130_v57 = vpop.f32.mrb[15].mxu1  ;;  %v9435_v37 = vld [vmem:[#allocation71_spill] sm:$0xff] }
 0x2db   :  { %7428 = vrcp.f32 %v1083_v49  ;;  %v7305_v60 = vadd.f32 %v9434_v42, %v1160_v6  ;;  %v1230_v11 = vadd.f32 %v1229_v16, %v9435_v37  ;;  %v9437_v16 = vld [vmem:[#allocation72_spill] sm:$0xff] }
 0x2dc   :  { %v4469_v5 = vmul.f32 -1.442695, %v7303_v12 }
 0x2dd   :  { %v4470_v3 = vmul.f32 -1.442695, %v7305_v60 }
 0x2de   :  { %7430 = vpow2.f32 %v4469_v5  ;;  %v9436_v5 = vld [vmem:[#allocation60_spill] sm:$0xff] }
 0x2df   :  { %7432 = vpow2.f32 %v4470_v3  ;;  %v9440_v3 = vld [vmem:[#allocation75_spill] sm:$0xff] }
 0x2e4   :  { %v7427_v32 = vpop.eup %7426 }
 0x2e5   :  { %v1089_v1 = vsub.f32 %v8282_v19, %v7427_v32  ;;  %v7429_v63 = vpop.eup %7428 }
 0x2e7   :  { %v1090_v50 = vmul.f32 %v7429_v63, %v1089_v1 }
 0x2e8   :  { %v7431_v31 = vpop.eup %7430 }
 0x2e9   :  { %v1237_v59 = vadd.f32 1.0, %v7431_v31  ;;  %v8387_v27 = vadd.f32 %v7427_v32, %v1090_v50  ;;  %v7433_v47 = vpop.eup %7432  ;;  %v9438_v32 = vld [vmem:[#allocation73_spill] sm:$0xff]  ;;  %v9441_v50 = vld [vmem:[#allocation76_spill] sm:$0xff] }
 0x2ea   :  { %v1244_v6 = vadd.f32 1.0, %v7433_v47  ;;  %v9443_v47 = vld [vmem:[#allocation78_spill] sm:$0xff] }
 0x2eb   :  { %7434 = vrcp.f32 %v1237_v59  ;;  %v9442_v59 = vld [vmem:[#allocation77_spill] sm:$0xff] }
 0x2f5   :  { %v7435_v49 = vpop.eup %7434 }
 0x2f6   :  { %v1247_v12 = vmul.f32 %v7435_v49, %v1230_v11  ;;  %v9444_v11 = vld [vmem:[#allocation79_spill] sm:$0xff]  ;;  %v9445_v49 = vld [vmem:[#allocation80_spill] sm:$0xff] }
 0x2f8   :  { %v1248_v57 = vadd.f32 %v1247_v12, %v9436_v5  ;;  %v9446_v12 = vld [vmem:[#allocation81_spill] sm:$0xff]  ;;  %v9447_v5 = vld [vmem:[#allocation82_spill] sm:$0xff] }
 0x2fa   :  { %7436 = vtanh.f32 %v1248_v57  ;;  %v9448_v57 = vld [vmem:[#allocation83_spill] sm:$0xff] }
 0x2fb   :  { %7438 = vrcp.f32 %v1244_v6  ;;  %v9449_v6 = vld [vmem:[#allocation84_spill] sm:$0xff] }
 0x304   :  { %v7437_v19 = vpop.eup %7436 }
 0x305   :  { %v1250_v60 = vsub.f32 %v8203_v53, %v7437_v19  ;;  %v7439_v63 = vpop.eup %7438  ;;  %v9439_v53 = vld [vmem:[#allocation74_spill] sm:$0xff] }
 0x307   :  { %v1251_v1 = vmul.f32 %v7439_v63, %v1250_v60  ;;  %v9451_v60 = vld [vmem:[#allocation40_spill] sm:$0xff]  ;;  %v9452_v63 = vld [vmem:[#allocation41_spill] sm:$0xff] }
 0x309   :  { %v8392_v31 = vadd.f32 %v7437_v19, %v1251_v1  ;;  %v9450_v19 = vld [vmem:[#allocation39_spill] sm:$0xff]  ;;  %v9453_v1 = vld [vmem:[#allocation42_spill] sm:$0xff] }
 0x30b   :  { %1318 = vmatmul.mubr.f32.vlgmr.msra.gmra.mrb[18].mxu0 %v8392_v31  ;;  %5164 = vmatmul.mubr.f32.vlgmr.msra.gmra.mrb[16].mxu1 %v8392_v31 }
 0x30c   :  { %6213 = vmatpush1.bf16.msra.mxu0 %v8199_v39  ;;  %6244 = vmatpush3.bf16.msra.mxu1 %v9437_v16 }
 0x30d   :  { %6215 = vmatprep.subr.bf16.mxu0 %v9438_v32  ;;  %6245 = vmatprep.subr.bf16.mxu1 %v9409_v22 }
 0x30e   :  { %1458 = vmatprep.mubr.f32.mxu0 %v9411_v21  ;;  %5198 = vmatprep.mubr.msk.f32.mxu1 %vm7793_vm0, %v9411_v21 }
 0x310   :  { %6217 = vmatpush1.bf16.msra.mxu0 %v9439_v53  ;;  %6247 = vmatpush3.bf16.msra.mxu1 %v9440_v3 }
 0x311   :  { %6219 = vmatprep.subr.bf16.mxu0 %v9441_v50  ;;  %6248 = vmatprep.subr.bf16.mxu1 %v9409_v22 }
 0x314   :  { %6221 = vmatpush1.bf16.msra.mxu0 %v9442_v59  ;;  %6250 = vmatpush3.bf16.msra.mxu1 %v9443_v47 }
 0x315   :  { %6223 = vmatprep.subr.bf16.mxu0 %v9444_v11  ;;  %6251 = vmatprep.subr.bf16.mxu1 %v9409_v22 }
 0x318   :  { %6225 = vmatpush1.bf16.msra.mxu0 %v9445_v49  ;;  %6253 = vmatpush3.bf16.msra.mxu1 %v9446_v12 }
 0x319   :  { %6227 = vmatprep.subr.bf16.mxu0 %v9447_v5  ;;  %6254 = vmatprep.subr.bf16.mxu1 %v9409_v22 }
 0x31c   :  { %6229 = vmatpush1.bf16.msra.mxu0 %v8244_v40  ;;  %6256 = vmatpush3.bf16.msra.mxu1 %v8246_v62 }
 0x31d   :  { %6231 = vmatprep.subr.bf16.mxu0 %v9448_v57  ;;  %6257 = vmatprep.subr.bf16.mxu1 %v9409_v22 }
 0x320   :  { %6233 = vmatpush1.bf16.msra.mxu0 %v9449_v6  ;;  %6259 = vmatpush3.bf16.msra.mxu1 %v8256_v43 }
 0x321   :  { %6235 = vmatprep.subr.bf16.mxu0 %v8260_v54  ;;  %6260 = vmatprep.subr.bf16.mxu1 %v9409_v22 }
 0x324   :  { %6237 = vmatpush1.bf16.msra.mxu0 %v8264_v29  ;;  %6262 = vmatpush3.bf16.msra.mxu1 %v8266_v28 }
 0x325   :  { %6239 = vmatprep.subr.bf16.mxu0 %v8270_v36  ;;  %6263 = vmatprep.subr.bf16.mxu1 %v9409_v22 }
 0x328   :  { %6241 = vmatpush1.bf16.msra.mxu0 %v8274_v8  ;;  %6265 = vmatpush3.bf16.msra.mxu1 %v8276_v0 }
 0x329   :  { %6267 = vmatprep.subr.bf16.mxu0 %v7975_v9  ;;  %6298 = vmatprep.subr.bf16.mxu1 %v9409_v22 }
 0x32b   :  { %1459 = vmatmul.mubr.f32.vlgmr.msra.gmra.mrb[18].mxu0 %v8387_v27  ;;  %5199 = vmatmul.mubr.f32.vlgmr.msra.gmra.mrb[18].mxu1 %v8387_v27 }
 0x32c   :  { %6269 = vmatpush1.bf16.msra.mxu0 %v7977_v17  ;;  %6300 = vmatpush3.bf16.msra.mxu1 %v7998_v41 }
 0x32d   :  { %6271 = vmatprep.subr.bf16.mxu0 %v7980_v18  ;;  %6301 = vmatprep.subr.bf16.mxu1 %v9409_v22 }
 0x32e   :  { %1619 = vmatprep.mubr.f32.mxu0 %v9411_v21  ;;  %5233 = vmatprep.mubr.msk.f32.mxu1 %vm7793_vm0, %v9411_v21 }
 0x330   :  { %6273 = vmatpush1.bf16.msra.mxu0 %v7985_v25  ;;  %6303 = vmatpush3.bf16.msra.mxu1 %v8008_v51 }
 0x331   :  { %6275 = vmatprep.subr.bf16.mxu0 %v7988_v26  ;;  %6304 = vmatprep.subr.bf16.mxu1 %v9409_v22 }
 0x334   :  { %6277 = vmatpush1.bf16.msra.mxu0 %v7992_v34  ;;  %6306 = vmatpush3.bf16.msra.mxu1 %v8019_v61 }
 0x335   :  { %6279 = vmatprep.subr.bf16.mxu0 %v7995_v35  ;;  %6307 = vmatprep.subr.bf16.mxu1 %v9409_v22 }
 0x338   :  { %6281 = vmatpush1.bf16.msra.mxu0 %v8002_v45  ;;  %6309 = vmatpush3.bf16.msra.mxu1 %v8030_v10 }
 0x339   :  { %6283 = vmatprep.subr.bf16.mxu0 %v8005_v46  ;;  %6310 = vmatprep.subr.bf16.mxu1 %v9409_v22 }
 0x33c   :  { %6285 = vmatpush1.bf16.msra.mxu0 %v8013_v55  ;;  %6312 = vmatpush3.bf16.msra.mxu1 %v8041_v20 }
 0x33d   :  { %6287 = vmatprep.subr.bf16.mxu0 %v8016_v56  ;;  %6313 = vmatprep.subr.bf16.mxu1 %v9409_v22 }
 0x340   :  { %6289 = vmatpush1.bf16.msra.mxu0 %v8024_v2  ;;  %6315 = vmatpush3.bf16.msra.mxu1 %v8052_v24 }
 0x341   :  { %6291 = vmatprep.subr.bf16.mxu0 %v8027_v4  ;;  %6316 = vmatprep.subr.bf16.mxu1 %v9409_v22 }
 0x344   :  { %6293 = vmatpush1.bf16.msra.mxu0 %v8035_v13  ;;  %6318 = vmatpush3.bf16.msra.mxu1 %v8060_v30 }
 0x345   :  { %6295 = vmatprep.subr.bf16.mxu0 %v8038_v15  ;;  %6319 = vmatprep.subr.bf16.mxu1 %v9409_v22 }
 0x348   :  { %6297 = vmatpush1.bf16.msra.mxu0 %v8048_v23  ;;  %6321 = vmatpush3.bf16.msra.mxu1 %v8066_v33  ;;  %v9470_v23 = vld [vmem:[#allocation65_spill] sm:$0xff] }
 0x349   :  { %6323 = vmatprep.subr.bf16.mxu0 %v8074_v38  ;;  %6354 = vmatprep.subr.bf16.mxu1 %v9409_v22  ;;  %v9457_v38 = vld [vmem:[#allocation46_spill] sm:$0xff] }
 0x34b   :  { %1620 = vmatmul.mubr.f32.vlgmr.msra.gmra.mrb[4].mxu0 %v8392_v31  ;;  %5234 = vmatmul.mubr.f32.vlgmr.msra.gmra.mrb[20].mxu1 %v8392_v31 }
 0x34c   :  { %6325 = vmatpush1.bf16.msra.mxu0 %v8076_v44  ;;  %6356 = vmatpush3.bf16.msra.mxu1 %v8079_v48  ;;  %v9455_v48 = vld [vmem:[#allocation44_spill] sm:$0xff]  ;;  %v9456_v44 = vld [vmem:[#allocation45_spill] sm:$0xff] }
 0x34d   :  { %6327 = vmatprep.subr.bf16.mxu0 %v8083_v52  ;;  %6357 = vmatprep.subr.bf16.mxu1 %v9409_v22  ;;  %v9454_v52 = vld [vmem:[#allocation43_spill] sm:$0xff] }
 0x34e   :  { %1780 = vmatprep.mubr.f32.mxu0 %v9411_v21  ;;  %5268 = vmatprep.mubr.msk.f32.mxu1 %vm7793_vm0, %v9411_v21 }
 0x350   :  { %6329 = vmatpush1.bf16.msra.mxu0 %v8086_v58  ;;  %6359 = vmatpush3.bf16.msra.mxu1 %v9450_v19  ;;  %v9458_v19 = vld [vmem:[#allocation47_spill] sm:$0xff]  ;;  %v9460_v58 = vld [vmem:[#allocation49_spill] sm:$0xff] }
 0x351   :  { %6331 = vmatprep.subr.bf16.mxu0 %v9451_v60  ;;  %6360 = vmatprep.subr.bf16.mxu1 %v9409_v22  ;;  %v9459_v60 = vld [vmem:[#allocation48_spill] sm:$0xff] }
 0x354   :  { %6333 = vmatpush1.bf16.msra.mxu0 %v9452_v63  ;;  %6362 = vmatpush3.bf16.msra.mxu1 %v9453_v1  ;;  %v9461_v1 = vld [vmem:[#allocation50_spill] sm:$0xff]  ;;  %v9463_v63 = vld [vmem:[#allocation52_spill] sm:$0xff] }
 0x355   :  { %6335 = vmatprep.subr.bf16.mxu0 %v9454_v52  ;;  %6363 = vmatprep.subr.bf16.mxu1 %v9409_v22  ;;  %v9462_v52 = vld [vmem:[#allocation51_spill] sm:$0xff] }
 0x358   :  { %6337 = vmatpush1.bf16.msra.mxu0 %v9455_v48  ;;  %6365 = vmatpush3.bf16.msra.mxu1 %v9456_v44  ;;  %v9464_v44 = vld [vmem:[#allocation53_spill] sm:$0xff]  ;;  %v9466_v48 = vld [vmem:[#allocation55_spill] sm:$0xff] }
 0x359   :  { %6339 = vmatprep.subr.bf16.mxu0 %v9457_v38  ;;  %6366 = vmatprep.subr.bf16.mxu1 %v9409_v22  ;;  %v9465_v38 = vld [vmem:[#allocation54_spill] sm:$0xff] }
 0x35c   :  { %6341 = vmatpush1.bf16.msra.mxu0 %v9458_v19  ;;  %6368 = vmatpush3.bf16.msra.mxu1 %v9459_v60  ;;  %v9467_v60 = vld [vmem:[#allocation56_spill] sm:$0xff]  ;;  %v9469_v19 = vld [vmem:[#allocation58_spill] sm:$0xff] }
 0x35d   :  { %6343 = vmatprep.subr.bf16.mxu0 %v9460_v58  ;;  %6369 = vmatprep.subr.bf16.mxu1 %v9409_v22  ;;  %v9468_v58 = vld [vmem:[#allocation57_spill] sm:$0xff] }
 0x360   :  { %6345 = vmatpush1.bf16.msra.mxu0 %v9461_v1  ;;  %6371 = vmatpush3.bf16.msra.mxu1 %v9462_v52 }
 0x361   :  { %6347 = vmatprep.subr.bf16.mxu0 %v9463_v63  ;;  %6372 = vmatprep.subr.bf16.mxu1 %v9409_v22 }
 0x364   :  { %6349 = vmatpush1.bf16.msra.mxu0 %v9464_v44  ;;  %6374 = vmatpush3.bf16.msra.mxu1 %v9465_v38 }
 0x365   :  { %6351 = vmatprep.subr.bf16.mxu0 %v9466_v48  ;;  %6375 = vmatprep.subr.bf16.mxu1 %v9409_v22  ;;  %v9471_v48 = vld [vmem:[#allocation69_spill] sm:$0xff] }
 0x368   :  { %6353 = vmatpush1.bf16.msra.mxu0 %v9467_v60  ;;  %6377 = vmatpush3.bf16.msra.mxu1 %v9468_v58  ;;  %v9472_v58 = vld [vmem:[#allocation59_spill] sm:$0xff] }
 0x369   :  { %6379 = vmatprep.subr.bf16.mxu0 %v9469_v19  ;;  %6410 = vmatprep.subr.bf16.mxu1 %v9409_v22 }
 0x3de   :  { %v1390_v52 = vpop.f32.mrb[16].mxu1 }
 0x3df   :  { %v5165_v63 = vpop.f32.mrb[17].mxu1 }
 0x3e0   :  { %v1391_v63 = vadd.f32 %v1390_v52, %v8380_v14 }
 0x3fe   :  { %v1460_v1 = vpop.f32.mrb[18].mxu0  ;;  %v1531_v33 = vpop.f32.mrb[18].mxu1 }
 0x3ff   :  { %v7335_v44 = vadd.f32 %v9470_v23, %v1460_v1  ;;  %v1462_v15 = vpop.f32.mrb[19].mxu0  ;;  %v5200_v38 = vpop.f32.mrb[19].mxu1  ;;  %v1532_v2 = vadd.f32 %v1531_v33, %v9472_v58 }
 0x400   :  { %v7337_v13 = vadd.f32 %v9471_v48, %v1462_v15 }
 0x401   :  { %v4471_v30 = vmul.f32 -1.442695, %v7335_v44 }
 0x402   :  { %v4472_v4 = vmul.f32 -1.442695, %v7337_v13 }
 0x403   :  { %7440 = vpow2.f32 %v4471_v30 }
 0x404   :  { %7442 = vpow2.f32 %v4472_v4 }
 0x40d   :  { %v7441_v60 = vpop.eup %7440 }
 0x40e   :  { %v1539_v24 = vadd.f32 1.0, %v7441_v60  ;;  %v7443_v19 = vpop.eup %7442 }
 0x40f   :  { %v1546_v1 = vadd.f32 1.0, %v7443_v19 }
 0x410   :  { %7444 = vrcp.f32 %v1539_v24 }
 0x41a   :  { %v7445_v56 = vpop.eup %7444 }
 0x41b   :  { %v1549_v20 = vmul.f32 %v7445_v56, %v1532_v2 }
 0x41d   :  { %v1550_v55 = vadd.f32 %v1549_v20, %v1391_v63 }
 0x41e   :  { %v1621_v23 = vpop.f32.mrb[4].mxu0  ;;  %v1692_v38 = vpop.f32.mrb[20].mxu1 }
 0x41f   :  { %7446 = vtanh.f32 %v1550_v55  ;;  %v7307_v30 = vadd.f32 %v9433_v7, %v1621_v23  ;;  %v1623_v15 = vpop.f32.mrb[5].mxu0  ;;  %v5235_v13 = vpop.f32.mrb[21].mxu1  ;;  %v1693_v23 = vadd.f32 %v1692_v38, %v9435_v37  ;;  %v9475_v38 = vld [vmem:[#allocation29_spill] sm:$0xff] }
 0x420   :  { %7448 = vrcp.f32 %v1546_v1  ;;  %v7309_v4 = vadd.f32 %v9434_v42, %v1623_v15 }
 0x421   :  { %v4473_v44 = vmul.f32 -1.442695, %v7307_v30  ;;  %v9473_v30 = vld [vmem:[#allocation62_spill] sm:$0xff] }
 0x422   :  { %v4474_v52 = vmul.f32 -1.442695, %v7309_v4 }
 0x423   :  { %7450 = vpow2.f32 %v4473_v44 }
 0x424   :  { %7452 = vpow2.f32 %v4474_v52  ;;  %v9477_v52 = vld [vmem:[#allocation25_spill] sm:$0xff] }
 0x429   :  { %v7447_v24 = vpop.eup %7446 }
 0x42a   :  { %v1552_v33 = vsub.f32 %v8387_v27, %v7447_v24  ;;  %v7449_v60 = vpop.eup %7448 }
 0x42c   :  { %v1553_v56 = vmul.f32 %v7449_v60, %v1552_v33 }
 0x42d   :  { %v7451_v2 = vpop.eup %7450 }
 0x42e   :  { %v1700_v20 = vadd.f32 1.0, %v7451_v2  ;;  %v8512_v19 = vadd.f32 %v7447_v24, %v1553_v56  ;;  %v7453_v55 = vpop.eup %7452  ;;  %v9476_v24 = vld [vmem:[#allocation24_spill] sm:$0xff]  ;;  %v9478_v56 = vld [vmem:[#allocation31_spill] sm:$0xff]  ;;  %v9479_v2 = vld [vmem:[#allocation26_spill] sm:$0xff] }
 0x42f   :  { %v1707_v15 = vadd.f32 1.0, %v7453_v55  ;;  %v9481_v55 = vld [vmem:[#allocation32_spill] sm:$0xff] }
 0x430   :  { %7454 = vrcp.f32 %v1700_v20  ;;  %v9480_v20 = vld [vmem:[#allocation27_spill] sm:$0xff] }
 0x43a   :  { %v7455_v63 = vpop.eup %7454 }
 0x43b   :  { %v1710_v1 = vmul.f32 %v7455_v63, %v1693_v23  ;;  %v9482_v23 = vld [vmem:[#allocation28_spill] sm:$0xff]  ;;  %v9483_v63 = vld [vmem:[#allocation30_spill] sm:$0xff] }
 0x43d   :  { %v1711_v13 = vadd.f32 %v1710_v1, %v9473_v30  ;;  %v9484_v1 = vld [vmem:[#allocation33_spill] sm:$0xff]  ;;  %v9485_v30 = vld [vmem:[#allocation34_spill] sm:$0xff] }
 0x43f   :  { %7456 = vtanh.f32 %v1711_v13  ;;  %v9486_v13 = vld [vmem:[#allocation35_spill] sm:$0xff] }
 0x440   :  { %7458 = vrcp.f32 %v1707_v15  ;;  %v9487_v15 = vld [vmem:[#allocation36_spill] sm:$0xff] }
 0x449   :  { %v7457_v27 = vpop.eup %7456 }
 0x44a   :  { %v1713_v44 = vsub.f32 %v8392_v31, %v7457_v27  ;;  %v7459_v4 = vpop.eup %7458  ;;  %v9474_v31 = vld [vmem:[#allocation23_spill] sm:$0xff] }
 0x44c   :  { %v1714_v33 = vmul.f32 %v7459_v4, %v1713_v44  ;;  %v9489_v44 = vld [vmem:[#allocation38_spill] sm:$0xff]  ;;  %v9490_v4 = vld [vmem:[#allocation39_spill] sm:$0xff] }
 0x44e   :  { %v8517_v60 = vadd.f32 %v7457_v27, %v1714_v33  ;;  %v9488_v27 = vld [vmem:[#allocation37_spill] sm:$0xff]  ;;  %v9491_v33 = vld [vmem:[#allocation40_spill] sm:$0xff] }
 0x450   :  { %1781 = vmatmul.mubr.f32.vlgmr.msra.gmra.mrb[20].mxu0 %v8517_v60  ;;  %5269 = vmatmul.mubr.f32.vlgmr.msra.gmra.mrb[22].mxu1 %v8517_v60 }
 0x451   :  { %6381 = vmatpush1.bf16.msra.mxu0 %v8199_v39  ;;  %6412 = vmatpush3.bf16.msra.mxu1 %v9437_v16 }
 0x452   :  { %6383 = vmatprep.subr.bf16.mxu0 %v9438_v32  ;;  %6413 = vmatprep.subr.bf16.mxu1 %v9409_v22 }
 0x453   :  { %1921 = vmatprep.mubr.f32.mxu0 %v9411_v21  ;;  %5303 = vmatprep.mubr.msk.f32.mxu1 %vm7793_vm0, %v9411_v21 }
 0x455   :  { %6385 = vmatpush1.bf16.msra.mxu0 %v9439_v53  ;;  %6415 = vmatpush3.bf16.msra.mxu1 %v9440_v3 }
 0x456   :  { %6387 = vmatprep.subr.bf16.mxu0 %v9441_v50  ;;  %6416 = vmatprep.subr.bf16.mxu1 %v9409_v22 }
 0x459   :  { %6389 = vmatpush1.bf16.msra.mxu0 %v9442_v59  ;;  %6418 = vmatpush3.bf16.msra.mxu1 %v9443_v47 }
 0x45a   :  { %6391 = vmatprep.subr.bf16.mxu0 %v9444_v11  ;;  %6419 = vmatprep.subr.bf16.mxu1 %v9409_v22 }
 0x45d   :  { %6393 = vmatpush1.bf16.msra.mxu0 %v9445_v49  ;;  %6421 = vmatpush3.bf16.msra.mxu1 %v9446_v12 }
 0x45e   :  { %6395 = vmatprep.subr.bf16.mxu0 %v9447_v5  ;;  %6422 = vmatprep.subr.bf16.mxu1 %v9409_v22 }
 0x461   :  { %6397 = vmatpush1.bf16.msra.mxu0 %v8244_v40  ;;  %6424 = vmatpush3.bf16.msra.mxu1 %v8246_v62 }
 0x462   :  { %6399 = vmatprep.subr.bf16.mxu0 %v9448_v57  ;;  %6425 = vmatprep.subr.bf16.mxu1 %v9409_v22 }
 0x465   :  { %6401 = vmatpush1.bf16.msra.mxu0 %v9449_v6  ;;  %6427 = vmatpush3.bf16.msra.mxu1 %v8256_v43 }
 0x466   :  { %6403 = vmatprep.subr.bf16.mxu0 %v8260_v54  ;;  %6428 = vmatprep.subr.bf16.mxu1 %v9409_v22 }
 0x469   :  { %6405 = vmatpush1.bf16.msra.mxu0 %v8264_v29  ;;  %6430 = vmatpush3.bf16.msra.mxu1 %v8266_v28 }
 0x46a   :  { %6407 = vmatprep.subr.bf16.mxu0 %v8270_v36  ;;  %6431 = vmatprep.subr.bf16.mxu1 %v9409_v22 }
 0x46d   :  { %6409 = vmatpush1.bf16.msra.mxu0 %v8274_v8  ;;  %6433 = vmatpush3.bf16.msra.mxu1 %v8276_v0 }
 0x46e   :  { %6435 = vmatprep.subr.bf16.mxu0 %v7975_v9  ;;  %6466 = vmatprep.subr.bf16.mxu1 %v9409_v22 }
 0x470   :  { %1922 = vmatmul.mubr.f32.vlgmr.msra.gmra.mrb[20].mxu0 %v8512_v19  ;;  %5304 = vmatmul.mubr.f32.vlgmr.msra.gmra.mrb[24].mxu1 %v8512_v19 }
 0x471   :  { %6437 = vmatpush1.bf16.msra.mxu0 %v7977_v17  ;;  %6468 = vmatpush3.bf16.msra.mxu1 %v7998_v41 }
 0x472   :  { %6439 = vmatprep.subr.bf16.mxu0 %v7980_v18  ;;  %6469 = vmatprep.subr.bf16.mxu1 %v9409_v22 }
 0x473   :  { %2082 = vmatprep.mubr.f32.mxu0 %v9411_v21  ;;  %5338 = vmatprep.mubr.msk.f32.mxu1 %vm7793_vm0, %v9411_v21 }
 0x475   :  { %6441 = vmatpush1.bf16.msra.mxu0 %v7985_v25  ;;  %6471 = vmatpush3.bf16.msra.mxu1 %v8008_v51 }
 0x476   :  { %6443 = vmatprep.subr.bf16.mxu0 %v7988_v26  ;;  %6472 = vmatprep.subr.bf16.mxu1 %v9409_v22 }
 0x479   :  { %6445 = vmatpush1.bf16.msra.mxu0 %v7992_v34  ;;  %6474 = vmatpush3.bf16.msra.mxu1 %v8019_v61 }
 0x47a   :  { %6447 = vmatprep.subr.bf16.mxu0 %v7995_v35  ;;  %6475 = vmatprep.subr.bf16.mxu1 %v9409_v22 }
 0x47d   :  { %6449 = vmatpush1.bf16.msra.mxu0 %v8002_v45  ;;  %6477 = vmatpush3.bf16.msra.mxu1 %v8030_v10 }
 0x47e   :  { %6451 = vmatprep.subr.bf16.mxu0 %v8005_v46  ;;  %6478 = vmatprep.subr.bf16.mxu1 %v9409_v22 }
 0x481   :  { %6453 = vmatpush1.bf16.msra.mxu0 %v9474_v31  ;;  %6480 = vmatpush3.bf16.msra.mxu1 %v9475_v38 }
 0x482   :  { %6455 = vmatprep.subr.bf16.mxu0 %v9476_v24  ;;  %6481 = vmatprep.subr.bf16.mxu1 %v9409_v22 }
 0x485   :  { %6457 = vmatpush1.bf16.msra.mxu0 %v9477_v52  ;;  %6483 = vmatpush3.bf16.msra.mxu1 %v9478_v56 }
 0x486   :  { %6459 = vmatprep.subr.bf16.mxu0 %v9479_v2  ;;  %6484 = vmatprep.subr.bf16.mxu1 %v9409_v22 }
 0x489   :  { %6461 = vmatpush1.bf16.msra.mxu0 %v9480_v20  ;;  %6486 = vmatpush3.bf16.msra.mxu1 %v9481_v55  ;;  %v9510_v55 = vld [vmem:[#allocation65_spill] sm:$0xff] }
 0x48a   :  { %6463 = vmatprep.subr.bf16.mxu0 %v9482_v23  ;;  %6487 = vmatprep.subr.bf16.mxu1 %v9409_v22 }
 0x48d   :  { %6465 = vmatpush1.bf16.msra.mxu0 %v9483_v63  ;;  %6489 = vmatpush3.bf16.msra.mxu1 %v9484_v1  ;;  %v9496_v1 = vld [vmem:[#allocation45_spill] sm:$0xff]  ;;  %v9497_v63 = vld [vmem:[#allocation46_spill] sm:$0xff] }
 0x48e   :  { %6491 = vmatprep.subr.bf16.mxu0 %v9485_v30  ;;  %6522 = vmatprep.subr.bf16.mxu1 %v9409_v22  ;;  %v9495_v30 = vld [vmem:[#allocation44_spill] sm:$0xff] }
 0x490   :  { %2083 = vmatmul.mubr.f32.vlgmr.msra.gmra.mrb[6].mxu0 %v8517_v60  ;;  %5339 = vmatmul.mubr.f32.vlgmr.msra.gmra.mrb[26].mxu1 %v8517_v60 }
 0x491   :  { %6493 = vmatpush1.bf16.msra.mxu0 %v9486_v13  ;;  %6524 = vmatpush3.bf16.msra.mxu1 %v9487_v15  ;;  %v9492_v13 = vld [vmem:[#allocation41_spill] sm:$0xff]  ;;  %v9493_v15 = vld [vmem:[#allocation42_spill] sm:$0xff] }
 0x492   :  { %6495 = vmatprep.subr.bf16.mxu0 %v9488_v27  ;;  %6525 = vmatprep.subr.bf16.mxu1 %v9409_v22  ;;  %v9494_v27 = vld [vmem:[#allocation43_spill] sm:$0xff] }
 0x493   :  { %2243 = vmatprep.mubr.f32.mxu0 %v9411_v21  ;;  %5373 = vmatprep.mubr.msk.f32.mxu1 %vm7793_vm0, %v9411_v21 }
 0x495   :  { %6497 = vmatpush1.bf16.msra.mxu0 %v9489_v44  ;;  %6527 = vmatpush3.bf16.msra.mxu1 %v9490_v4  ;;  %v9498_v4 = vld [vmem:[#allocation47_spill] sm:$0xff]  ;;  %v9500_v44 = vld [vmem:[#allocation49_spill] sm:$0xff] }
 0x496   :  { %6499 = vmatprep.subr.bf16.mxu0 %v9491_v33  ;;  %6528 = vmatprep.subr.bf16.mxu1 %v9409_v22  ;;  %v9499_v33 = vld [vmem:[#allocation48_spill] sm:$0xff] }
 0x499   :  { %6501 = vmatpush1.bf16.msra.mxu0 %v9492_v13  ;;  %6530 = vmatpush3.bf16.msra.mxu1 %v9493_v15  ;;  %v9501_v15 = vld [vmem:[#allocation50_spill] sm:$0xff]  ;;  %v9503_v13 = vld [vmem:[#allocation52_spill] sm:$0xff] }
 0x49a   :  { %6503 = vmatprep.subr.bf16.mxu0 %v9494_v27  ;;  %6531 = vmatprep.subr.bf16.mxu1 %v9409_v22  ;;  %v9502_v27 = vld [vmem:[#allocation51_spill] sm:$0xff] }
 0x49d   :  { %6505 = vmatpush1.bf16.msra.mxu0 %v9495_v30  ;;  %6533 = vmatpush3.bf16.msra.mxu1 %v9496_v1  ;;  %v9504_v1 = vld [vmem:[#allocation53_spill] sm:$0xff]  ;;  %v9506_v30 = vld [vmem:[#allocation55_spill] sm:$0xff] }
 0x49e   :  { %6507 = vmatprep.subr.bf16.mxu0 %v9497_v63  ;;  %6534 = vmatprep.subr.bf16.mxu1 %v9409_v22  ;;  %v9505_v63 = vld [vmem:[#allocation54_spill] sm:$0xff] }
 0x4a1   :  { %6509 = vmatpush1.bf16.msra.mxu0 %v9498_v4  ;;  %6536 = vmatpush3.bf16.msra.mxu1 %v9499_v33  ;;  %v9507_v33 = vld [vmem:[#allocation56_spill] sm:$0xff]  ;;  %v9509_v4 = vld [vmem:[#allocation58_spill] sm:$0xff] }
 0x4a2   :  { %6511 = vmatprep.subr.bf16.mxu0 %v9500_v44  ;;  %6537 = vmatprep.subr.bf16.mxu1 %v9409_v22  ;;  %v9508_v44 = vld [vmem:[#allocation57_spill] sm:$0xff] }
 0x4a5   :  { %6513 = vmatpush1.bf16.msra.mxu0 %v9501_v15  ;;  %6539 = vmatpush3.bf16.msra.mxu1 %v9502_v27 }
 0x4a6   :  { %6515 = vmatprep.subr.bf16.mxu0 %v9503_v13  ;;  %6540 = vmatprep.subr.bf16.mxu1 %v9409_v22 }
 0x4a9   :  { %6517 = vmatpush1.bf16.msra.mxu0 %v9504_v1  ;;  %6542 = vmatpush3.bf16.msra.mxu1 %v9505_v63 }
 0x4aa   :  { %6519 = vmatprep.subr.bf16.mxu0 %v9506_v30  ;;  %6543 = vmatprep.subr.bf16.mxu1 %v9409_v22 }
 0x4ad   :  { %6521 = vmatpush1.bf16.msra.mxu0 %v9507_v33  ;;  %6545 = vmatpush3.bf16.msra.mxu1 %v9508_v44 }
 0x4ae   :  { %6547 = vmatprep.subr.bf16.mxu0 %v9509_v4  ;;  %6578 = vmatprep.subr.bf16.mxu1 %v9409_v22 }
 0x523   :  { %v1853_v27 = vpop.f32.mrb[22].mxu1 }
 0x524   :  { %v5270_v13 = vpop.f32.mrb[23].mxu1 }
 0x525   :  { %v1854_v13 = vadd.f32 %v1853_v27, %v8380_v14 }
 0x543   :  { %v1923_v15 = vpop.f32.mrb[20].mxu0  ;;  %v1994_v23 = vpop.f32.mrb[24].mxu1 }
 0x544   :  { %v7339_v1 = vadd.f32 %v9510_v55, %v1923_v15  ;;  %v1925_v20 = vpop.f32.mrb[21].mxu0  ;;  %v5305_v63 = vpop.f32.mrb[25].mxu1  ;;  %v1995_v44 = vadd.f32 %v1994_v23, %v9472_v58 }
 0x545   :  { %v7341_v30 = vadd.f32 %v9471_v48, %v1925_v20 }
 0x546   :  { %v4475_v2 = vmul.f32 -1.442695, %v7339_v1 }
 0x547   :  { %v4476_v56 = vmul.f32 -1.442695, %v7341_v30 }
 0x548   :  { %7460 = vpow2.f32 %v4475_v2 }
 0x549   :  { %7462 = vpow2.f32 %v4476_v56 }
 0x552   :  { %v7461_v33 = vpop.eup %7460 }
 0x553   :  { %v2002_v52 = vadd.f32 1.0, %v7461_v33  ;;  %v7463_v4 = vpop.eup %7462 }
 0x554   :  { %v2009_v15 = vadd.f32 1.0, %v7463_v4 }
 0x555   :  { %7464 = vrcp.f32 %v2002_v52 }
 0x55f   :  { %v7465_v24 = vpop.eup %7464 }
 0x560   :  { %v2012_v38 = vmul.f32 %v7465_v24, %v1995_v44 }
 0x562   :  { %v2013_v31 = vadd.f32 %v2012_v38, %v1854_v13 }
 0x563   :  { %v2084_v55 = vpop.f32.mrb[6].mxu0  ;;  %v2155_v63 = vpop.f32.mrb[26].mxu1 }
 0x564   :  { %7466 = vtanh.f32 %v2013_v31  ;;  %v7311_v2 = vadd.f32 %v9433_v7, %v2084_v55  ;;  %v2086_v20 = vpop.f32.mrb[7].mxu0  ;;  %v5340_v1 = vpop.f32.mrb[27].mxu1  ;;  %v2156_v55 = vadd.f32 %v2155_v63, %v9435_v37  ;;  %v9513_v63 = vld [vmem:[#allocation29_spill] sm:$0xff] }
 0x565   :  { %7468 = vrcp.f32 %v2009_v15  ;;  %v7313_v52 = vadd.f32 %v9434_v42, %v2086_v20 }
 0x566   :  { %v4477_v30 = vmul.f32 -1.442695, %v7311_v2  ;;  %v9511_v2 = vld [vmem:[#allocation61_spill] sm:$0xff] }
 0x567   :  { %v4478_v27 = vmul.f32 -1.442695, %v7313_v52 }
 0x568   :  { %7470 = vpow2.f32 %v4477_v30 }
 0x569   :  { %7472 = vpow2.f32 %v4478_v27  ;;  %v9515_v27 = vld [vmem:[#allocation25_spill] sm:$0xff] }
 0x56e   :  { %v7467_v56 = vpop.eup %7466 }
 0x56f   :  { %v2015_v23 = vsub.f32 %v8512_v19, %v7467_v56  ;;  %v7469_v33 = vpop.eup %7468 }
 0x571   :  { %v2016_v24 = vmul.f32 %v7469_v33, %v2015_v23 }
 0x572   :  { %v7471_v38 = vpop.eup %7470 }
 0x573   :  { %v2163_v44 = vadd.f32 1.0, %v7471_v38  ;;  %v8637_v4 = vadd.f32 %v7467_v56, %v2016_v24  ;;  %v7473_v31 = vpop.eup %7472  ;;  %v9514_v56 = vld [vmem:[#allocation24_spill] sm:$0xff]  ;;  %v9516_v24 = vld [vmem:[#allocation31_spill] sm:$0xff]  ;;  %v9517_v38 = vld [vmem:[#allocation26_spill] sm:$0xff] }
 0x574   :  { %v2170_v20 = vadd.f32 1.0, %v7473_v31  ;;  %v9519_v31 = vld [vmem:[#allocation32_spill] sm:$0xff] }
 0x575   :  { %7474 = vrcp.f32 %v2163_v44  ;;  %v9518_v44 = vld [vmem:[#allocation27_spill] sm:$0xff] }
 0x57f   :  { %v7475_v13 = vpop.eup %7474 }
 0x580   :  { %v2173_v15 = vmul.f32 %v7475_v13, %v2156_v55  ;;  %v9520_v55 = vld [vmem:[#allocation28_spill] sm:$0xff]  ;;  %v9521_v13 = vld [vmem:[#allocation30_spill] sm:$0xff] }
 0x582   :  { %v2174_v1 = vadd.f32 %v2173_v15, %v9511_v2  ;;  %v9522_v15 = vld [vmem:[#allocation33_spill] sm:$0xff]  ;;  %v9523_v2 = vld [vmem:[#allocation34_spill] sm:$0xff] }
 0x584   :  { %7476 = vtanh.f32 %v2174_v1  ;;  %v9524_v1 = vld [vmem:[#allocation35_spill] sm:$0xff] }
 0x585   :  { %7478 = vrcp.f32 %v2170_v20  ;;  %v9525_v20 = vld [vmem:[#allocation36_spill] sm:$0xff] }
 0x58e   :  { %v7477_v19 = vpop.eup %7476 }
 0x58f   :  { %v2176_v30 = vsub.f32 %v8517_v60, %v7477_v19  ;;  %v7479_v52 = vpop.eup %7478  ;;  %v9512_v60 = vld [vmem:[#allocation23_spill] sm:$0xff] }
 0x591   :  { %v2177_v23 = vmul.f32 %v7479_v52, %v2176_v30  ;;  %v9527_v30 = vld [vmem:[#allocation38_spill] sm:$0xff]  ;;  %v9528_v52 = vld [vmem:[#allocation39_spill] sm:$0xff] }
 0x593   :  { %v8642_v33 = vadd.f32 %v7477_v19, %v2177_v23  ;;  %v9526_v19 = vld [vmem:[#allocation37_spill] sm:$0xff]  ;;  %v9529_v23 = vld [vmem:[#allocation40_spill] sm:$0xff] }
 0x595   :  { %2244 = vmatmul.mubr.f32.vlgmr.msra.gmra.mrb[22].mxu0 %v8642_v33  ;;  %5374 = vmatmul.mubr.f32.vlgmr.msra.gmra.mrb[28].mxu1 %v8642_v33 }
 0x596   :  { %6549 = vmatpush1.bf16.msra.mxu0 %v8199_v39  ;;  %6580 = vmatpush3.bf16.msra.mxu1 %v9437_v16 }
 0x597   :  { %6551 = vmatprep.subr.bf16.mxu0 %v9438_v32  ;;  %6581 = vmatprep.subr.bf16.mxu1 %v9409_v22 }
 0x598   :  { %2384 = vmatprep.mubr.f32.mxu0 %v9411_v21  ;;  %5408 = vmatprep.mubr.msk.f32.mxu1 %vm7793_vm0, %v9411_v21 }
 0x59a   :  { %6553 = vmatpush1.bf16.msra.mxu0 %v9439_v53  ;;  %6583 = vmatpush3.bf16.msra.mxu1 %v9440_v3 }
 0x59b   :  { %6555 = vmatprep.subr.bf16.mxu0 %v9441_v50  ;;  %6584 = vmatprep.subr.bf16.mxu1 %v9409_v22 }
 0x59e   :  { %6557 = vmatpush1.bf16.msra.mxu0 %v9442_v59  ;;  %6586 = vmatpush3.bf16.msra.mxu1 %v9443_v47 }
 0x59f   :  { %6559 = vmatprep.subr.bf16.mxu0 %v9444_v11  ;;  %6587 = vmatprep.subr.bf16.mxu1 %v9409_v22 }
 0x5a2   :  { %6561 = vmatpush1.bf16.msra.mxu0 %v9445_v49  ;;  %6589 = vmatpush3.bf16.msra.mxu1 %v9446_v12 }
 0x5a3   :  { %6563 = vmatprep.subr.bf16.mxu0 %v9447_v5  ;;  %6590 = vmatprep.subr.bf16.mxu1 %v9409_v22 }
 0x5a6   :  { %6565 = vmatpush1.bf16.msra.mxu0 %v8244_v40  ;;  %6592 = vmatpush3.bf16.msra.mxu1 %v8246_v62 }
 0x5a7   :  { %6567 = vmatprep.subr.bf16.mxu0 %v9448_v57  ;;  %6593 = vmatprep.subr.bf16.mxu1 %v9409_v22 }
 0x5aa   :  { %6569 = vmatpush1.bf16.msra.mxu0 %v9449_v6  ;;  %6595 = vmatpush3.bf16.msra.mxu1 %v8256_v43 }
 0x5ab   :  { %6571 = vmatprep.subr.bf16.mxu0 %v8260_v54  ;;  %6596 = vmatprep.subr.bf16.mxu1 %v9409_v22 }
 0x5ae   :  { %6573 = vmatpush1.bf16.msra.mxu0 %v8264_v29  ;;  %6598 = vmatpush3.bf16.msra.mxu1 %v8266_v28 }
 0x5af   :  { %6575 = vmatprep.subr.bf16.mxu0 %v8270_v36  ;;  %6599 = vmatprep.subr.bf16.mxu1 %v9409_v22 }
 0x5b2   :  { %6577 = vmatpush1.bf16.msra.mxu0 %v8274_v8  ;;  %6601 = vmatpush3.bf16.msra.mxu1 %v8276_v0 }
 0x5b3   :  { %6603 = vmatprep.subr.bf16.mxu0 %v7975_v9  ;;  %6634 = vmatprep.subr.bf16.mxu1 %v9409_v22 }
 0x5b5   :  { %2385 = vmatmul.mubr.f32.vlgmr.msra.gmra.mrb[22].mxu0 %v8637_v4  ;;  %5409 = vmatmul.mubr.f32.vlgmr.msra.gmra.mrb[30].mxu1 %v8637_v4 }
 0x5b6   :  { %6605 = vmatpush1.bf16.msra.mxu0 %v7977_v17  ;;  %6636 = vmatpush3.bf16.msra.mxu1 %v7998_v41 }
 0x5b7   :  { %6607 = vmatprep.subr.bf16.mxu0 %v7980_v18  ;;  %6637 = vmatprep.subr.bf16.mxu1 %v9409_v22 }
 0x5b8   :  { %2545 = vmatprep.mubr.f32.mxu0 %v9411_v21  ;;  %5443 = vmatprep.mubr.msk.f32.mxu1 %vm7793_vm0, %v9411_v21 }
 0x5ba   :  { %6609 = vmatpush1.bf16.msra.mxu0 %v7985_v25  ;;  %6639 = vmatpush3.bf16.msra.mxu1 %v8008_v51 }
 0x5bb   :  { %6611 = vmatprep.subr.bf16.mxu0 %v7988_v26  ;;  %6640 = vmatprep.subr.bf16.mxu1 %v9409_v22 }
 0x5be   :  { %6613 = vmatpush1.bf16.msra.mxu0 %v7992_v34  ;;  %6642 = vmatpush3.bf16.msra.mxu1 %v8019_v61 }
 0x5bf   :  { %6615 = vmatprep.subr.bf16.mxu0 %v7995_v35  ;;  %6643 = vmatprep.subr.bf16.mxu1 %v9409_v22 }
 0x5c2   :  { %6617 = vmatpush1.bf16.msra.mxu0 %v8002_v45  ;;  %6645 = vmatpush3.bf16.msra.mxu1 %v8030_v10 }
 0x5c3   :  { %6619 = vmatprep.subr.bf16.mxu0 %v8005_v46  ;;  %6646 = vmatprep.subr.bf16.mxu1 %v9409_v22 }
 0x5c6   :  { %6621 = vmatpush1.bf16.msra.mxu0 %v9512_v60  ;;  %6648 = vmatpush3.bf16.msra.mxu1 %v9513_v63 }
 0x5c7   :  { %6623 = vmatprep.subr.bf16.mxu0 %v9514_v56  ;;  %6649 = vmatprep.subr.bf16.mxu1 %v9409_v22 }
 0x5ca   :  { %6625 = vmatpush1.bf16.msra.mxu0 %v9515_v27  ;;  %6651 = vmatpush3.bf16.msra.mxu1 %v9516_v24 }
 0x5cb   :  { %6627 = vmatprep.subr.bf16.mxu0 %v9517_v38  ;;  %6652 = vmatprep.subr.bf16.mxu1 %v9409_v22 }
 0x5ce   :  { %6629 = vmatpush1.bf16.msra.mxu0 %v9518_v44  ;;  %6654 = vmatpush3.bf16.msra.mxu1 %v9519_v31  ;;  %v9548_v31 = vld [vmem:[#allocation65_spill] sm:$0xff] }
 0x5cf   :  { %6631 = vmatprep.subr.bf16.mxu0 %v9520_v55  ;;  %6655 = vmatprep.subr.bf16.mxu1 %v9409_v22 }
 0x5d2   :  { %6633 = vmatpush1.bf16.msra.mxu0 %v9521_v13  ;;  %6657 = vmatpush3.bf16.msra.mxu1 %v9522_v15  ;;  %v9534_v15 = vld [vmem:[#allocation45_spill] sm:$0xff]  ;;  %v9535_v13 = vld [vmem:[#allocation46_spill] sm:$0xff] }
 0x5d3   :  { %6659 = vmatprep.subr.bf16.mxu0 %v9523_v2  ;;  %6690 = vmatprep.subr.bf16.mxu1 %v9409_v22  ;;  %v9533_v2 = vld [vmem:[#allocation44_spill] sm:$0xff] }
 0x5d5   :  { %2546 = vmatmul.mubr.f32.vlgmr.msra.gmra.mrb[8].mxu0 %v8642_v33  ;;  %5444 = vmatmul.mubr.f32.vlgmr.msra.gmra.mrb[32].mxu1 %v8642_v33 }
 0x5d6   :  { %6661 = vmatpush1.bf16.msra.mxu0 %v9524_v1  ;;  %6692 = vmatpush3.bf16.msra.mxu1 %v9525_v20  ;;  %v9530_v1 = vld [vmem:[#allocation41_spill] sm:$0xff]  ;;  %v9531_v20 = vld [vmem:[#allocation42_spill] sm:$0xff] }
 0x5d7   :  { %6663 = vmatprep.subr.bf16.mxu0 %v9526_v19  ;;  %6693 = vmatprep.subr.bf16.mxu1 %v9409_v22  ;;  %v9532_v19 = vld [vmem:[#allocation43_spill] sm:$0xff] }
 0x5d8   :  { %2706 = vmatprep.mubr.f32.mxu0 %v9411_v21  ;;  %5478 = vmatprep.mubr.msk.f32.mxu1 %vm7793_vm0, %v9411_v21 }
 0x5da   :  { %6665 = vmatpush1.bf16.msra.mxu0 %v9527_v30  ;;  %6695 = vmatpush3.bf16.msra.mxu1 %v9528_v52  ;;  %v9536_v52 = vld [vmem:[#allocation47_spill] sm:$0xff]  ;;  %v9538_v30 = vld [vmem:[#allocation49_spill] sm:$0xff] }
 0x5db   :  { %6667 = vmatprep.subr.bf16.mxu0 %v9529_v23  ;;  %6696 = vmatprep.subr.bf16.mxu1 %v9409_v22  ;;  %v9537_v23 = vld [vmem:[#allocation48_spill] sm:$0xff] }
 0x5de   :  { %6669 = vmatpush1.bf16.msra.mxu0 %v9530_v1  ;;  %6698 = vmatpush3.bf16.msra.mxu1 %v9531_v20  ;;  %v9539_v20 = vld [vmem:[#allocation50_spill] sm:$0xff]  ;;  %v9541_v1 = vld [vmem:[#allocation52_spill] sm:$0xff] }
 0x5df   :  { %6671 = vmatprep.subr.bf16.mxu0 %v9532_v19  ;;  %6699 = vmatprep.subr.bf16.mxu1 %v9409_v22  ;;  %v9540_v19 = vld [vmem:[#allocation51_spill] sm:$0xff] }
 0x5e2   :  { %6673 = vmatpush1.bf16.msra.mxu0 %v9533_v2  ;;  %6701 = vmatpush3.bf16.msra.mxu1 %v9534_v15  ;;  %v9542_v15 = vld [vmem:[#allocation53_spill] sm:$0xff]  ;;  %v9544_v2 = vld [vmem:[#allocation55_spill] sm:$0xff] }
 0x5e3   :  { %6675 = vmatprep.subr.bf16.mxu0 %v9535_v13  ;;  %6702 = vmatprep.subr.bf16.mxu1 %v9409_v22  ;;  %v9543_v13 = vld [vmem:[#allocation54_spill] sm:$0xff] }
 0x5e6   :  { %6677 = vmatpush1.bf16.msra.mxu0 %v9536_v52  ;;  %6704 = vmatpush3.bf16.msra.mxu1 %v9537_v23  ;;  %v9545_v23 = vld [vmem:[#allocation56_spill] sm:$0xff]  ;;  %v9547_v52 = vld [vmem:[#allocation58_spill] sm:$0xff] }
 0x5e7   :  { %6679 = vmatprep.subr.bf16.mxu0 %v9538_v30  ;;  %6705 = vmatprep.subr.bf16.mxu1 %v9409_v22  ;;  %v9546_v30 = vld [vmem:[#allocation57_spill] sm:$0xff] }
 0x5ea   :  { %6681 = vmatpush1.bf16.msra.mxu0 %v9539_v20  ;;  %6707 = vmatpush3.bf16.msra.mxu1 %v9540_v19 }
 0x5eb   :  { %6683 = vmatprep.subr.bf16.mxu0 %v9541_v1  ;;  %6708 = vmatprep.subr.bf16.mxu1 %v9409_v22 }
 0x5ee   :  { %6685 = vmatpush1.bf16.msra.mxu0 %v9542_v15  ;;  %6710 = vmatpush3.bf16.msra.mxu1 %v9543_v13 }
 0x5ef   :  { %6687 = vmatprep.subr.bf16.mxu0 %v9544_v2  ;;  %6711 = vmatprep.subr.bf16.mxu1 %v9409_v22 }
 0x5f2   :  { %6689 = vmatpush1.bf16.msra.mxu0 %v9545_v23  ;;  %6713 = vmatpush3.bf16.msra.mxu1 %v9546_v30 }
 0x5f3   :  { %6715 = vmatprep.subr.bf16.mxu0 %v9547_v52  ;;  %6746 = vmatprep.subr.bf16.mxu1 %v9409_v22 }
 0x668   :  { %v2316_v19 = vpop.f32.mrb[28].mxu1 }
 0x669   :  { %v5375_v1 = vpop.f32.mrb[29].mxu1 }
 0x66a   :  { %v2317_v1 = vadd.f32 %v2316_v19, %v8380_v14 }
 0x688   :  { %v2386_v20 = vpop.f32.mrb[22].mxu0  ;;  %v2457_v55 = vpop.f32.mrb[30].mxu1 }
 0x689   :  { %v7343_v15 = vadd.f32 %v9548_v31, %v2386_v20  ;;  %v2388_v44 = vpop.f32.mrb[23].mxu0  ;;  %v5410_v13 = vpop.f32.mrb[31].mxu1  ;;  %v2458_v30 = vadd.f32 %v2457_v55, %v9472_v58 }
 0x68a   :  { %v7345_v2 = vadd.f32 %v9471_v48, %v2388_v44 }
 0x68b   :  { %v4479_v38 = vmul.f32 -1.442695, %v7343_v15 }
 0x68c   :  { %v4480_v24 = vmul.f32 -1.442695, %v7345_v2 }
 0x68d   :  { %7480 = vpow2.f32 %v4479_v38 }
 0x68e   :  { %7482 = vpow2.f32 %v4480_v24 }
 0x697   :  { %v7481_v23 = vpop.eup %7480 }
 0x698   :  { %v2465_v27 = vadd.f32 1.0, %v7481_v23  ;;  %v7483_v52 = vpop.eup %7482 }
 0x699   :  { %v2472_v20 = vadd.f32 1.0, %v7483_v52 }
 0x69a   :  { %7484 = vrcp.f32 %v2465_v27 }
 0x6a4   :  { %v7485_v56 = vpop.eup %7484 }
 0x6a5   :  { %v2475_v63 = vmul.f32 %v7485_v56, %v2458_v30 }
 0x6a7   :  { %v2476_v60 = vadd.f32 %v2475_v63, %v2317_v1 }
 0x6a8   :  { %v2547_v31 = vpop.f32.mrb[8].mxu0  ;;  %v2618_v13 = vpop.f32.mrb[32].mxu1 }
 0x6a9   :  { %7486 = vtanh.f32 %v2476_v60  ;;  %v7315_v38 = vadd.f32 %v9433_v7, %v2547_v31  ;;  %v2549_v44 = vpop.f32.mrb[9].mxu0  ;;  %v5445_v15 = vpop.f32.mrb[33].mxu1  ;;  %v2619_v31 = vadd.f32 %v2618_v13, %v9435_v37  ;;  %v9551_v13 = vld [vmem:[#allocation29_spill] sm:$0xff] }
 0x6aa   :  { %7488 = vrcp.f32 %v2472_v20  ;;  %v7317_v27 = vadd.f32 %v9434_v42, %v2549_v44 }
 0x6ab   :  { %v4481_v2 = vmul.f32 -1.442695, %v7315_v38  ;;  %v9549_v38 = vld [vmem:[#allocation64_spill] sm:$0xff] }
 0x6ac   :  { %v4482_v19 = vmul.f32 -1.442695, %v7317_v27 }
 0x6ad   :  { %7490 = vpow2.f32 %v4481_v2 }
 0x6ae   :  { %7492 = vpow2.f32 %v4482_v19  ;;  %v9553_v19 = vld [vmem:[#allocation25_spill] sm:$0xff] }
 0x6b3   :  { %v7487_v24 = vpop.eup %7486 }
 0x6b4   :  { %v2478_v55 = vsub.f32 %v8637_v4, %v7487_v24  ;;  %v7489_v23 = vpop.eup %7488 }
 0x6b6   :  { %v2479_v56 = vmul.f32 %v7489_v23, %v2478_v55 }
 0x6b7   :  { %v7491_v63 = vpop.eup %7490 }
 0x6b8   :  { %v2626_v30 = vadd.f32 1.0, %v7491_v63  ;;  %v8762_v52 = vadd.f32 %v7487_v24, %v2479_v56  ;;  %v7493_v60 = vpop.eup %7492  ;;  %v9552_v24 = vld [vmem:[#allocation24_spill] sm:$0xff]  ;;  %v9554_v56 = vld [vmem:[#allocation31_spill] sm:$0xff]  ;;  %v9555_v63 = vld [vmem:[#allocation26_spill] sm:$0xff] }
 0x6b9   :  { %v2633_v44 = vadd.f32 1.0, %v7493_v60  ;;  %v9557_v60 = vld [vmem:[#allocation32_spill] sm:$0xff] }
 0x6ba   :  { %7494 = vrcp.f32 %v2626_v30  ;;  %v9556_v30 = vld [vmem:[#allocation27_spill] sm:$0xff] }
 0x6c4   :  { %v7495_v1 = vpop.eup %7494 }
 0x6c5   :  { %v2636_v20 = vmul.f32 %v7495_v1, %v2619_v31  ;;  %v9558_v31 = vld [vmem:[#allocation28_spill] sm:$0xff]  ;;  %v9559_v1 = vld [vmem:[#allocation30_spill] sm:$0xff] }
 0x6c7   :  { %v2637_v15 = vadd.f32 %v2636_v20, %v9549_v38  ;;  %v9560_v20 = vld [vmem:[#allocation33_spill] sm:$0xff]  ;;  %v9561_v38 = vld [vmem:[#allocation34_spill] sm:$0xff] }
 0x6c9   :  { %7496 = vtanh.f32 %v2637_v15  ;;  %v9562_v15 = vld [vmem:[#allocation35_spill] sm:$0xff] }
 0x6ca   :  { %7498 = vrcp.f32 %v2633_v44  ;;  %v9563_v44 = vld [vmem:[#allocation36_spill] sm:$0xff] }
 0x6d3   :  { %v7497_v4 = vpop.eup %7496 }
 0x6d4   :  { %v2639_v2 = vsub.f32 %v8642_v33, %v7497_v4  ;;  %v7499_v27 = vpop.eup %7498  ;;  %v9550_v33 = vld [vmem:[#allocation23_spill] sm:$0xff] }
 0x6d6   :  { %v2640_v55 = vmul.f32 %v7499_v27, %v2639_v2  ;;  %v9565_v2 = vld [vmem:[#allocation38_spill] sm:$0xff]  ;;  %v9566_v27 = vld [vmem:[#allocation39_spill] sm:$0xff] }
 0x6d8   :  { %v8767_v23 = vadd.f32 %v7497_v4, %v2640_v55  ;;  %v9564_v4 = vld [vmem:[#allocation37_spill] sm:$0xff]  ;;  %v9567_v55 = vld [vmem:[#allocation40_spill] sm:$0xff] }
 0x6da   :  { %2707 = vmatmul.mubr.f32.vlgmr.msra.gmra.mrb[24].mxu0 %v8767_v23  ;;  %5479 = vmatmul.mubr.f32.vlgmr.msra.gmra.mrb[34].mxu1 %v8767_v23 }
 0x6db   :  { %6717 = vmatpush1.bf16.msra.mxu0 %v8199_v39  ;;  %6748 = vmatpush3.bf16.msra.mxu1 %v9437_v16 }
 0x6dc   :  { %6719 = vmatprep.subr.bf16.mxu0 %v9438_v32  ;;  %6749 = vmatprep.subr.bf16.mxu1 %v9409_v22 }
 0x6dd   :  { %2847 = vmatprep.mubr.f32.mxu0 %v9411_v21  ;;  %5513 = vmatprep.mubr.msk.f32.mxu1 %vm7793_vm0, %v9411_v21 }
 0x6df   :  { %6721 = vmatpush1.bf16.msra.mxu0 %v9439_v53  ;;  %6751 = vmatpush3.bf16.msra.mxu1 %v9440_v3 }
 0x6e0   :  { %6723 = vmatprep.subr.bf16.mxu0 %v9441_v50  ;;  %6752 = vmatprep.subr.bf16.mxu1 %v9409_v22 }
 0x6e3   :  { %6725 = vmatpush1.bf16.msra.mxu0 %v9442_v59  ;;  %6754 = vmatpush3.bf16.msra.mxu1 %v9443_v47 }
 0x6e4   :  { %6727 = vmatprep.subr.bf16.mxu0 %v9444_v11  ;;  %6755 = vmatprep.subr.bf16.mxu1 %v9409_v22 }
 0x6e7   :  { %6729 = vmatpush1.bf16.msra.mxu0 %v9445_v49  ;;  %6757 = vmatpush3.bf16.msra.mxu1 %v9446_v12 }
 0x6e8   :  { %6731 = vmatprep.subr.bf16.mxu0 %v9447_v5  ;;  %6758 = vmatprep.subr.bf16.mxu1 %v9409_v22 }
 0x6eb   :  { %6733 = vmatpush1.bf16.msra.mxu0 %v8244_v40  ;;  %6760 = vmatpush3.bf16.msra.mxu1 %v8246_v62 }
 0x6ec   :  { %6735 = vmatprep.subr.bf16.mxu0 %v9448_v57  ;;  %6761 = vmatprep.subr.bf16.mxu1 %v9409_v22 }
 0x6ef   :  { %6737 = vmatpush1.bf16.msra.mxu0 %v9449_v6  ;;  %6763 = vmatpush3.bf16.msra.mxu1 %v8256_v43 }
 0x6f0   :  { %6739 = vmatprep.subr.bf16.mxu0 %v8260_v54  ;;  %6764 = vmatprep.subr.bf16.mxu1 %v9409_v22 }
 0x6f3   :  { %6741 = vmatpush1.bf16.msra.mxu0 %v8264_v29  ;;  %6766 = vmatpush3.bf16.msra.mxu1 %v8266_v28 }
 0x6f4   :  { %6743 = vmatprep.subr.bf16.mxu0 %v8270_v36  ;;  %6767 = vmatprep.subr.bf16.mxu1 %v9409_v22 }
 0x6f7   :  { %6745 = vmatpush1.bf16.msra.mxu0 %v8274_v8  ;;  %6769 = vmatpush3.bf16.msra.mxu1 %v8276_v0 }
 0x6f8   :  { %6771 = vmatprep.subr.bf16.mxu0 %v7975_v9  ;;  %6802 = vmatprep.subr.bf16.mxu1 %v9409_v22 }
 0x6fa   :  { %2848 = vmatmul.mubr.f32.vlgmr.msra.gmra.mrb[24].mxu0 %v8762_v52  ;;  %5514 = vmatmul.mubr.f32.vlgmr.msra.gmra.mrb[36].mxu1 %v8762_v52 }
 0x6fb   :  { %6773 = vmatpush1.bf16.msra.mxu0 %v7977_v17  ;;  %6804 = vmatpush3.bf16.msra.mxu1 %v7998_v41 }
 0x6fc   :  { %6775 = vmatprep.subr.bf16.mxu0 %v7980_v18  ;;  %6805 = vmatprep.subr.bf16.mxu1 %v9409_v22 }
 0x6fd   :  { %3008 = vmatprep.mubr.f32.mxu0 %v9411_v21  ;;  %5548 = vmatprep.mubr.msk.f32.mxu1 %vm7793_vm0, %v9411_v21 }
 0x6ff   :  { %6777 = vmatpush1.bf16.msra.mxu0 %v7985_v25  ;;  %6807 = vmatpush3.bf16.msra.mxu1 %v8008_v51 }
 0x700   :  { %6779 = vmatprep.subr.bf16.mxu0 %v7988_v26  ;;  %6808 = vmatprep.subr.bf16.mxu1 %v9409_v22 }
 0x703   :  { %6781 = vmatpush1.bf16.msra.mxu0 %v7992_v34  ;;  %6810 = vmatpush3.bf16.msra.mxu1 %v8019_v61 }
 0x704   :  { %6783 = vmatprep.subr.bf16.mxu0 %v7995_v35  ;;  %6811 = vmatprep.subr.bf16.mxu1 %v9409_v22 }
 0x707   :  { %6785 = vmatpush1.bf16.msra.mxu0 %v8002_v45  ;;  %6813 = vmatpush3.bf16.msra.mxu1 %v8030_v10 }
 0x708   :  { %6787 = vmatprep.subr.bf16.mxu0 %v8005_v46  ;;  %6814 = vmatprep.subr.bf16.mxu1 %v9409_v22 }
 0x70b   :  { %6789 = vmatpush1.bf16.msra.mxu0 %v9550_v33  ;;  %6816 = vmatpush3.bf16.msra.mxu1 %v9551_v13 }
 0x70c   :  { %6791 = vmatprep.subr.bf16.mxu0 %v9552_v24  ;;  %6817 = vmatprep.subr.bf16.mxu1 %v9409_v22 }
 0x70f   :  { %6793 = vmatpush1.bf16.msra.mxu0 %v9553_v19  ;;  %6819 = vmatpush3.bf16.msra.mxu1 %v9554_v56 }
 0x710   :  { %6795 = vmatprep.subr.bf16.mxu0 %v9555_v63  ;;  %6820 = vmatprep.subr.bf16.mxu1 %v9409_v22 }
 0x713   :  { %6797 = vmatpush1.bf16.msra.mxu0 %v9556_v30  ;;  %6822 = vmatpush3.bf16.msra.mxu1 %v9557_v60  ;;  %v9586_v60 = vld [vmem:[#allocation65_spill] sm:$0xff] }
 0x714   :  { %6799 = vmatprep.subr.bf16.mxu0 %v9558_v31  ;;  %6823 = vmatprep.subr.bf16.mxu1 %v9409_v22 }
 0x717   :  { %6801 = vmatpush1.bf16.msra.mxu0 %v9559_v1  ;;  %6825 = vmatpush3.bf16.msra.mxu1 %v9560_v20  ;;  %v9572_v20 = vld [vmem:[#allocation45_spill] sm:$0xff]  ;;  %v9573_v1 = vld [vmem:[#allocation46_spill] sm:$0xff] }
 0x718   :  { %6827 = vmatprep.subr.bf16.mxu0 %v9561_v38  ;;  %6858 = vmatprep.subr.bf16.mxu1 %v9409_v22  ;;  %v9571_v38 = vld [vmem:[#allocation44_spill] sm:$0xff] }
 0x71a   :  { %3009 = vmatmul.mubr.f32.vlgmr.msra.gmra.mrb[10].mxu0 %v8767_v23  ;;  %5549 = vmatmul.mubr.f32.vlgmr.msra.gmra.mrb[38].mxu1 %v8767_v23 }
 0x71b   :  { %6829 = vmatpush1.bf16.msra.mxu0 %v9562_v15  ;;  %6860 = vmatpush3.bf16.msra.mxu1 %v9563_v44  ;;  %v9568_v15 = vld [vmem:[#allocation41_spill] sm:$0xff]  ;;  %v9569_v44 = vld [vmem:[#allocation42_spill] sm:$0xff] }
 0x71c   :  { %6831 = vmatprep.subr.bf16.mxu0 %v9564_v4  ;;  %6861 = vmatprep.subr.bf16.mxu1 %v9409_v22  ;;  %v9570_v4 = vld [vmem:[#allocation43_spill] sm:$0xff] }
 0x71d   :  { %3169 = vmatprep.mubr.f32.mxu0 %v9411_v21  ;;  %5583 = vmatprep.mubr.msk.f32.mxu1 %vm7793_vm0, %v9411_v21 }
 0x71f   :  { %6833 = vmatpush1.bf16.msra.mxu0 %v9565_v2  ;;  %6863 = vmatpush3.bf16.msra.mxu1 %v9566_v27  ;;  %v9574_v27 = vld [vmem:[#allocation47_spill] sm:$0xff]  ;;  %v9576_v2 = vld [vmem:[#allocation49_spill] sm:$0xff] }
 0x720   :  { %6835 = vmatprep.subr.bf16.mxu0 %v9567_v55  ;;  %6864 = vmatprep.subr.bf16.mxu1 %v9409_v22  ;;  %v9575_v55 = vld [vmem:[#allocation48_spill] sm:$0xff] }
 0x723   :  { %6837 = vmatpush1.bf16.msra.mxu0 %v9568_v15  ;;  %6866 = vmatpush3.bf16.msra.mxu1 %v9569_v44  ;;  %v9577_v44 = vld [vmem:[#allocation50_spill] sm:$0xff]  ;;  %v9579_v15 = vld [vmem:[#allocation52_spill] sm:$0xff] }
 0x724   :  { %6839 = vmatprep.subr.bf16.mxu0 %v9570_v4  ;;  %6867 = vmatprep.subr.bf16.mxu1 %v9409_v22  ;;  %v9578_v4 = vld [vmem:[#allocation51_spill] sm:$0xff] }
 0x727   :  { %6841 = vmatpush1.bf16.msra.mxu0 %v9571_v38  ;;  %6869 = vmatpush3.bf16.msra.mxu1 %v9572_v20  ;;  %v9580_v20 = vld [vmem:[#allocation53_spill] sm:$0xff]  ;;  %v9582_v38 = vld [vmem:[#allocation55_spill] sm:$0xff] }
 0x728   :  { %6843 = vmatprep.subr.bf16.mxu0 %v9573_v1  ;;  %6870 = vmatprep.subr.bf16.mxu1 %v9409_v22  ;;  %v9581_v1 = vld [vmem:[#allocation54_spill] sm:$0xff] }
 0x72b   :  { %6845 = vmatpush1.bf16.msra.mxu0 %v9574_v27  ;;  %6872 = vmatpush3.bf16.msra.mxu1 %v9575_v55  ;;  %v9583_v55 = vld [vmem:[#allocation56_spill] sm:$0xff]  ;;  %v9585_v27 = vld [vmem:[#allocation58_spill] sm:$0xff] }
 0x72c   :  { %6847 = vmatprep.subr.bf16.mxu0 %v9576_v2  ;;  %6873 = vmatprep.subr.bf16.mxu1 %v9409_v22  ;;  %v9584_v2 = vld [vmem:[#allocation57_spill] sm:$0xff] }
 0x72f   :  { %6849 = vmatpush1.bf16.msra.mxu0 %v9577_v44  ;;  %6875 = vmatpush3.bf16.msra.mxu1 %v9578_v4 }
 0x730   :  { %6851 = vmatprep.subr.bf16.mxu0 %v9579_v15  ;;  %6876 = vmatprep.subr.bf16.mxu1 %v9409_v22 }
 0x733   :  { %6853 = vmatpush1.bf16.msra.mxu0 %v9580_v20  ;;  %6878 = vmatpush3.bf16.msra.mxu1 %v9581_v1 }
 0x734   :  { %6855 = vmatprep.subr.bf16.mxu0 %v9582_v38  ;;  %6879 = vmatprep.subr.bf16.mxu1 %v9409_v22 }
 0x737   :  { %6857 = vmatpush1.bf16.msra.mxu0 %v9583_v55  ;;  %6881 = vmatpush3.bf16.msra.mxu1 %v9584_v2 }
 0x738   :  { %6883 = vmatprep.subr.bf16.mxu0 %v9585_v27  ;;  %6914 = vmatprep.subr.bf16.mxu1 %v9409_v22 }
 0x7ad   :  { %v2779_v4 = vpop.f32.mrb[34].mxu1 }
 0x7ae   :  { %v5480_v15 = vpop.f32.mrb[35].mxu1 }
 0x7af   :  { %v2780_v15 = vadd.f32 %v2779_v4, %v8380_v14 }
 0x7cd   :  { %v2849_v44 = vpop.f32.mrb[24].mxu0  ;;  %v2920_v31 = vpop.f32.mrb[36].mxu1 }
 0x7ce   :  { %v7347_v20 = vadd.f32 %v9586_v60, %v2849_v44  ;;  %v2851_v30 = vpop.f32.mrb[25].mxu0  ;;  %v5515_v1 = vpop.f32.mrb[37].mxu1  ;;  %v2921_v2 = vadd.f32 %v2920_v31, %v9472_v58 }
 0x7cf   :  { %v7349_v38 = vadd.f32 %v9471_v48, %v2851_v30 }
 0x7d0   :  { %v4483_v63 = vmul.f32 -1.442695, %v7347_v20 }
 0x7d1   :  { %v4484_v56 = vmul.f32 -1.442695, %v7349_v38 }
 0x7d2   :  { %7500 = vpow2.f32 %v4483_v63 }
 0x7d3   :  { %7502 = vpow2.f32 %v4484_v56 }
 0x7dc   :  { %v7501_v55 = vpop.eup %7500 }
 0x7dd   :  { %v2928_v19 = vadd.f32 1.0, %v7501_v55  ;;  %v7503_v27 = vpop.eup %7502 }
 0x7de   :  { %v2935_v44 = vadd.f32 1.0, %v7503_v27 }
 0x7df   :  { %7504 = vrcp.f32 %v2928_v19 }
 0x7e9   :  { %v7505_v24 = vpop.eup %7504 }
 0x7ea   :  { %v2938_v13 = vmul.f32 %v7505_v24, %v2921_v2 }
 0x7ec   :  { %v2939_v33 = vadd.f32 %v2938_v13, %v2780_v15 }
 0x7ed   :  { %v3010_v60 = vpop.f32.mrb[10].mxu0  ;;  %v3081_v1 = vpop.f32.mrb[38].mxu1 }
 0x7ee   :  { %7506 = vtanh.f32 %v2939_v33  ;;  %v7319_v63 = vadd.f32 %v9433_v7, %v3010_v60  ;;  %v3012_v30 = vpop.f32.mrb[11].mxu0  ;;  %v5550_v20 = vpop.f32.mrb[39].mxu1  ;;  %v3082_v60 = vadd.f32 %v3081_v1, %v9435_v37  ;;  %v9589_v1 = vld [vmem:[#allocation29_spill] sm:$0xff] }
 0x7ef   :  { %7508 = vrcp.f32 %v2935_v44  ;;  %v7321_v19 = vadd.f32 %v9434_v42, %v3012_v30 }
 0x7f0   :  { %v4485_v38 = vmul.f32 -1.442695, %v7319_v63  ;;  %v9587_v63 = vld [vmem:[#allocation63_spill] sm:$0xff] }
 0x7f1   :  { %v4486_v4 = vmul.f32 -1.442695, %v7321_v19 }
 0x7f2   :  { %7510 = vpow2.f32 %v4485_v38 }
 0x7f3   :  { %7512 = vpow2.f32 %v4486_v4  ;;  %v9591_v4 = vld [vmem:[#allocation25_spill] sm:$0xff] }
 0x7f8   :  { %v7507_v56 = vpop.eup %7506 }
 0x7f9   :  { %v2941_v31 = vsub.f32 %v8762_v52, %v7507_v56  ;;  %v7509_v55 = vpop.eup %7508 }
 0x7fb   :  { %v2942_v24 = vmul.f32 %v7509_v55, %v2941_v31 }
 0x7fc   :  { %v7511_v13 = vpop.eup %7510 }
 0x7fd   :  { %v3089_v2 = vadd.f32 1.0, %v7511_v13  ;;  %v8887_v27 = vadd.f32 %v7507_v56, %v2942_v24  ;;  %v7513_v33 = vpop.eup %7512  ;;  %v9590_v56 = vld [vmem:[#allocation24_spill] sm:$0xff]  ;;  %v9592_v24 = vld [vmem:[#allocation31_spill] sm:$0xff]  ;;  %v9593_v13 = vld [vmem:[#allocation26_spill] sm:$0xff] }
 0x7fe   :  { %v3096_v30 = vadd.f32 1.0, %v7513_v33  ;;  %v9595_v33 = vld [vmem:[#allocation32_spill] sm:$0xff] }
 0x7ff   :  { %7514 = vrcp.f32 %v3089_v2  ;;  %v9594_v2 = vld [vmem:[#allocation27_spill] sm:$0xff] }
 0x809   :  { %v7515_v15 = vpop.eup %7514 }
 0x80a   :  { %v3099_v44 = vmul.f32 %v7515_v15, %v3082_v60  ;;  %v9596_v60 = vld [vmem:[#allocation28_spill] sm:$0xff]  ;;  %v9597_v15 = vld [vmem:[#allocation30_spill] sm:$0xff] }
 0x80c   :  { %v3100_v20 = vadd.f32 %v3099_v44, %v9587_v63  ;;  %v9598_v44 = vld [vmem:[#allocation33_spill] sm:$0xff]  ;;  %v9599_v63 = vld [vmem:[#allocation34_spill] sm:$0xff] }
 0x80e   :  { %7516 = vtanh.f32 %v3100_v20  ;;  %v9600_v20 = vld [vmem:[#allocation35_spill] sm:$0xff] }
 0x80f   :  { %7518 = vrcp.f32 %v3096_v30  ;;  %v9601_v30 = vld [vmem:[#allocation36_spill] sm:$0xff] }
 0x818   :  { %v7517_v52 = vpop.eup %7516 }
 0x819   :  { %v3102_v38 = vsub.f32 %v8767_v23, %v7517_v52  ;;  %v7519_v19 = vpop.eup %7518  ;;  %v9588_v23 = vld [vmem:[#allocation23_spill] sm:$0xff] }
 0x81b   :  { %v3103_v31 = vmul.f32 %v7519_v19, %v3102_v38  ;;  %v9603_v38 = vld [vmem:[#allocation38_spill] sm:$0xff]  ;;  %v9604_v19 = vld [vmem:[#allocation39_spill] sm:$0xff] }
 0x81d   :  { %v8892_v55 = vadd.f32 %v7517_v52, %v3103_v31  ;;  %v9602_v52 = vld [vmem:[#allocation37_spill] sm:$0xff]  ;;  %v9605_v31 = vld [vmem:[#allocation40_spill] sm:$0xff] }
 0x81f   :  { %3170 = vmatmul.mubr.f32.vlgmr.msra.gmra.mrb[26].mxu0 %v8892_v55  ;;  %5584 = vmatmul.mubr.f32.vlgmr.msra.gmra.mrb[40].mxu1 %v8892_v55 }
 0x820   :  { %6885 = vmatpush1.bf16.msra.mxu0 %v8199_v39  ;;  %6916 = vmatpush3.bf16.msra.mxu1 %v9437_v16 }
 0x821   :  { %6887 = vmatprep.subr.bf16.mxu0 %v9438_v32  ;;  %6917 = vmatprep.subr.bf16.mxu1 %v9409_v22 }
 0x822   :  { %3310 = vmatprep.mubr.f32.mxu0 %v9411_v21  ;;  %5618 = vmatprep.mubr.msk.f32.mxu1 %vm7793_vm0, %v9411_v21 }
 0x824   :  { %6889 = vmatpush1.bf16.msra.mxu0 %v9439_v53  ;;  %6919 = vmatpush3.bf16.msra.mxu1 %v9440_v3 }
 0x825   :  { %6891 = vmatprep.subr.bf16.mxu0 %v9441_v50  ;;  %6920 = vmatprep.subr.bf16.mxu1 %v9409_v22 }
 0x828   :  { %6893 = vmatpush1.bf16.msra.mxu0 %v9442_v59  ;;  %6922 = vmatpush3.bf16.msra.mxu1 %v9443_v47 }
 0x829   :  { %6895 = vmatprep.subr.bf16.mxu0 %v9444_v11  ;;  %6923 = vmatprep.subr.bf16.mxu1 %v9409_v22 }
 0x82c   :  { %6897 = vmatpush1.bf16.msra.mxu0 %v9445_v49  ;;  %6925 = vmatpush3.bf16.msra.mxu1 %v9446_v12 }
 0x82d   :  { %6899 = vmatprep.subr.bf16.mxu0 %v9447_v5  ;;  %6926 = vmatprep.subr.bf16.mxu1 %v9409_v22 }
 0x830   :  { %6901 = vmatpush1.bf16.msra.mxu0 %v8244_v40  ;;  %6928 = vmatpush3.bf16.msra.mxu1 %v8246_v62 }
 0x831   :  { %6903 = vmatprep.subr.bf16.mxu0 %v9448_v57  ;;  %6929 = vmatprep.subr.bf16.mxu1 %v9409_v22 }
 0x834   :  { %6905 = vmatpush1.bf16.msra.mxu0 %v9449_v6  ;;  %6931 = vmatpush3.bf16.msra.mxu1 %v8256_v43 }
 0x835   :  { %6907 = vmatprep.subr.bf16.mxu0 %v8260_v54  ;;  %6932 = vmatprep.subr.bf16.mxu1 %v9409_v22 }
 0x838   :  { %6909 = vmatpush1.bf16.msra.mxu0 %v8264_v29  ;;  %6934 = vmatpush3.bf16.msra.mxu1 %v8266_v28 }
 0x839   :  { %6911 = vmatprep.subr.bf16.mxu0 %v8270_v36  ;;  %6935 = vmatprep.subr.bf16.mxu1 %v9409_v22 }
 0x83c   :  { %6913 = vmatpush1.bf16.msra.mxu0 %v8274_v8  ;;  %6937 = vmatpush3.bf16.msra.mxu1 %v8276_v0 }
 0x83d   :  { %6939 = vmatprep.subr.bf16.mxu0 %v7975_v9  ;;  %6970 = vmatprep.subr.bf16.mxu1 %v9409_v22 }
 0x83f   :  { %3311 = vmatmul.mubr.f32.vlgmr.msra.gmra.mrb[26].mxu0 %v8887_v27  ;;  %5619 = vmatmul.mubr.f32.vlgmr.msra.gmra.mrb[42].mxu1 %v8887_v27 }
 0x840   :  { %6941 = vmatpush1.bf16.msra.mxu0 %v7977_v17  ;;  %6972 = vmatpush3.bf16.msra.mxu1 %v7998_v41 }
 0x841   :  { %6943 = vmatprep.subr.bf16.mxu0 %v7980_v18  ;;  %6973 = vmatprep.subr.bf16.mxu1 %v9409_v22 }
 0x842   :  { %3471 = vmatprep.mubr.f32.mxu0 %v9411_v21  ;;  %5653 = vmatprep.mubr.msk.f32.mxu1 %vm7793_vm0, %v9411_v21 }
 0x844   :  { %6945 = vmatpush1.bf16.msra.mxu0 %v7985_v25  ;;  %6975 = vmatpush3.bf16.msra.mxu1 %v8008_v51 }
 0x845   :  { %6947 = vmatprep.subr.bf16.mxu0 %v7988_v26  ;;  %6976 = vmatprep.subr.bf16.mxu1 %v9409_v22 }
 0x848   :  { %6949 = vmatpush1.bf16.msra.mxu0 %v7992_v34  ;;  %6978 = vmatpush3.bf16.msra.mxu1 %v8019_v61 }
 0x849   :  { %6951 = vmatprep.subr.bf16.mxu0 %v7995_v35  ;;  %6979 = vmatprep.subr.bf16.mxu1 %v9409_v22 }
 0x84c   :  { %6953 = vmatpush1.bf16.msra.mxu0 %v8002_v45  ;;  %6981 = vmatpush3.bf16.msra.mxu1 %v8030_v10 }
 0x84d   :  { %6955 = vmatprep.subr.bf16.mxu0 %v8005_v46  ;;  %6982 = vmatprep.subr.bf16.mxu1 %v9409_v22 }
 0x850   :  { %6957 = vmatpush1.bf16.msra.mxu0 %v9588_v23  ;;  %6984 = vmatpush3.bf16.msra.mxu1 %v9589_v1 }
 0x851   :  { %6959 = vmatprep.subr.bf16.mxu0 %v9590_v56  ;;  %6985 = vmatprep.subr.bf16.mxu1 %v9409_v22 }
 0x854   :  { %6961 = vmatpush1.bf16.msra.mxu0 %v9591_v4  ;;  %6987 = vmatpush3.bf16.msra.mxu1 %v9592_v24 }
 0x855   :  { %6963 = vmatprep.subr.bf16.mxu0 %v9593_v13  ;;  %6988 = vmatprep.subr.bf16.mxu1 %v9409_v22 }
 0x858   :  { %6965 = vmatpush1.bf16.msra.mxu0 %v9594_v2  ;;  %6990 = vmatpush3.bf16.msra.mxu1 %v9595_v33  ;;  %v9624_v33 = vld [vmem:[#allocation65_spill] sm:$0xff] }
 0x859   :  { %6967 = vmatprep.subr.bf16.mxu0 %v9596_v60  ;;  %6991 = vmatprep.subr.bf16.mxu1 %v9409_v22 }
 0x85c   :  { %6969 = vmatpush1.bf16.msra.mxu0 %v9597_v15  ;;  %6993 = vmatpush3.bf16.msra.mxu1 %v9598_v44  ;;  %v9610_v44 = vld [vmem:[#allocation45_spill] sm:$0xff]  ;;  %v9611_v15 = vld [vmem:[#allocation46_spill] sm:$0xff] }
 0x85d   :  { %6995 = vmatprep.subr.bf16.mxu0 %v9599_v63  ;;  %7026 = vmatprep.subr.bf16.mxu1 %v9409_v22  ;;  %v9609_v63 = vld [vmem:[#allocation44_spill] sm:$0xff] }
 0x85f   :  { %3472 = vmatmul.mubr.f32.vlgmr.msra.gmra.mrb[12].mxu0 %v8892_v55  ;;  %5654 = vmatmul.mubr.f32.vlgmr.msra.gmra.mrb[44].mxu1 %v8892_v55 }
 0x860   :  { %6997 = vmatpush1.bf16.msra.mxu0 %v9600_v20  ;;  %7028 = vmatpush3.bf16.msra.mxu1 %v9601_v30  ;;  %v9606_v20 = vld [vmem:[#allocation41_spill] sm:$0xff]  ;;  %v9607_v30 = vld [vmem:[#allocation42_spill] sm:$0xff] }
 0x861   :  { %6999 = vmatprep.subr.bf16.mxu0 %v9602_v52  ;;  %7029 = vmatprep.subr.bf16.mxu1 %v9409_v22  ;;  %v9608_v52 = vld [vmem:[#allocation43_spill] sm:$0xff] }
 0x862   :  { %3632 = vmatprep.mubr.f32.mxu0 %v9411_v21  ;;  %5688 = vmatprep.mubr.msk.f32.mxu1 %vm7793_vm0, %v9411_v21 }
 0x864   :  { %7001 = vmatpush1.bf16.msra.mxu0 %v9603_v38  ;;  %7031 = vmatpush3.bf16.msra.mxu1 %v9604_v19  ;;  %v9612_v19 = vld [vmem:[#allocation47_spill] sm:$0xff]  ;;  %v9614_v38 = vld [vmem:[#allocation49_spill] sm:$0xff] }
 0x865   :  { %7003 = vmatprep.subr.bf16.mxu0 %v9605_v31  ;;  %7032 = vmatprep.subr.bf16.mxu1 %v9409_v22  ;;  %v9613_v31 = vld [vmem:[#allocation48_spill] sm:$0xff] }
 0x868   :  { %7005 = vmatpush1.bf16.msra.mxu0 %v9606_v20  ;;  %7034 = vmatpush3.bf16.msra.mxu1 %v9607_v30  ;;  %v9615_v30 = vld [vmem:[#allocation50_spill] sm:$0xff]  ;;  %v9617_v20 = vld [vmem:[#allocation52_spill] sm:$0xff] }
 0x869   :  { %7007 = vmatprep.subr.bf16.mxu0 %v9608_v52  ;;  %7035 = vmatprep.subr.bf16.mxu1 %v9409_v22  ;;  %v9616_v52 = vld [vmem:[#allocation51_spill] sm:$0xff] }
 0x86c   :  { %7009 = vmatpush1.bf16.msra.mxu0 %v9609_v63  ;;  %7037 = vmatpush3.bf16.msra.mxu1 %v9610_v44  ;;  %v9618_v44 = vld [vmem:[#allocation53_spill] sm:$0xff]  ;;  %v9620_v63 = vld [vmem:[#allocation55_spill] sm:$0xff] }
 0x86d   :  { %7011 = vmatprep.subr.bf16.mxu0 %v9611_v15  ;;  %7038 = vmatprep.subr.bf16.mxu1 %v9409_v22  ;;  %v9619_v15 = vld [vmem:[#allocation54_spill] sm:$0xff] }
 0x870   :  { %7013 = vmatpush1.bf16.msra.mxu0 %v9612_v19  ;;  %7040 = vmatpush3.bf16.msra.mxu1 %v9613_v31  ;;  %v9621_v31 = vld [vmem:[#allocation56_spill] sm:$0xff]  ;;  %v9623_v19 = vld [vmem:[#allocation58_spill] sm:$0xff] }
 0x871   :  { %7015 = vmatprep.subr.bf16.mxu0 %v9614_v38  ;;  %7041 = vmatprep.subr.bf16.mxu1 %v9409_v22  ;;  %v9622_v38 = vld [vmem:[#allocation57_spill] sm:$0xff] }
 0x874   :  { %7017 = vmatpush1.bf16.msra.mxu0 %v9615_v30  ;;  %7043 = vmatpush3.bf16.msra.mxu1 %v9616_v52 }
 0x875   :  { %7019 = vmatprep.subr.bf16.mxu0 %v9617_v20  ;;  %7044 = vmatprep.subr.bf16.mxu1 %v9409_v22 }
 0x878   :  { %7021 = vmatpush1.bf16.msra.mxu0 %v9618_v44  ;;  %7046 = vmatpush3.bf16.msra.mxu1 %v9619_v15 }
 0x879   :  { %7023 = vmatprep.subr.bf16.mxu0 %v9620_v63  ;;  %7047 = vmatprep.subr.bf16.mxu1 %v9409_v22 }
 0x87c   :  { %7025 = vmatpush1.bf16.msra.mxu0 %v9621_v31  ;;  %7049 = vmatpush3.bf16.msra.mxu1 %v9622_v38 }
 0x87d   :  { %7051 = vmatprep.subr.bf16.mxu0 %v9623_v19  ;;  %7082 = vmatprep.subr.bf16.mxu1 %v9409_v22 }
 0x8f2   :  { %v3242_v52 = vpop.f32.mrb[40].mxu1 }
 0x8f3   :  { %v5585_v20 = vpop.f32.mrb[41].mxu1 }
 0x8f4   :  { %v3243_v20 = vadd.f32 %v3242_v52, %v8380_v14 }
 0x912   :  { %v3312_v30 = vpop.f32.mrb[26].mxu0  ;;  %v3383_v60 = vpop.f32.mrb[42].mxu1 }
 0x913   :  { %v7351_v44 = vadd.f32 %v9624_v33, %v3312_v30  ;;  %v3314_v2 = vpop.f32.mrb[27].mxu0  ;;  %v5620_v15 = vpop.f32.mrb[43].mxu1  ;;  %v3384_v38 = vadd.f32 %v3383_v60, %v9472_v58 }
 0x914   :  { %v7353_v63 = vadd.f32 %v9471_v48, %v3314_v2 }
 0x915   :  { %v4487_v13 = vmul.f32 -1.442695, %v7351_v44 }
 0x916   :  { %v4488_v24 = vmul.f32 -1.442695, %v7353_v63 }
 0x917   :  { %7520 = vpow2.f32 %v4487_v13 }
 0x918   :  { %7522 = vpow2.f32 %v4488_v24 }
 0x921   :  { %v7521_v31 = vpop.eup %7520 }
 0x922   :  { %v3391_v4 = vadd.f32 1.0, %v7521_v31  ;;  %v7523_v19 = vpop.eup %7522 }
 0x923   :  { %v3398_v30 = vadd.f32 1.0, %v7523_v19 }
 0x924   :  { %7524 = vrcp.f32 %v3391_v4 }
 0x92e   :  { %v7525_v56 = vpop.eup %7524 }
 0x92f   :  { %v3401_v1 = vmul.f32 %v7525_v56, %v3384_v38 }
 0x931   :  { %v3402_v23 = vadd.f32 %v3401_v1, %v3243_v20 }
 0x932   :  { %v3473_v33 = vpop.f32.mrb[12].mxu0  ;;  %v3544_v15 = vpop.f32.mrb[44].mxu1 }
 0x933   :  { %7526 = vtanh.f32 %v3402_v23  ;;  %v7323_v13 = vadd.f32 %v9433_v7, %v3473_v33  ;;  %v3475_v2 = vpop.f32.mrb[13].mxu0  ;;  %v5655_v44 = vpop.f32.mrb[45].mxu1  ;;  %v3545_v33 = vadd.f32 %v3544_v15, %v9435_v37  ;;  %v9640_v15 = vld [vmem:[#allocation37_spill] sm:$0xff] }
 0x934   :  { %7528 = vrcp.f32 %v3398_v30  ;;  %v7325_v4 = vadd.f32 %v9434_v42, %v3475_v2 }
 0x935   :  { %v4489_v63 = vmul.f32 -1.442695, %v7323_v13  ;;  %v9625_v13 = vld [vmem:[#allocation67_spill] sm:$0xff] }
 0x936   :  { %v4490_v52 = vmul.f32 -1.442695, %v7325_v4 }
 0x937   :  { %7530 = vpow2.f32 %v4489_v63 }
 0x938   :  { %7532 = vpow2.f32 %v4490_v52  ;;  %v9642_v52 = vld [vmem:[#allocation39_spill] sm:$0xff] }
 0x93d   :  { %v7527_v24 = vpop.eup %7526 }
 0x93e   :  { %v3404_v60 = vsub.f32 %v8887_v27, %v7527_v24  ;;  %v7529_v31 = vpop.eup %7528 }
 0x940   :  { %v3405_v56 = vmul.f32 %v7529_v31, %v3404_v60 }
 0x941   :  { %v7531_v1 = vpop.eup %7530 }
 0x942   :  { %v3552_v38 = vadd.f32 1.0, %v7531_v1  ;;  %v9012_v19 = vadd.f32 %v7527_v24, %v3405_v56  ;;  %v7533_v23 = vpop.eup %7532  ;;  %v9641_v24 = vld [vmem:[#allocation38_spill] sm:$0xff]  ;;  %v9643_v56 = vld [vmem:[#allocation40_spill] sm:$0xff]  ;;  %v9644_v1 = vld [vmem:[#allocation41_spill] sm:$0xff] }
 0x943   :  { %v3559_v2 = vadd.f32 1.0, %v7533_v23  ;;  %v9646_v23 = vld [vmem:[#allocation43_spill] sm:$0xff] }
 0x944   :  { %7534 = vrcp.f32 %v3552_v38  ;;  %v9645_v38 = vld [vmem:[#allocation42_spill] sm:$0xff] }
 0x94e   :  { %v7535_v20 = vpop.eup %7534 }
 0x94f   :  { %v3562_v30 = vmul.f32 %v7535_v20, %v3545_v33  ;;  %v9647_v33 = vld [vmem:[#allocation44_spill] sm:$0xff]  ;;  %v9648_v20 = vld [vmem:[#allocation45_spill] sm:$0xff] }
 0x951   :  { %v3563_v44 = vadd.f32 %v3562_v30, %v9625_v13  ;;  %v9649_v30 = vld [vmem:[#allocation46_spill] sm:$0xff]  ;;  %v9650_v13 = vld [vmem:[#allocation47_spill] sm:$0xff] }
 0x953   :  { %7536 = vtanh.f32 %v3563_v44  ;;  %v9651_v44 = vld [vmem:[#allocation48_spill] sm:$0xff] }
 0x954   :  { %7538 = vrcp.f32 %v3559_v2  ;;  %v9652_v2 = vld [vmem:[#allocation49_spill] sm:$0xff] }
 0x95d   :  { %v7537_v27 = vpop.eup %7536 }
 0x95e   :  { %v3565_v63 = vsub.f32 %v8892_v55, %v7537_v27  ;;  %v7539_v4 = vpop.eup %7538  ;;  %v9639_v55 = vld [vmem:[#allocation36_spill] sm:$0xff] }
 0x960   :  { %v3566_v60 = vmul.f32 %v7539_v4, %v3565_v63  ;;  %v9654_v63 = vld [vmem:[#allocation51_spill] sm:$0xff]  ;;  %v9655_v4 = vld [vmem:[#allocation52_spill] sm:$0xff] }
 0x962   :  { %v9017_v31 = vadd.f32 %v7537_v27, %v3566_v60  ;;  %v9653_v27 = vld [vmem:[#allocation50_spill] sm:$0xff]  ;;  %v9656_v60 = vld [vmem:[#allocation53_spill] sm:$0xff] }
 0x964   :  { %3633 = vmatmul.mubr.f32.vlgmr.msra.gmra.mrb[28].mxu0 %v9017_v31  ;;  %5689 = vmatmul.mubr.f32.vlgmr.msra.gmra.mrb[46].mxu1 %v9017_v31 }
 0x965   :  { %7053 = vmatpush1.bf16.msra.mxu0 %v8199_v39  ;;  %7084 = vmatpush3.bf16.msra.mxu1 %v9437_v16 }
 0x966   :  { %7055 = vmatprep.subr.bf16.mxu0 %v9438_v32  ;;  %7085 = vmatprep.subr.bf16.mxu1 %v9409_v22 }
 0x967   :  { %3773 = vmatprep.mubr.f32.mxu0 %v9411_v21  ;;  %5723 = vmatprep.mubr.msk.f32.mxu1 %vm7793_vm0, %v9411_v21 }
 0x969   :  { %7057 = vmatpush1.bf16.msra.mxu0 %v9439_v53  ;;  %7087 = vmatpush3.bf16.msra.mxu1 %v9440_v3 }
 0x96a   :  { %7059 = vmatprep.subr.bf16.mxu0 %v9441_v50  ;;  %7088 = vmatprep.subr.bf16.mxu1 %v9409_v22 }
 0x96d   :  { %7061 = vmatpush1.bf16.msra.mxu0 %v9442_v59  ;;  %7090 = vmatpush3.bf16.msra.mxu1 %v9443_v47 }
 0x96e   :  { %7063 = vmatprep.subr.bf16.mxu0 %v9444_v11  ;;  %7091 = vmatprep.subr.bf16.mxu1 %v9409_v22 }
 0x971   :  { %7065 = vmatpush1.bf16.msra.mxu0 %v9445_v49  ;;  %7093 = vmatpush3.bf16.msra.mxu1 %v9446_v12 }
 0x972   :  { %7067 = vmatprep.subr.bf16.mxu0 %v9447_v5  ;;  %7094 = vmatprep.subr.bf16.mxu1 %v9409_v22 }
 0x975   :  { %7069 = vmatpush1.bf16.msra.mxu0 %v8244_v40  ;;  %7096 = vmatpush3.bf16.msra.mxu1 %v8246_v62 }
 0x976   :  { %7071 = vmatprep.subr.bf16.mxu0 %v9448_v57  ;;  %7097 = vmatprep.subr.bf16.mxu1 %v9409_v22 }
 0x979   :  { %7073 = vmatpush1.bf16.msra.mxu0 %v9449_v6  ;;  %7099 = vmatpush3.bf16.msra.mxu1 %v8256_v43 }
 0x97a   :  { %7075 = vmatprep.subr.bf16.mxu0 %v8260_v54  ;;  %7100 = vmatprep.subr.bf16.mxu1 %v9409_v22 }
 0x97d   :  { %7077 = vmatpush1.bf16.msra.mxu0 %v8264_v29  ;;  %7102 = vmatpush3.bf16.msra.mxu1 %v8266_v28 }
 0x97e   :  { %7079 = vmatprep.subr.bf16.mxu0 %v8270_v36  ;;  %7103 = vmatprep.subr.bf16.mxu1 %v9409_v22 }
 0x981   :  { %7081 = vmatpush1.bf16.msra.mxu0 %v8274_v8  ;;  %7105 = vmatpush3.bf16.msra.mxu1 %v8276_v0 }
 0x982   :  { %7107 = vmatprep.subr.bf16.mxu0 %v7975_v9  ;;  %7138 = vmatprep.subr.bf16.mxu1 %v9409_v22  ;;  %v9626_v9 = vld [vmem:[#allocation23_spill] sm:$0xff] }
 0x984   :  { %3774 = vmatmul.mubr.f32.vlgmr.msra.gmra.mrb[28].mxu0 %v9012_v19  ;;  %5724 = vmatmul.mubr.f32.vlgmr.msra.gmra.mrb[48].mxu1 %v9012_v19 }
 0x985   :  { %7109 = vmatpush1.bf16.msra.mxu0 %v7977_v17  ;;  %7140 = vmatpush3.bf16.msra.mxu1 %v7998_v41  ;;  %v9627_v17 = vld [vmem:[#allocation29_spill] sm:$0xff]  ;;  %v9633_v41 = vld [vmem:[#allocation32_spill] sm:$0xff] }
 0x986   :  { %7111 = vmatprep.subr.bf16.mxu0 %v7980_v18  ;;  %7141 = vmatprep.subr.bf16.mxu1 %v9409_v22  ;;  %v9628_v18 = vld [vmem:[#allocation24_spill] sm:$0xff] }
 0x987   :  { %3934 = vmatprep.mubr.f32.mxu0 %v9411_v21  ;;  %5758 = vmatprep.mubr.msk.f32.mxu1 %vm7793_vm0, %v9411_v21 }
 0x989   :  { %7113 = vmatpush1.bf16.msra.mxu0 %v7985_v25  ;;  %7143 = vmatpush3.bf16.msra.mxu1 %v8008_v51  ;;  %v9629_v25 = vld [vmem:[#allocation25_spill] sm:$0xff] }
 0x98a   :  { %7115 = vmatprep.subr.bf16.mxu0 %v7988_v26  ;;  %7144 = vmatprep.subr.bf16.mxu1 %v9409_v22  ;;  %v9630_v26 = vld [vmem:[#allocation31_spill] sm:$0xff]  ;;  %v9636_v51 = vld [vmem:[#allocation33_spill] sm:$0xff] }
 0x98d   :  { %7117 = vmatpush1.bf16.msra.mxu0 %v7992_v34  ;;  %7146 = vmatpush3.bf16.msra.mxu1 %v8019_v61  ;;  %v9631_v34 = vld [vmem:[#allocation26_spill] sm:$0xff] }
 0x98e   :  { %7119 = vmatprep.subr.bf16.mxu0 %v7995_v35  ;;  %7147 = vmatprep.subr.bf16.mxu1 %v9409_v22  ;;  %v9632_v35 = vld [vmem:[#allocation27_spill] sm:$0xff]  ;;  %v9637_v61 = vld [vmem:[#allocation34_spill] sm:$0xff] }
 0x991   :  { %7121 = vmatpush1.bf16.msra.mxu0 %v8002_v45  ;;  %7149 = vmatpush3.bf16.msra.mxu1 %v8030_v10  ;;  %v9634_v45 = vld [vmem:[#allocation28_spill] sm:$0xff]  ;;  %v9638_v10 = vld [vmem:[#allocation35_spill] sm:$0xff] }
 0x992   :  { %7123 = vmatprep.subr.bf16.mxu0 %v8005_v46  ;;  %7150 = vmatprep.subr.bf16.mxu1 %v9409_v22  ;;  %v9635_v46 = vld [vmem:[#allocation30_spill] sm:$0xff] }
 0x995   :  { %7125 = vmatpush1.bf16.msra.mxu0 %v9626_v9  ;;  %7152 = vmatpush3.bf16.msra.mxu1 %v9627_v17  ;;  %v9657_v9 = vld [vmem:[#allocation54_spill] sm:$0xff]  ;;  %v9658_v17 = vld [vmem:[#allocation55_spill] sm:$0xff] }
 0x996   :  { %7127 = vmatprep.subr.bf16.mxu0 %v9628_v18  ;;  %7153 = vmatprep.subr.bf16.mxu1 %v9409_v22  ;;  %v9659_v18 = vld [vmem:[#allocation56_spill] sm:$0xff] }
 0x999   :  { %7129 = vmatpush1.bf16.msra.mxu0 %v9629_v25  ;;  %7155 = vmatpush3.bf16.msra.mxu1 %v9630_v26  ;;  %v9660_v25 = vld [vmem:[#allocation57_spill] sm:$0xff]  ;;  %v9661_v26 = vld [vmem:[#allocation58_spill] sm:$0xff] }
 0x99a   :  { %7131 = vmatprep.subr.bf16.mxu0 %v9631_v34  ;;  %7156 = vmatprep.subr.bf16.mxu1 %v9409_v22 }
 0x99d   :  { %7133 = vmatpush1.bf16.msra.mxu0 %v9632_v35  ;;  %7158 = vmatpush3.bf16.msra.mxu1 %v9633_v41 }
 0x99e   :  { %7135 = vmatprep.subr.bf16.mxu0 %v9634_v45  ;;  %7159 = vmatprep.subr.bf16.mxu1 %v9409_v22 }
 0x9a1   :  { %7137 = vmatpush1.bf16.msra.mxu0 %v9635_v46  ;;  %7161 = vmatpush3.bf16.msra.mxu1 %v9636_v51  ;;  %v9662_v46 = vld [vmem:[#allocation65_spill] sm:$0xff] }
 0x9a2   :  { %7163 = vmatprep.subr.bf16.mxu0 %v9637_v61  ;;  %7194 = vmatprep.subr.bf16.mxu1 %v9409_v22 }
 0x9a4   :  { %3935 = vmatmul.mubr.f32.vlgmr.msra.gmra.mrb[14].mxu0 %v9017_v31  ;;  %5759 = vmatmul.mubr.f32.vlgmr.msra.gmra.mrb[50].mxu1 %v9017_v31 }
 0x9a5   :  { %7165 = vmatpush1.bf16.msra.mxu0 %v9638_v10  ;;  %7196 = vmatpush3.bf16.msra.mxu1 %v9639_v55 }
 0x9a6   :  { %7167 = vmatprep.subr.bf16.mxu0 %v9640_v15  ;;  %7197 = vmatprep.subr.bf16.mxu1 %v9409_v22 }
 0x9a7   :  { %4095 = vmatprep.mubr.f32.mxu0 %v9411_v21  ;;  %5793 = vmatprep.mubr.msk.f32.mxu1 %vm7793_vm0, %v9411_v21 }
 0x9a9   :  { %7169 = vmatpush1.bf16.msra.mxu0 %v9641_v24  ;;  %7199 = vmatpush3.bf16.msra.mxu1 %v9642_v52 }
 0x9aa   :  { %7171 = vmatprep.subr.bf16.mxu0 %v9643_v56  ;;  %7200 = vmatprep.subr.bf16.mxu1 %v9409_v22 }
 0x9ad   :  { %7173 = vmatpush1.bf16.msra.mxu0 %v9644_v1  ;;  %7202 = vmatpush3.bf16.msra.mxu1 %v9645_v38 }
 0x9ae   :  { %7175 = vmatprep.subr.bf16.mxu0 %v9646_v23  ;;  %7203 = vmatprep.subr.bf16.mxu1 %v9409_v22 }
 0x9b1   :  { %7177 = vmatpush1.bf16.msra.mxu0 %v9647_v33  ;;  %7205 = vmatpush3.bf16.msra.mxu1 %v9648_v20 }
 0x9b2   :  { %7179 = vmatprep.subr.bf16.mxu0 %v9649_v30  ;;  %7206 = vmatprep.subr.bf16.mxu1 %v9409_v22 }
 0x9b5   :  { %7181 = vmatpush1.bf16.msra.mxu0 %v9650_v13  ;;  %7208 = vmatpush3.bf16.msra.mxu1 %v9651_v44 }
 0x9b6   :  { %7183 = vmatprep.subr.bf16.mxu0 %v9652_v2  ;;  %7209 = vmatprep.subr.bf16.mxu1 %v9409_v22 }
 0x9b9   :  { %7185 = vmatpush1.bf16.msra.mxu0 %v9653_v27  ;;  %7211 = vmatpush3.bf16.msra.mxu1 %v9654_v63 }
 0x9ba   :  { %7187 = vmatprep.subr.bf16.mxu0 %v9655_v4  ;;  %7212 = vmatprep.subr.bf16.mxu1 %v9409_v22 }
 0x9bd   :  { %7189 = vmatpush1.bf16.msra.mxu0 %v9656_v60  ;;  %7214 = vmatpush3.bf16.msra.mxu1 %v9657_v9 }
 0x9be   :  { %7191 = vmatprep.subr.bf16.mxu0 %v9658_v17  ;;  %7215 = vmatprep.subr.bf16.mxu1 %v9409_v22 }
 0x9c1   :  { %7193 = vmatpush1.bf16.msra.mxu0 %v9659_v18  ;;  %7217 = vmatpush3.bf16.msra.mxu1 %v9660_v25 }
 0x9c2   :  { %7219 = vmatprep.subr.bf16.mxu0 %v9661_v26  ;;  %7250 = vmatprep.subr.bf16.mxu1 %v9409_v22 }
 0xa37   :  { %v3705_v34 = vpop.f32.mrb[46].mxu1 }
 0xa38   :  { %v5690_v35 = vpop.f32.mrb[47].mxu1  ;;  %v3706_v33 = vadd.f32 %v3705_v34, %v8380_v14 }
 0xa57   :  { %v3775_v41 = vpop.f32.mrb[28].mxu0  ;;  %v3846_v45 = vpop.f32.mrb[48].mxu1 }
 0xa58   :  { %v7355_v51 = vadd.f32 %v9662_v46, %v3775_v41  ;;  %v3777_v61 = vpop.f32.mrb[29].mxu0  ;;  %v5725_v10 = vpop.f32.mrb[49].mxu1  ;;  %v3847_v38 = vadd.f32 %v3846_v45, %v9472_v58 }
 0xa59   :  { %v7357_v15 = vadd.f32 %v9471_v48, %v3777_v61 }
 0xa5a   :  { %v4491_v55 = vmul.f32 -1.442695, %v7355_v51 }
 0xa5b   :  { %v4492_v24 = vmul.f32 -1.442695, %v7357_v15 }
 0xa5c   :  { %7540 = vpow2.f32 %v4491_v55  ;;  %v9663_v55 = vld [vmem:[#allocation66_spill] sm:$0xff] }
 0xa5d   :  { %7542 = vpow2.f32 %v4492_v24 }
 0xa66   :  { %v7541_v52 = vpop.eup %7540 }
 0xa67   :  { %v3854_v56 = vadd.f32 1.0, %v7541_v52  ;;  %v7543_v1 = vpop.eup %7542 }
 0xa68   :  { %v3861_v13 = vadd.f32 1.0, %v7543_v1 }
 0xa69   :  { %7544 = vrcp.f32 %v3854_v56 }
 0xa73   :  { %v7545_v23 = vpop.eup %7544 }
 0xa74   :  { %v3864_v20 = vmul.f32 %v7545_v23, %v3847_v38 }
 0xa76   :  { %v3865_v30 = vadd.f32 %v3864_v20, %v3706_v33 }
 0xa77   :  { %v3936_v44 = vpop.f32.mrb[14].mxu0  ;;  %v4007_v2 = vpop.f32.mrb[50].mxu1 }
 0xa78   :  { %7546 = vtanh.f32 %v3865_v30  ;;  %v7327_v27 = vadd.f32 %v9433_v7, %v3936_v44  ;;  %v3938_v63 = vpop.f32.mrb[15].mxu0  ;;  %v5760_v4 = vpop.f32.mrb[51].mxu1  ;;  %v4008_v51 = vadd.f32 %v4007_v2, %v9435_v37 }
 0xa79   :  { %7548 = vrcp.f32 %v3861_v13  ;;  %v7329_v9 = vadd.f32 %v9434_v42, %v3938_v63 }
 0xa7a   :  { %v4493_v60 = vmul.f32 -1.442695, %v7327_v27 }
 0xa7b   :  { %v4494_v26 = vmul.f32 -1.442695, %v7329_v9 }
 0xa7c   :  { %7550 = vpow2.f32 %v4493_v60 }
 0xa7d   :  { %7552 = vpow2.f32 %v4494_v26 }
 0xa82   :  { %v7547_v17 = vpop.eup %7546 }
 0xa83   :  { %v3867_v18 = vsub.f32 %v9012_v19, %v7547_v17  ;;  %v7549_v25 = vpop.eup %7548 }
 0xa85   :  { %v3868_v34 = vmul.f32 %v7549_v25, %v3867_v18 }
 0xa86   :  { %v7551_v35 = vpop.eup %7550 }
 0xa87   :  { %v4015_v41 = vadd.f32 1.0, %v7551_v35  ;;  %v9137_v45 = vadd.f32 %v7547_v17, %v3868_v34  ;;  %v7553_v7 = vpop.eup %7552 }
 0xa88   :  { %v4022_v42 = vadd.f32 1.0, %v7553_v7 }
 0xa89   :  { %7554 = vrcp.f32 %v4015_v41 }
 0xa93   :  { %v7555_v61 = vpop.eup %7554 }
 0xa94   :  { %v4025_v10 = vmul.f32 %v7555_v61, %v4008_v51 }
 0xa96   :  { %v4026_v15 = vadd.f32 %v4025_v10, %v9663_v55 }
 0xa98   :  { %7556 = vtanh.f32 %v4026_v15 }
 0xa99   :  { %7558 = vrcp.f32 %v4022_v42 }
 0xaa2   :  { %v7557_v19 = vpop.eup %7556 }
 0xaa3   :  { %v4028_v24 = vsub.f32 %v9017_v31, %v7557_v19  ;;  %v7559_v52 = vpop.eup %7558 }
 0xaa5   :  { %v4029_v56 = vmul.f32 %v7559_v52, %v4028_v24 }
 0xaa7   :  { %v4030_v1 = vadd.f32 %v7557_v19, %v4029_v56 }
 0xaa9   :  { %4096 = vmatmul.mubr.f32.vlgmr.msra.gmra.mrb[30].mxu0 %v4030_v1  ;;  %4333 = vst [vmem:[#allocation15] sm:$0xff] %v4030_v1  ;;  %5794 = vmatmul.mubr.f32.vlgmr.msra.gmra.mrb[52].mxu1 %v4030_v1 }
 0xaaa   :  { %7221 = vmatpush1.bf16.msra.mxu0 %v8199_v39  ;;  %7252 = vmatpush3.bf16.msra.mxu1 %v9437_v16  ;;  %v4337_v39 = vld [vmem:[#allocation13] sm:$0xff] }
 0xaab   :  { %7223 = vmatprep.subr.bf16.mxu0 %v9438_v32  ;;  %7253 = vmatprep.subr.bf16.mxu1 %v9409_v22  ;;  %v4345_v16 = vld [vmem:[#allocation13 + $0x40] sm:$0xff]  ;;  %v4346_v32 = vld [vmem:[#allocation13 + $0x48] sm:$0xff] }
 0xaac   :  { %4236 = vmatprep.mubr.f32.mxu0 %v9411_v21  ;;  %5828 = vmatprep.mubr.msk.f32.mxu1 %vm7793_vm0, %v9411_v21 }
 0xaae   :  { %7225 = vmatpush1.bf16.msra.mxu0 %v9439_v53  ;;  %7255 = vmatpush3.bf16.msra.mxu1 %v9440_v3  ;;  %v7287_v53 = vpack.c.bf16 %v4346_v32, %v4345_v16  ;;  %v4347_v3 = vld [vmem:[#allocation13 + $0x50] sm:$0xff] }
 0xaaf   :  { %7227 = vmatprep.subr.bf16.mxu0 %v9441_v50  ;;  %7256 = vmatprep.subr.bf16.mxu1 %v9409_v22  ;;  %v4348_v50 = vld [vmem:[#allocation13 + $0x58] sm:$0xff] }
 0xab2   :  { %7229 = vmatpush1.bf16.msra.mxu0 %v9442_v59  ;;  %7258 = vmatpush3.bf16.msra.mxu1 %v9443_v47  ;;  %v7290_v59 = vpack.c.bf16 %v4348_v50, %v4347_v3  ;;  %v4349_v47 = vld [vmem:[#allocation13 + $0x60] sm:$0xff] }
 0xab3   :  { %7231 = vmatprep.subr.bf16.mxu0 %v9444_v11  ;;  %7259 = vmatprep.subr.bf16.mxu1 %v9409_v22  ;;  %v4350_v11 = vld [vmem:[#allocation13 + $0x68] sm:$0xff] }
 0xab6   :  { %7233 = vmatpush1.bf16.msra.mxu0 %v9445_v49  ;;  %7261 = vmatpush3.bf16.msra.mxu1 %v9446_v12  ;;  %v7293_v49 = vpack.c.bf16 %v4350_v11, %v4349_v47  ;;  %v4351_v12 = vld [vmem:[#allocation13 + $0x70] sm:$0xff] }
 0xab7   :  { %7235 = vmatprep.subr.bf16.mxu0 %v9447_v5  ;;  %7262 = vmatprep.subr.bf16.mxu1 %v9409_v22  ;;  %v4352_v5 = vld [vmem:[#allocation13 + $0x78] sm:$0xff] }
 0xaba   :  { %7237 = vmatpush1.bf16.msra.mxu0 %v8244_v40  ;;  %7264 = vmatpush3.bf16.msra.mxu1 %v8246_v62  ;;  %v4338_v40 = vld [vmem:[#allocation13 + $0x8] sm:$0xff] }
 0xabb   :  { %7239 = vmatprep.subr.bf16.mxu0 %v9448_v57  ;;  %7265 = vmatprep.subr.bf16.mxu1 %v9409_v22  ;;  %v7275_v62 = vpack.c.bf16 %v4338_v40, %v4337_v39  ;;  %v7296_v57 = vpack.c.bf16 %v4352_v5, %v4351_v12 }
 0xabe   :  { %7241 = vmatpush1.bf16.msra.mxu0 %v9449_v6  ;;  %7267 = vmatpush3.bf16.msra.mxu1 %v8256_v43  ;;  %v4339_v43 = vld [vmem:[#allocation13 + $0x10] sm:$0xff] }
 0xabf   :  { %7243 = vmatprep.subr.bf16.mxu0 %v8260_v54  ;;  %7268 = vmatprep.subr.bf16.mxu1 %v9409_v22  ;;  %v4340_v54 = vld [vmem:[#allocation13 + $0x18] sm:$0xff] }
 0xac2   :  { %7245 = vmatpush1.bf16.msra.mxu0 %v8264_v29  ;;  %7270 = vmatpush3.bf16.msra.mxu1 %v8266_v28  ;;  %v4341_v29 = vld [vmem:[#allocation13 + $0x20] sm:$0xff]  ;;  %v4342_v28 = vld [vmem:[#allocation13 + $0x28] sm:$0xff] }
 0xac3   :  { %7247 = vmatprep.subr.bf16.mxu0 %v8270_v36  ;;  %7271 = vmatprep.subr.bf16.mxu1 %v9409_v22  ;;  %v7281_v36 = vpack.c.bf16 %v4342_v28, %v4341_v29 }
 0xac6   :  { %7249 = vmatpush1.bf16.msra.mxu0 %v8274_v8  ;;  %7273 = vmatpush3.bf16.msra.mxu1 %v8276_v0  ;;  %v7278_v8 = vpack.c.bf16 %v4340_v54, %v4339_v43  ;;  %v4343_v0 = vld [vmem:[#allocation13 + $0x30] sm:$0xff] }
 0xac7   :  { %7274 = vmatprep.subr.bf16.mxu0 %v9409_v22 }
 0xac9   :  { %4237 = vmatmul.mubr.f32.vlgmr.msra.gmra.mrb[30].mxu0 %v9137_v45  ;;  %5829 = vmatmul.mubr.f32.vlgmr.msra.gmra.mrb[54].mxu1 %v9137_v45 }
 0xaca   :  { %5863 = vmatprep.mubr.msk.f32.mxu0 %vm7793_vm0, %v9411_v21  ;;  %7276 = vmatpush3.bf16.msra.mxu0 %v7275_v62  ;;  %v4344_v21 = vld [vmem:[#allocation13 + $0x38] sm:$0xff] }
 0xacb   :  { %7277 = vmatprep.subr.bf16.mxu0 %v9409_v22  ;;  %v7284_v37 = vpack.c.bf16 %v4344_v21, %v4343_v0 }
 0xace   :  { %7279 = vmatpush3.bf16.msra.mxu0 %v7278_v8 }
 0xacf   :  { %7280 = vmatprep.subr.bf16.mxu0 %v9409_v22 }
 0xad2   :  { %7282 = vmatpush3.bf16.msra.mxu0 %v7281_v36 }
 0xad3   :  { %7283 = vmatprep.subr.bf16.mxu0 %v9409_v22 }
 0xad6   :  { %7285 = vmatpush3.bf16.msra.mxu0 %v7284_v37 }
 0xad7   :  { %7286 = vmatprep.subr.bf16.mxu0 %v9409_v22 }
 0xada   :  { %7288 = vmatpush3.bf16.msra.mxu0 %v7287_v53 }
 0xadb   :  { %7289 = vmatprep.subr.bf16.mxu0 %v9409_v22 }
 0xade   :  { %7291 = vmatpush3.bf16.msra.mxu0 %v7290_v59 }
 0xadf   :  { %7292 = vmatprep.subr.bf16.mxu0 %v9409_v22 }
 0xae2   :  { %7294 = vmatpush3.bf16.msra.mxu0 %v7293_v49 }
 0xae3   :  { %7295 = vmatprep.subr.bf16.mxu0 %v9409_v22 }
 0xae6   :  { %7297 = vmatpush3.bf16.msra.mxu0 %v7296_v57 }
 0xb7c   :  { %v4168_v6 = vpop.f32.mrb[52].mxu1 }
 0xb7d   :  { %v5795_v31 = vpop.f32.mrb[53].mxu1  ;;  %v4169_v9 = vadd.f32 %v4168_v6, %v8380_v14 }
 0xb9c   :  { %v4238_v38 = vpop.f32.mrb[30].mxu0  ;;  %v4309_v23 = vpop.f32.mrb[54].mxu1 }
 0xb9d   :  { %v7359_v33 = vadd.f32 %v9662_v46, %v4238_v38  ;;  %v4240_v20 = vpop.f32.mrb[31].mxu0  ;;  %v5830_v30 = vpop.f32.mrb[55].mxu1  ;;  %v4310_v22 = vadd.f32 %v4309_v23, %v9472_v58 }
 0xb9e   :  { %v7361_v44 = vadd.f32 %v9471_v48, %v4240_v20 }
 0xb9f   :  { %v4495_v13 = vmul.f32 -1.442695, %v7359_v33 }
 0xba0   :  { %v4496_v2 = vmul.f32 -1.442695, %v7361_v44 }
 0xba1   :  { %7560 = vpow2.f32 %v4495_v13 }
 0xba2   :  { %7562 = vpow2.f32 %v4496_v2 }
 0xbab   :  { %v7561_v27 = vpop.eup %7560 }
 0xbac   :  { %v4317_v63 = vadd.f32 1.0, %v7561_v27  ;;  %v7563_v4 = vpop.eup %7562 }
 0xbad   :  { %v4324_v46 = vadd.f32 1.0, %v7563_v4 }
 0xbae   :  { %7564 = vrcp.f32 %v4317_v63 }
 0xbb8   :  { %v7565_v60 = vpop.eup %7564 }
 0xbb9   :  { %v4327_v17 = vmul.f32 %v7565_v60, %v4310_v22 }
 0xbbb   :  { %v4328_v18 = vadd.f32 %v4327_v17, %v4169_v9 }
 0xbbd   :  { %7566 = vtanh.f32 %v4328_v18 }
 0xbbe   :  { %7568 = vrcp.f32 %v4324_v46 }
 0xbc7   :  { %v7567_v25 = vpop.eup %7566 }
 0xbc8   :  { %v4330_v26 = vsub.f32 %v9137_v45, %v7567_v25  ;;  %v7569_v48 = vpop.eup %7568 }
 0xbca   :  { %v4331_v34 = vmul.f32 %v7569_v48, %v4330_v26 }
 0xbcc   :  { %v4332_v35 = vadd.f32 %v7567_v25, %v4331_v34 }
 0xbce   :  { %v4336_v41 = vmax.f32 %v4332_v35, 0.0  ;;  %4335 = vst [vmem:[#allocation15 + $0x8] sm:$0xff] %v4332_v35 }
 0xbd0   :  { %5864 = vmatmul.mubr.f32.vlgmr.msra.gmra.mrb[32].mxu0 %v4336_v41 }
 0xbd1   :  { %7735 = shalt.err (!%p7732_p4)
}
 0xbd2   :  { %s7736_s2 = scalar_lea.hbm %s9235_s13, 256 }
 0xbd3   :  { %p7737_p5 = scmp.ne.s32.totalorder %s9235_s13, %s7736_s2  ;;  %p7740_p6 = scmp.lt.u32.totalorder %s7736_s2, %s9235_s13 }
 0xbd5   :  { %p7742_p7 = pnand %p7740_p6, %p7737_p5 }
 0xbd7   :  { %7745 = shalt.err (!%p7742_p7)
}
 0xbd8   :  { %4452 = dma.vmem_to_hbm [thread:$0]  %s4447_s9, 256, %s9235_s13, [#allocation16], %s7781_s18, %s7781_s18, %s7782_s19  }
 0xbd9   :  { %v4497_v58 = vld [vmem:[%s9233_s11] ss:$0 sm:$0xff]  ;;  %s7795_s25 = smov [#allocation14]  }
 0xbda   :  { %s4437_s15 = sshll.u32 %s7795_s25, 4  ;;  %s4438_s15 = int_to_ptr.vmem [resolvable:$true] %s4437_s15 }
 0xbdb   :  { %s7746_s6 = scalar_lea.vmem %s4438_s15, 128  ;;  %p7751_p9 = scmp.lt.s32.totalorder %s4438_s15, %s4438_s15 }
 0xbdc   :  { %p7747_p8 = scmp.ne.s32.totalorder %s4438_s15, %s7746_s6  ;;  %p7752_p10 = scmp.lt.s32.totalorder %s7746_s6, %s7746_s6 }
 0xbde   :  { %p7753_p11 = por %p7752_p10, %p7751_p9 }
 0xbe0   :  { %p7754_p12 = pnand %p7753_p11, %p7747_p8 }
 0xca3   :  { %v4426_v14 = vpop.f32.mrb[32].mxu0 }
 0xca4   :  { %v4427_v45 = vadd.f32 %v4497_v58, %v4426_v14  ;;  %v5865_v7 = vpop.f32.mrb[33].mxu0 }
 0xca6   :  { %4430 = vst [vmem:[#allocation14] sm:$0xff] %v4427_v45 }
 0xca7   :  { %7757 = shalt.err (!%p7754_p12)
}
 0xca8   :  { %s7758_s18 = scalar_lea.hbm %s9234_s12, 128 }
 0xca9   :  { %p7759_p13 = scmp.ne.s32.totalorder %s9234_s12, %s7758_s18  ;;  %p7762_p0 = scmp.lt.u32.totalorder %s7758_s18, %s9234_s12 }
 0xcab   :  { %p7764_p1 = pnand %p7762_p0, %p7759_p13 }
 0xcad   :  { %7767 = shalt.err (!%p7764_p1)
}
 0xcae   :  { %4440 = dma.vmem_to_hbm [thread:$0]  %s4438_s15, 128, %s9234_s12, [#allocation4]  }
 0xcaf   :  { %7776 = dma.done.wait [#allocation4], 128  }
 0xcb0   :  { %7777 = vsyncadd [#allocation4], 4294967168 }
 0xcb1   :  { %7778 = dma.done.wait [#allocation16], 256  }
 0xcb2   :  { %7779 = vsyncadd [#allocation16], 4294967040 }
 0xcb3   :  { %4459 = vsyncpa [#allocation3], 1 }
 0xcb4   :  { %4460 = vsyncpa [#allocation6], 1 }
 0xcb5   :  { %4461 = vsyncpa [#allocation9], 1 }
 0xcb6   :  { %4462 = vsyncpa [#allocation12], 1 }
 0xcb7   :  { %4463 = vsyncpa [#allocation4], 1 }
 0xcb8   :  { %4464 = vsyncpa [#allocation16], 1 }

</bundles_post_ra>
